<compile_context>
chip_gen: v6e
topology: v6e:2x2x1
jax: 0.10.0
libtpu: 0.0.40
codegen_flags: <defaults>
</compile_context>

<pallas_src>
import functools

import jax
import jax.numpy as jnp
from jax import lax
from jax.experimental import pallas as pl
from jax.experimental.pallas import tpu as pltpu


_LANES = 128
_SUBLANES = 8
_ALIGN = _SUBLANES * _LANES        # 1024: zero-copy reshape granularity
_RGB_TILE_ROWS = 2048              # (2048,128) f32    = 1.0 MiB per buffer
_EIK_TILE_ROWS = 1024              # (3,1024,128) f32  = 1.5 MiB per buffer
_NUM_CORES = 2                     # v7x megacore split; harmless on v5e/v6e


def _round_up(x, m):
    return (x + m - 1) // m * m


def _lane_dense(flat):
    """(L,) -> (rows, 128) with rows % 8 == 0.

    Zero-copy (bitcast reshape) when L % 1024 == 0; otherwise one fused
    pad+reshape copy.  Pad/garbage tail is masked in-kernel, so the pad value
    is irrelevant (zeros used).
    """
    total = flat.shape[0]
    padded = _round_up(max(total, 1), _ALIGN)
    if padded != total:
        flat = jnp.pad(flat, (0, padded - total))
    return flat.reshape(padded // _LANES, _LANES)


def _fused_loss_kernel(rgb_v_ref, rgb_gt_ref, g_ref, rgb_acc_ref, eik_acc_ref,
                       *, tiles_per_core, n_rgb_tiles, n_eik_tiles,
                       rgb_count, eik_count, rgb_tr, eik_tr):
    c = pl.program_id(0)                       # core / partial-sum index
    t = pl.program_id(1)                       # reduction step within the core
    g = c * tiles_per_core + t                 # global tile index

    @pl.when(t == 0)
    def _init():
        rgb_acc_ref[...] = jnp.zeros_like(rgb_acc_ref)
        eik_acc_ref[...] = jnp.zeros_like(eik_acc_ref)

    @pl.when(g < n_rgb_tiles)
    def _rgb():
        row = lax.broadcasted_iota(jnp.int32, (rgb_tr, _LANES), 0)
        col = lax.broadcasted_iota(jnp.int32, (rgb_tr, _LANES), 1)
        idx = g * (rgb_tr * _LANES) + row * _LANES + col
        gt = (rgb_gt_ref[...] + 1.0) * 0.5                 # fold gt rescale in-kernel
        l1 = jnp.abs(rgb_v_ref[...] - gt)
        contrib = jnp.where(idx < rgb_count, l1, 0.0)      # mask pad / OOB garbage
        folded = contrib.reshape(rgb_tr // _SUBLANES, _SUBLANES, _LANES).sum(axis=0)
        rgb_acc_ref[0] += folded                           # pure VPU accumulation

    @pl.when(g < n_eik_tiles)
    def _eik():
        row = lax.broadcasted_iota(jnp.int32, (eik_tr, _LANES), 0)
        col = lax.broadcasted_iota(jnp.int32, (eik_tr, _LANES), 1)
        idx = g * (eik_tr * _LANES) + row * _LANES + col
        gx = g_ref[0]
        gy = g_ref[1]
        gz = g_ref[2]
        sq = gx * gx + gy * gy + gz * gz                   # VPU; no XLU axis-1 reduce
        err = jnp.sqrt(sq) - 1.0                           # EUP slot
        contrib = jnp.where(idx < eik_count, err * err, 0.0)
        folded = contrib.reshape(eik_tr // _SUBLANES, _SUBLANES, _LANES).sum(axis=0)
        eik_acc_ref[0] += folded


def _neus_loss_impl(rgb_values, rgb_gt_raw, grad_theta, eikonal_weight):
    rgb_values = rgb_values.astype(jnp.float32)
    grad_theta = grad_theta.astype(jnp.float32)
    rgb_gt = jnp.squeeze(rgb_gt_raw.astype(jnp.float32)).reshape(-1, 3)

    n_elems = rgb_values.size                  # N * 3 (static)
    assert rgb_gt.size == n_elems, "rgb_values / rgb_gt element count mismatch"
    m_pts = grad_theta.shape[0]                # M (static)

    # ---- rgb: lane-dense views (zero-copy when N*3 % 1024 == 0). ----
    rgb_v2d = _lane_dense(rgb_values.reshape(-1))
    rgb_gt2d = _lane_dense(rgb_gt.reshape(-1))
    rgb_rows = rgb_v2d.shape[0]
    rgb_tr = min(_RGB_TILE_ROWS, rgb_rows)
    n_rgb_tiles = pl.cdiv(rgb_rows, rgb_tr)

    # ---- grad: ONE fused pad+transpose+reshape -> (3, rowsM, 128) slab. ----
    m_padded = _round_up(max(m_pts, 1), _ALIGN)
    grad_p = grad_theta
    if m_padded != m_pts:
        grad_p = jnp.pad(grad_theta, ((0, m_padded - m_pts), (0, 0)))
    grad3d = grad_p.T.reshape(3, m_padded // _LANES, _LANES)
    eik_rows = grad3d.shape[1]
    eik_tr = min(_EIK_TILE_ROWS, eik_rows)
    n_eik_tiles = pl.cdiv(eik_rows, eik_tr)

    tiles_per_core = pl.cdiv(max(n_rgb_tiles, n_eik_tiles), _NUM_CORES)

    kernel = functools.partial(
        _fused_loss_kernel,
        tiles_per_core=tiles_per_core,
        n_rgb_tiles=n_rgb_tiles, n_eik_tiles=n_eik_tiles,
        rgb_count=n_elems, eik_count=m_pts,
        rgb_tr=rgb_tr, eik_tr=eik_tr)

    def rgb_map(c, t):
        return (jnp.minimum(c * tiles_per_core + t, n_rgb_tiles - 1), 0)

    def eik_map(c, t):
        return (0, jnp.minimum(c * tiles_per_core + t, n_eik_tiles - 1), 0)

    rgb_acc, eik_acc = pl.pallas_call(
        kernel,
        out_shape=(
            jax.ShapeDtypeStruct((_NUM_CORES, _SUBLANES, _LANES), jnp.float32),
            jax.ShapeDtypeStruct((_NUM_CORES, _SUBLANES, _LANES), jnp.float32),
        ),
        grid_spec=pltpu.PrefetchScalarGridSpec(
            num_scalar_prefetch=0,
            grid=(_NUM_CORES, tiles_per_core),
            in_specs=[
                pl.BlockSpec((rgb_tr, _LANES), rgb_map),
                pl.BlockSpec((rgb_tr, _LANES), rgb_map),
                pl.BlockSpec((3, eik_tr, _LANES), eik_map),
            ],
            out_specs=[
                pl.BlockSpec((1, _SUBLANES, _LANES), lambda c, t: (c, 0, 0)),
                pl.BlockSpec((1, _SUBLANES, _LANES), lambda c, t: (c, 0, 0)),
            ],
        ),
        compiler_params=pltpu.CompilerParams(
            dimension_semantics=("parallel", "arbitrary")),
    )(rgb_v2d, rgb_gt2d, grad3d)

    rgb_loss = jnp.sum(rgb_acc) / float(n_elems)
    eik_loss = jnp.sum(eik_acc) / float(max(m_pts, 1))   # exactly 0.0 when M == 0
    loss = rgb_loss + eikonal_weight * eik_loss
    return {'loss': loss, 'rgb_loss': rgb_loss, 'eikonal_loss': eik_loss}


_neus_loss_jit = jax.jit(_neus_loss_impl)


def neus_loss(model_outputs, ground_truth, *, eikonal_weight,
              mask_weight=0.0, alpha=0.0):
    """Pallas implementation of NeuSLoss.forward."""
    del mask_weight, alpha   # present in torch __init__ but unused in forward
    return _neus_loss_jit(
        jnp.asarray(model_outputs['rgb_values']),
        jnp.asarray(ground_truth['rgb']),
        jnp.asarray(model_outputs['grad_theta']),
        jnp.float32(eikonal_weight))


def _reference(rgb_values, rgb_gt_raw, grad_theta, eikonal_weight):
    rgb_values = jnp.asarray(rgb_values, jnp.float32)
    grad_theta = jnp.asarray(grad_theta, jnp.float32)
    rgb_gt = jnp.squeeze(jnp.asarray(rgb_gt_raw, jnp.float32)).reshape(-1, 3)
    rgb_gt = (rgb_gt + 1.0) / 2.0
    rgb_loss = jnp.mean(jnp.abs(rgb_values - rgb_gt))
    if grad_theta.shape[0]:
        eik = jnp.mean((jnp.linalg.norm(grad_theta, axis=1) - 1.0) ** 2)
    else:
        eik = jnp.float32(0.0)
    return rgb_loss + eikonal_weight * eik, rgb_loss, eik


if __name__ == "__main__":
    # Loss hyper-parameters (from the torch module's __init__).
    eikonal_weight = 0.1
    mask_weight = 0.0
    alpha = 50.0

    # (N rays, M eikonal points):
    #   (1024, 768)    -> zero-copy lane-aligned rgb path
    #   (200, 0)       -> tail masking + empty grad_theta branch (eik == 0)
    #   (2048, 300000) -> multi-tile reduction + 2-partial (core) split + clamping
    cases = [(1024, 768), (200, 0), (2048, 300_000)]

    key = jax.random.PRNGKey(0)
    for n_rays, m_pts in cases:
        key, k1, k2, k3 = jax.random.split(key, 4)
        model_outputs = {
            'rgb_values': jax.random.uniform(k1, (n_rays, 3), jnp.float32),
            'grad_theta': jax.random.normal(k2, (m_pts, 3), jnp.float32),
        }
        ground_truth = {
            'rgb': jax.random.uniform(k3, (1, n_rays, 3), jnp.float32,
                                      minval=-1.0, maxval=1.0),
        }

        out = neus_loss(model_outputs, ground_truth,
                        eikonal_weight=eikonal_weight,
                        mask_weight=mask_weight, alpha=alpha)
        jax.block_until_ready(out['loss'])

        ref_loss, ref_rgb, ref_eik = _reference(
            model_outputs['rgb_values'], ground_truth['rgb'],
            model_outputs['grad_theta'], eikonal_weight)
        assert jnp.allclose(out['rgb_loss'], ref_rgb, rtol=1e-4, atol=1e-5), (n_rays, m_pts)
        assert jnp.allclose(out['eikonal_loss'], ref_eik, rtol=1e-4, atol=1e-5), (n_rays, m_pts)
        assert jnp.allclose(out['loss'], ref_loss, rtol=1e-4, atol=1e-5), (n_rays, m_pts)

    print("KERNEL_OK")
</pallas_src>

<mosaic_0001>
module attributes {stable_mosaic.version = 11 : i64} {
  func.func @_fused_loss_kernel(%arg0: i32, %arg1: i32, %arg2: memref<24x128xf32, #tpu.memory_space<vmem>>, %arg3: memref<24x128xf32, #tpu.memory_space<vmem>>, %arg4: memref<3x8x128xf32, #tpu.memory_space<vmem>>, %arg5: memref<1x8x128xf32, #tpu.memory_space<vmem>>, %arg6: memref<1x8x128xf32, #tpu.memory_space<vmem>>) attributes {dimension_semantics = [#tpu.dimension_semantics<parallel>, #tpu.dimension_semantics<arbitrary>], iteration_bounds = array<i64: 2, 1>, scalar_prefetch = 0 : i64, scratch_operands = 0 : i64, tpu.core_type = #tpu.core_type<tc>, window_params = [{transform_indices = @transform_0, window_bounds = array<i64: 24, 128>}, {transform_indices = @transform_1, window_bounds = array<i64: 24, 128>}, {transform_indices = @transform_2, window_bounds = array<i64: 3, 8, 128>}, {transform_indices = @transform_3, window_bounds = array<i64: 1, 8, 128>}, {transform_indices = @transform_4, window_bounds = array<i64: 1, 8, 128>}]} {
    %c1_i32 = arith.constant 1 : i32
    %0 = arith.muli %arg0, %c1_i32 : i32
    %1 = arith.addi %0, %arg1 : i32
    %c0_i32 = arith.constant 0 : i32
    %2 = arith.cmpi eq, %arg1, %c0_i32 : i32
    %3 = arith.extui %2 : i1 to i32
    %c0_i32_0 = arith.constant 0 : i32
    %4 = arith.cmpi ne, %3, %c0_i32_0 : i32
    scf.if %4 {
      %cst = arith.constant 0.000000e+00 : f32
      %11 = vector.broadcast %cst : f32 to vector<1x8x128xf32>
      %c0 = arith.constant 0 : index
      %c0_5 = arith.constant 0 : index
      %c0_6 = arith.constant 0 : index
      %12 = vector.load %arg5[%c0, %c0_5, %c0_6] : memref<1x8x128xf32, #tpu.memory_space<vmem>>, vector<1x8x128xf32>
      tpu.vector_store %arg5[%c0, %c0_5, %c0_6], %11 {strides = array<i32>} : memref<1x8x128xf32, #tpu.memory_space<vmem>>, vector<1x8x128xf32>,
      %cst_7 = arith.constant 0.000000e+00 : f32
      %13 = vector.broadcast %cst_7 : f32 to vector<1x8x128xf32>
      %c0_8 = arith.constant 0 : index
      %c0_9 = arith.constant 0 : index
      %c0_10 = arith.constant 0 : index
      %14 = vector.load %arg6[%c0_8, %c0_9, %c0_10] : memref<1x8x128xf32, #tpu.memory_space<vmem>>, vector<1x8x128xf32>
      tpu.vector_store %arg6[%c0_8, %c0_9, %c0_10], %13 {strides = array<i32>} : memref<1x8x128xf32, #tpu.memory_space<vmem>>, vector<1x8x128xf32>,
    } else {
    }
    %c1_i32_1 = arith.constant 1 : i32
    %5 = arith.cmpi slt, %1, %c1_i32_1 : i32
    %6 = arith.extui %5 : i1 to i32
    %c0_i32_2 = arith.constant 0 : i32
    %7 = arith.cmpi ne, %6, %c0_i32_2 : i32
    scf.if %7 {
      %11 = tpu.iota {dimensions = array<i32: 0>} : vector<24x128xi32>
      %12 = tpu.iota {dimensions = array<i32: 1>} : vector<24x128xi32>
      %c3072_i32 = arith.constant 3072 : i32
      %13 = arith.muli %1, %c3072_i32 : i32
      %c128_i32 = arith.constant 128 : i32
      %14 = vector.broadcast %c128_i32 : i32 to vector<24x128xi32>
      %15 = arith.muli %11, %14 : vector<24x128xi32>
      %16 = vector.broadcast %13 : i32 to vector<24x128xi32>
      %17 = arith.addi %16, %15 : vector<24x128xi32>
      %18 = arith.addi %17, %12 : vector<24x128xi32>
      %c0 = arith.constant 0 : index
      %c0_5 = arith.constant 0 : index
      %19 = vector.load %arg3[%c0, %c0_5] : memref<24x128xf32, #tpu.memory_space<vmem>>, vector<24x128xf32>
      %cst = arith.constant 1.000000e+00 : f32
      %20 = vector.broadcast %cst : f32 to vector<24x128xf32>
      %21 = arith.addf %19, %20 : vector<24x128xf32>
      %cst_6 = arith.constant 5.000000e-01 : f32
      %22 = vector.broadcast %cst_6 : f32 to vector<24x128xf32>
      %23 = arith.mulf %21, %22 : vector<24x128xf32>
      %c0_7 = arith.constant 0 : index
      %c0_8 = arith.constant 0 : index
      %24 = vector.load %arg2[%c0_7, %c0_8] : memref<24x128xf32, #tpu.memory_space<vmem>>, vector<24x128xf32>
      %25 = arith.subf %24, %23 : vector<24x128xf32>
      %26 = math.absf %25 : vector<24x128xf32>
      %c3072_i32_9 = arith.constant 3072 : i32
      %27 = vector.broadcast %c3072_i32_9 : i32 to vector<24x128xi32>
      %28 = arith.cmpi slt, %18, %27 : vector<24x128xi32>
      %cst_10 = arith.constant 0.000000e+00 : f32
      %29 = vector.broadcast %cst_10 : f32 to vector<24x128xf32>
      %30 = arith.select %28, %26, %29 : vector<24x128xi1>, vector<24x128xf32>
      %31 = vector.shape_cast %30 : vector<24x128xf32> to vector<3x8x128xf32>
      %cst_11 = arith.constant dense<0.000000e+00> : vector<8x128xf32>
      %32 = vector.multi_reduction <add>, %31, %cst_11 [0] : vector<3x8x128xf32> to vector<8x128xf32>
      %c0_12 = arith.constant 0 : index
      %c0_13 = arith.constant 0 : index
      %c0_14 = arith.constant 0 : index
      %33 = vector.load %arg5[%c0_12, %c0_13, %c0_14] : memref<1x8x128xf32, #tpu.memory_space<vmem>>, vector<1x8x128xf32>
      %34 = vector.shape_cast %33 : vector<1x8x128xf32> to vector<8x128xf32>
      %35 = arith.addf %34, %32 : vector<8x128xf32>
      %c0_15 = arith.constant 0 : index
      %c0_16 = arith.constant 0 : index
      %c0_17 = arith.constant 0 : index
      %36 = vector.load %arg5[%c0_15, %c0_16, %c0_17] : memref<1x8x128xf32, #tpu.memory_space<vmem>>, vector<1x8x128xf32>
      %37 = vector.shape_cast %36 : vector<1x8x128xf32> to vector<8x128xf32>
      %38 = vector.shape_cast %35 : vector<8x128xf32> to vector<1x8x128xf32>
      tpu.vector_store %arg5[%c0_15, %c0_16, %c0_17], %38 {strides = array<i32>} : memref<1x8x128xf32, #tpu.memory_space<vmem>>, vector<1x8x128xf32>,
    } else {
    }
    %c1_i32_3 = arith.constant 1 : i32
    %8 = arith.cmpi slt, %1, %c1_i32_3 : i32
    %9 = arith.extui %8 : i1 to i32
    %c0_i32_4 = arith.constant 0 : i32
    %10 = arith.cmpi ne, %9, %c0_i32_4 : i32
    scf.if %10 {
      %11 = tpu.iota {dimensions = array<i32: 0>} : vector<8x128xi32>
      %12 = tpu.iota {dimensions = array<i32: 1>} : vector<8x128xi32>
      %c1024_i32 = arith.constant 1024 : i32
      %13 = arith.muli %1, %c1024_i32 : i32
      %c128_i32 = arith.constant 128 : i32
      %14 = vector.broadcast %c128_i32 : i32 to vector<8x128xi32>
      %15 = arith.muli %11, %14 : vector<8x128xi32>
      %16 = vector.broadcast %13 : i32 to vector<8x128xi32>
      %17 = arith.addi %16, %15 : vector<8x128xi32>
      %18 = arith.addi %17, %12 : vector<8x128xi32>
      %c0 = arith.constant 0 : index
      %c0_5 = arith.constant 0 : index
      %c0_6 = arith.constant 0 : index
      %19 = vector.load %arg4[%c0, %c0_5, %c0_6] : memref<3x8x128xf32, #tpu.memory_space<vmem>>, vector<1x8x128xf32>
      %20 = vector.shape_cast %19 : vector<1x8x128xf32> to vector<8x128xf32>
      %c1 = arith.constant 1 : index
      %c0_7 = arith.constant 0 : index
      %c0_8 = arith.constant 0 : index
      %21 = vector.load %arg4[%c1, %c0_7, %c0_8] : memref<3x8x128xf32, #tpu.memory_space<vmem>>, vector<1x8x128xf32>
      %22 = vector.shape_cast %21 : vector<1x8x128xf32> to vector<8x128xf32>
      %c2 = arith.constant 2 : index
      %c0_9 = arith.constant 0 : index
      %c0_10 = arith.constant 0 : index
      %23 = vector.load %arg4[%c2, %c0_9, %c0_10] : memref<3x8x128xf32, #tpu.memory_space<vmem>>, vector<1x8x128xf32>
      %24 = vector.shape_cast %23 : vector<1x8x128xf32> to vector<8x128xf32>
      %25 = arith.mulf %20, %20 : vector<8x128xf32>
      %26 = arith.mulf %22, %22 : vector<8x128xf32>
      %27 = arith.addf %25, %26 : vector<8x128xf32>
      %28 = arith.mulf %24, %24 : vector<8x128xf32>
      %29 = arith.addf %27, %28 : vector<8x128xf32>
      %30 = math.sqrt %29 : vector<8x128xf32>
      %cst = arith.constant 1.000000e+00 : f32
      %31 = vector.broadcast %cst : f32 to vector<8x128xf32>
      %32 = arith.subf %30, %31 : vector<8x128xf32>
      %c768_i32 = arith.constant 768 : i32
      %33 = vector.broadcast %c768_i32 : i32 to vector<8x128xi32>
      %34 = arith.cmpi slt, %18, %33 : vector<8x128xi32>
      %35 = arith.mulf %32, %32 : vector<8x128xf32>
      %cst_11 = arith.constant 0.000000e+00 : f32
      %36 = vector.broadcast %cst_11 : f32 to vector<8x128xf32>
      %37 = arith.select %34, %35, %36 : vector<8x128xi1>, vector<8x128xf32>
      %38 = vector.shape_cast %37 : vector<8x128xf32> to vector<1x8x128xf32>
      %cst_12 = arith.constant dense<0.000000e+00> : vector<8x128xf32>
      %39 = vector.multi_reduction <add>, %38, %cst_12 [0] : vector<1x8x128xf32> to vector<8x128xf32>
      %c0_13 = arith.constant 0 : index
      %c0_14 = arith.constant 0 : index
      %c0_15 = arith.constant 0 : index
      %40 = vector.load %arg6[%c0_13, %c0_14, %c0_15] : memref<1x8x128xf32, #tpu.memory_space<vmem>>, vector<1x8x128xf32>
      %41 = vector.shape_cast %40 : vector<1x8x128xf32> to vector<8x128xf32>
      %42 = arith.addf %41, %39 : vector<8x128xf32>
      %c0_16 = arith.constant 0 : index
      %c0_17 = arith.constant 0 : index
      %c0_18 = arith.constant 0 : index
      %43 = vector.load %arg6[%c0_16, %c0_17, %c0_18] : memref<1x8x128xf32, #tpu.memory_space<vmem>>, vector<1x8x128xf32>
      %44 = vector.shape_cast %43 : vector<1x8x128xf32> to vector<8x128xf32>
      %45 = vector.shape_cast %42 : vector<8x128xf32> to vector<1x8x128xf32>
      tpu.vector_store %arg6[%c0_16, %c0_17, %c0_18], %45 {strides = array<i32>} : memref<1x8x128xf32, #tpu.memory_space<vmem>>, vector<1x8x128xf32>,
    } else {
    }
    return
  }
  func.func @transform_0(%arg0: i32, %arg1: i32) -> (i32, i32) {
    %c1_i32 = arith.constant 1 : i32
    %0 = arith.muli %arg0, %c1_i32 : i32
    %1 = arith.addi %0, %arg1 : i32
    %c0_i32 = arith.constant 0 : i32
    %2 = arith.minsi %1, %c0_i32 : i32
    %c0_i32_0 = arith.constant 0 : i32
    %c0_i32_1 = arith.constant 0 : i32
    return %2, %c0_i32_0 : i32, i32
  }
  func.func @transform_1(%arg0: i32, %arg1: i32) -> (i32, i32) {
    %c1_i32 = arith.constant 1 : i32
    %0 = arith.muli %arg0, %c1_i32 : i32
    %1 = arith.addi %0, %arg1 : i32
    %c0_i32 = arith.constant 0 : i32
    %2 = arith.minsi %1, %c0_i32 : i32
    %c0_i32_0 = arith.constant 0 : i32
    %c0_i32_1 = arith.constant 0 : i32
    return %2, %c0_i32_0 : i32, i32
  }
  func.func @transform_2(%arg0: i32, %arg1: i32) -> (i32, i32, i32) {
    %c1_i32 = arith.constant 1 : i32
    %0 = arith.muli %arg0, %c1_i32 : i32
    %1 = arith.addi %0, %arg1 : i32
    %c0_i32 = arith.constant 0 : i32
    %2 = arith.minsi %1, %c0_i32 : i32
    %c0_i32_0 = arith.constant 0 : i32
    %c0_i32_1 = arith.constant 0 : i32
    %c0_i32_2 = arith.constant 0 : i32
    return %c0_i32_0, %2, %c0_i32_1 : i32, i32, i32
  }
  func.func @transform_3(%arg0: i32, %arg1: i32) -> (i32, i32, i32) {
    %c0_i32 = arith.constant 0 : i32
    %c0_i32_0 = arith.constant 0 : i32
    %c0_i32_1 = arith.constant 0 : i32
    return %arg0, %c0_i32, %c0_i32_0 : i32, i32, i32
  }
  func.func @transform_4(%arg0: i32, %arg1: i32) -> (i32, i32, i32) {
    %c0_i32 = arith.constant 0 : i32
    %c0_i32_0 = arith.constant 0 : i32
    %c0_i32_1 = arith.constant 0 : i32
    return %arg0, %c0_i32, %c0_i32_0 : i32, i32, i32
  }
}

</mosaic_0001>

<bundles_post_ra>
// kernel: squeeze.1
= control target key start
LH: loop header
LB: loop body
LE: loop exit
PB: predicated region body
PF: predicated region fallthrough
CT: control target
= control target key end

     0   :  { %vm5_vm0 = vcmask 1041409   ;;  %vm9_vm1 = vcmask 1042434   ;;  %vm13_vm2 = vcmask 1043459   ;;  %vm17_vm3 = vcmask 1044484   ;;  %s5759_s27 = smov 127   ;;  %s5760_s11 = smov 126   ;;  %s10586_s0 = inlined_call_operand.vmem [shape: f32[1,1024,3], index: 0, kind: input, shape index: {}]   ;;  %s10587_s1 = inlined_call_operand.vmem [shape: f32[24,128], index: 1, kind: output, shape index: {}]  }
   0x1   :  { %vm21_vm4 = vcmask 1045509   ;;  %vm25_vm5 = vcmask 1046534   ;;  %vm29_vm6 = vcmask 1047559   ;;  %v4513_v0 = vld [vmem:[%s10586_s0 + $0x55] sm:$0x1]   ;;  %s5761_s30 = smov 125  }
   0x2   :  { %v4514_v1 = vld [vmem:[%s10586_s0 + $0xd4] sm:$0x2]   ;;  %v4531_v10 = vld [vmem:[%s10586_s0 + $0x2a] sm:$0x1]   ;;  %v4548_v53 = vld [vmem:[%s10586_s0 + $0x7f] sm:$0x1]  }
   0x3   :  { %v4515_v2 = vld [vmem:[%s10586_s0 + $0x153] sm:$0x4]   ;;  %v38_v4 = vsel %vm5_vm0, %v4514_v1, %v4513_v0  ;;  %v4532_v11 = vld [vmem:[%s10586_s0 + $0xa9] sm:$0x2]   ;;  %v4549_v54 = vld [vmem:[%s10586_s0 + $0xfe] sm:$0x2]  }
   0x4   :  { %v4516_v3 = vld [vmem:[%s10586_s0 + $0x1d2] sm:$0x8]   ;;  %v42_v8 = vsel %vm9_vm1, %v4515_v2, %v38_v4  ;;  %v108_v13 = vsel %vm5_vm0, %v4532_v11, %v4531_v10  ;;  %v4533_v14 = vld [vmem:[%s10586_s0 + $0x128] sm:$0x4]   ;;  %v177_v57 = vsel %vm5_vm0, %v4549_v54, %v4548_v53  ;;  %v4550_v58 = vld [vmem:[%s10586_s0 + $0x17d] sm:$0x4]  }
   0x5   :  { %v4517_v5 = vld [vmem:[%s10586_s0 + $0x251] sm:$0x10]   ;;  %v46_v12 = vsel %vm13_vm2, %v4516_v3, %v42_v8  ;;  %v4534_v15 = vld [vmem:[%s10586_s0 + $0x1a7] sm:$0x8]   ;;  %v112_v18 = vsel %vm9_vm1, %v4533_v14, %v108_v13  ;;  %v4551_v59 = vld [vmem:[%s10586_s0 + $0x1fc] sm:$0x8]   ;;  %v181_v63 = vsel %vm9_vm1, %v4550_v58, %v177_v57 }
   0x6   :  { %v4518_v6 = vld [vmem:[%s10586_s0 + $0x2d0] sm:$0x20]   ;;  %v4535_v16 = vld [vmem:[%s10586_s0 + $0x226] sm:$0x10]   ;;  %v50_v17 = vsel %vm17_vm3, %v4517_v5, %v46_v12  ;;  %v116_v23 = vsel %vm13_vm2, %v4534_v15, %v112_v18  ;;  %v4552_v60 = vld [vmem:[%s10586_s0 + $0x27b] sm:$0x10]   ;;  %v185_v4 = vsel %vm13_vm2, %v4551_v59, %v181_v63 }
   0x7   :  { %v4519_v7 = vld [vmem:[%s10586_s0 + $0x34f] sm:$0x40]   ;;  %v4536_v19 = vld [vmem:[%s10586_s0 + $0x2a5] sm:$0x20]   ;;  %v54_v22 = vsel %vm21_vm4, %v4518_v6, %v50_v17  ;;  %v120_v28 = vsel %vm17_vm3, %v4535_v16, %v116_v23  ;;  %v4553_v0 = vld [vmem:[%s10586_s0 + $0x2fa] sm:$0x20]  }
   0x8   :  { %v4520_v9 = vld [vmem:[%s10586_s0 + $0x3ce] sm:$0x80]   ;;  %v4537_v20 = vld [vmem:[%s10586_s0 + $0x324] sm:$0x40]   ;;  %v58_v27 = vsel %vm25_vm5, %v4519_v7, %v54_v22  ;;  %v124_v34 = vsel %vm21_vm4, %v4536_v19, %v120_v28  ;;  %v4554_v1 = vld [vmem:[%s10586_s0 + $0x379] sm:$0x40]  }
   0x9   :  { %v4538_v21 = vld [vmem:[%s10586_s0 + $0x3a3] sm:$0x80]   ;;  %v4522_v24 = vld [vmem:[%s10586_s0 + $0x55] sm:$0x1]   ;;  %v62_v33 = vsel %vm29_vm6, %v4520_v9, %v58_v27  ;;  %v128_v39 = vsel %vm25_vm5, %v4537_v20, %v124_v34  ;;  %v4555_v2 = vld [vmem:[%s10586_s0 + $0x3f8] sm:$0x80]   ;;  %v189_v9 = vsel %vm17_vm3, %v4552_v60, %v185_v4 }
   0xa   :  { %v4523_v25 = vld [vmem:[%s10586_s0 + $0xd4] sm:$0x2]   ;;  %v4540_v38 = vld [vmem:[%s10586_s0 + $0x2a] sm:$0x1]   ;;  %63 = vrot.lane.b32.xlu0 %v62_v33, %s5759_s27  ;;  %v132_v44 = vsel %vm29_vm6, %v4538_v21, %v128_v39  ;;  %v4557_v5 = vld [vmem:[%s10586_s0 + $0x54] sm:$0x1]   ;;  %v193_v15 = vsel %vm21_vm4, %v4553_v0, %v189_v9 }
   0xb   :  { %v4524_v26 = vld [vmem:[%s10586_s0 + $0x153] sm:$0x4]   ;;  %v73_v29 = vsel %vm5_vm0, %v4523_v25, %v4522_v24  ;;  %v4541_v41 = vld [vmem:[%s10586_s0 + $0xa9] sm:$0x2]   ;;  %133 = vrot.lane.b32.xlu1 %v132_v44, %s5760_s11  ;;  %v4558_v6 = vld [vmem:[%s10586_s0 + $0xd3] sm:$0x2]   ;;  %v197_v19 = vsel %vm25_vm5, %v4554_v1, %v193_v15 }
   0xc   :  { %v4525_v30 = vld [vmem:[%s10586_s0 + $0x1d2] sm:$0x8]   ;;  %v77_v35 = vsel %vm9_vm1, %v4524_v26, %v73_v29  ;;  %v4542_v42 = vld [vmem:[%s10586_s0 + $0x128] sm:$0x4]   ;;  %v143_v46 = vsel %vm5_vm0, %v4541_v41, %v4540_v38  ;;  %v4559_v7 = vld [vmem:[%s10586_s0 + $0x152] sm:$0x4]   ;;  %v212_v10 = vsel %vm5_vm0, %v4558_v6, %v4557_v5  ;;  %v201_v24 = vsel %vm29_vm6, %v4555_v2, %v197_v19 }
   0xd   :  { %v4526_v31 = vld [vmem:[%s10586_s0 + $0x251] sm:$0x10]   ;;  %v81_v40 = vsel %vm13_vm2, %v4525_v30, %v77_v35  ;;  %v4543_v43 = vld [vmem:[%s10586_s0 + $0x1a7] sm:$0x8]   ;;  %v147_v51 = vsel %vm9_vm1, %v4542_v42, %v143_v46  ;;  %v4560_v11 = vld [vmem:[%s10586_s0 + $0x1d1] sm:$0x8]   ;;  %v216_v16 = vsel %vm9_vm1, %v4559_v7, %v212_v10 }
   0xe   :  { %v4527_v32 = vld [vmem:[%s10586_s0 + $0x2d0] sm:$0x20]   ;;  %v85_v45 = vsel %vm17_vm3, %v4526_v31, %v81_v40  ;;  %v4544_v47 = vld [vmem:[%s10586_s0 + $0x226] sm:$0x10]   ;;  %v151_v56 = vsel %vm13_vm2, %v4543_v43, %v147_v51  ;;  %v4561_v12 = vld [vmem:[%s10586_s0 + $0x250] sm:$0x10]   ;;  %v220_v20 = vsel %vm13_vm2, %v4560_v11, %v216_v16 }
   0xf   :  { %v4528_v36 = vld [vmem:[%s10586_s0 + $0x34f] sm:$0x40]   ;;  %v4545_v48 = vld [vmem:[%s10586_s0 + $0x2a5] sm:$0x20]   ;;  %v89_v50 = vsel %vm21_vm4, %v4527_v32, %v85_v45  ;;  %v155_v62 = vsel %vm17_vm3, %v4544_v47, %v151_v56  ;;  %v4562_v13 = vld [vmem:[%s10586_s0 + $0x2cf] sm:$0x20]   ;;  %v224_v25 = vsel %vm17_vm3, %v4561_v12, %v220_v20 }
  0x10   :  { %v4529_v37 = vld [vmem:[%s10586_s0 + $0x3ce] sm:$0x80]   ;;  %v4546_v49 = vld [vmem:[%s10586_s0 + $0x324] sm:$0x40]   ;;  %v93_v55 = vsel %vm25_vm5, %v4528_v36, %v89_v50  ;;  %v159_v3 = vsel %vm21_vm4, %v4545_v48, %v155_v62  ;;  %v4563_v17 = vld [vmem:[%s10586_s0 + $0x34e] sm:$0x40]   ;;  %v228_v30 = vsel %vm21_vm4, %v4562_v13, %v224_v25 }
  0x11   :  { %v4547_v52 = vld [vmem:[%s10586_s0 + $0x3a3] sm:$0x80]   ;;  %v97_v61 = vsel %vm29_vm6, %v4529_v37, %v93_v55  ;;  %v163_v8 = vsel %vm25_vm5, %v4546_v49, %v159_v3  ;;  %v4564_v18 = vld [vmem:[%s10586_s0 + $0x3cd] sm:$0x80]   ;;  %v4566_v21 = vld [vmem:[%s10586_s0 + $0x29] sm:$0x1]   ;;  %v232_v35 = vsel %vm25_vm5, %v4563_v17, %v228_v30 }
  0x12   :  { %98 = vrot.lane.b32.xlu0 %v97_v61, %s5759_s27  ;;  %v167_v14 = vsel %vm29_vm6, %v4547_v52, %v163_v8  ;;  %v4567_v22 = vld [vmem:[%s10586_s0 + $0xa8] sm:$0x2]   ;;  %v4574_v34 = vld [vmem:[%s10586_s0 + $0x7e] sm:$0x1]   ;;  %v236_v40 = vsel %vm29_vm6, %v4564_v18, %v232_v35  ;;  %s5762_s19 = smov 124   ;;  %s5763_s7 = smov 123  }
  0x13   :  { %168 = vrot.lane.b32.xlu1 %v167_v14, %s5760_s11  ;;  %v4568_v23 = vld [vmem:[%s10586_s0 + $0x127] sm:$0x4]   ;;  %v247_v26 = vsel %vm5_vm0, %v4567_v22, %v4566_v21  ;;  %v4575_v37 = vld [vmem:[%s10586_s0 + $0xfd] sm:$0x2]   ;;  %v4583_v49 = vld [vmem:[%s10586_s0 + $0x53] sm:$0x1]  }
  0x14   :  { %v4569_v27 = vld [vmem:[%s10586_s0 + $0x1a6] sm:$0x8]   ;;  %v251_v31 = vsel %vm9_vm1, %v4568_v23, %v247_v26  ;;  %v4576_v38 = vld [vmem:[%s10586_s0 + $0x17c] sm:$0x4]   ;;  %v281_v42 = vsel %vm5_vm0, %v4575_v37, %v4574_v34  ;;  %v4584_v52 = vld [vmem:[%s10586_s0 + $0xd2] sm:$0x2]  }
  0x15   :  { %v4570_v28 = vld [vmem:[%s10586_s0 + $0x225] sm:$0x10]   ;;  %v255_v36 = vsel %vm13_vm2, %v4569_v27, %v251_v31  ;;  %v4577_v39 = vld [vmem:[%s10586_s0 + $0x1fb] sm:$0x8]   ;;  %v285_v47 = vsel %vm9_vm1, %v4576_v38, %v281_v42  ;;  %v4585_v53 = vld [vmem:[%s10586_s0 + $0x151] sm:$0x4]   ;;  %v316_v57 = vsel %vm5_vm0, %v4584_v52, %v4583_v49 }
  0x16   :  { %v4571_v29 = vld [vmem:[%s10586_s0 + $0x2a4] sm:$0x20]   ;;  %202 = vrot.lane.b32.xlu0 %v201_v24, %s5761_s30  ;;  %v259_v41 = vsel %vm17_vm3, %v4570_v28, %v255_v36  ;;  %v4578_v43 = vld [vmem:[%s10586_s0 + $0x27a] sm:$0x10]   ;;  %v289_v51 = vsel %vm13_vm2, %v4577_v39, %v285_v47  ;;  %v4586_v54 = vld [vmem:[%s10586_s0 + $0x1d0] sm:$0x8]   ;;  %v320_v62 = vsel %vm9_vm1, %v4585_v53, %v316_v57 }
  0x17   :  { %v4572_v32 = vld [vmem:[%s10586_s0 + $0x323] sm:$0x40]   ;;  %v4579_v44 = vld [vmem:[%s10586_s0 + $0x2f9] sm:$0x20]   ;;  %237 = vrot.lane.b32.xlu1 %v236_v40, %s5762_s19  ;;  %v263_v46 = vsel %vm21_vm4, %v4571_v29, %v259_v41  ;;  %v293_v56 = vsel %vm17_vm3, %v4578_v43, %v289_v51  ;;  %v4587_v58 = vld [vmem:[%s10586_s0 + $0x24f] sm:$0x10]   ;;  %v324_v3 = vsel %vm13_vm2, %v4586_v54, %v320_v62 }
  0x18   :  { %v4573_v33 = vld [vmem:[%s10586_s0 + $0x3a2] sm:$0x80]   ;;  %v4580_v45 = vld [vmem:[%s10586_s0 + $0x378] sm:$0x40]   ;;  %v267_v50 = vsel %vm25_vm5, %v4572_v32, %v263_v46  ;;  %v4588_v59 = vld [vmem:[%s10586_s0 + $0x2ce] sm:$0x20]   ;;  %v297_v61 = vsel %vm21_vm4, %v4579_v44, %v293_v56  ;;  %v328_v9 = vsel %vm17_vm3, %v4587_v58, %v324_v3 }
  0x19   :  { %v4581_v48 = vld [vmem:[%s10586_s0 + $0x3f7] sm:$0x80]   ;;  %v271_v55 = vsel %vm29_vm6, %v4573_v33, %v267_v50  ;;  %v4589_v60 = vld [vmem:[%s10586_s0 + $0x34d] sm:$0x40]   ;;  %v4592_v0 = vld [vmem:[%s10586_s0 + $0x28] sm:$0x1]   ;;  %v301_v2 = vsel %vm25_vm5, %v4580_v45, %v297_v61  ;;  %v332_v14 = vsel %vm21_vm4, %v4588_v59, %v328_v9 }
  0x1a   :  { %272 = vrot.lane.b32.xlu0 %v271_v55, %s5763_s7  ;;  %v4590_v63 = vld [vmem:[%s10586_s0 + $0x3cc] sm:$0x80]   ;;  %v4593_v1 = vld [vmem:[%s10586_s0 + $0xa7] sm:$0x2]   ;;  %v305_v8 = vsel %vm29_vm6, %v4581_v48, %v301_v2  ;;  %s5764_s26 = smov 122   ;;  %v336_v18 = vsel %vm25_vm5, %v4589_v60, %v332_v14  ;;  %s5765_s15 = smov 121  }
  0x1b   :  { %v351_v4 = vsel %vm5_vm0, %v4593_v1, %v4592_v0  ;;  %v4594_v5 = vld [vmem:[%s10586_s0 + $0x126] sm:$0x4]   ;;  %306 = vrot.lane.b32.xlu1 %v305_v8, %s5764_s26  ;;  %v4600_v16 = vld [vmem:[%s10586_s0 + $0x7d] sm:$0x1]   ;;  %v340_v24 = vsel %vm29_vm6, %v4590_v63, %v336_v18  ;;  %v4609_v32 = vld [vmem:[%s10586_s0 + $0x52] sm:$0x1]  }
  0x1c   :  { %v4595_v6 = vld [vmem:[%s10586_s0 + $0x1a5] sm:$0x8]   ;;  %v355_v10 = vsel %vm9_vm1, %v4594_v5, %v351_v4  ;;  %v4601_v17 = vld [vmem:[%s10586_s0 + $0xfc] sm:$0x2]   ;;  %v4610_v33 = vld [vmem:[%s10586_s0 + $0xd1] sm:$0x2]  }
  0x1d   :  { %v4596_v7 = vld [vmem:[%s10586_s0 + $0x224] sm:$0x10]   ;;  %v359_v15 = vsel %vm13_vm2, %v4595_v6, %v355_v10  ;;  %v385_v20 = vsel %vm5_vm0, %v4601_v17, %v4600_v16  ;;  %v4602_v21 = vld [vmem:[%s10586_s0 + $0x17b] sm:$0x4]   ;;  %v4611_v34 = vld [vmem:[%s10586_s0 + $0x150] sm:$0x4]   ;;  %v420_v37 = vsel %vm5_vm0, %v4610_v33, %v4609_v32 }
  0x1e   :  { %v4597_v11 = vld [vmem:[%s10586_s0 + $0x2a3] sm:$0x20]   ;;  %v363_v19 = vsel %vm17_vm3, %v4596_v7, %v359_v15  ;;  %v4603_v22 = vld [vmem:[%s10586_s0 + $0x1fa] sm:$0x8]   ;;  %v389_v26 = vsel %vm9_vm1, %v4602_v21, %v385_v20  ;;  %341 = vrot.lane.b32.xlu0 %v340_v24, %s5765_s15  ;;  %v4612_v38 = vld [vmem:[%s10586_s0 + $0x1cf] sm:$0x8]   ;;  %v424_v42 = vsel %vm9_vm1, %v4611_v34, %v420_v37 }
  0x1f   :  { %v4598_v12 = vld [vmem:[%s10586_s0 + $0x322] sm:$0x40]   ;;  %v4604_v23 = vld [vmem:[%s10586_s0 + $0x279] sm:$0x10]   ;;  %v367_v25 = vsel %vm21_vm4, %v4597_v11, %v363_v19  ;;  %v393_v31 = vsel %vm13_vm2, %v4603_v22, %v389_v26  ;;  %v4613_v39 = vld [vmem:[%s10586_s0 + $0x24e] sm:$0x10]   ;;  %v428_v46 = vsel %vm13_vm2, %v4612_v38, %v424_v42 }
  0x20   :  { %v4599_v13 = vld [vmem:[%s10586_s0 + $0x3a1] sm:$0x80]   ;;  %v4605_v27 = vld [vmem:[%s10586_s0 + $0x2f8] sm:$0x20]   ;;  %v371_v30 = vsel %vm25_vm5, %v4598_v12, %v367_v25  ;;  %v397_v36 = vsel %vm17_vm3, %v4604_v23, %v393_v31  ;;  %v4614_v40 = vld [vmem:[%s10586_s0 + $0x2cd] sm:$0x20]   ;;  %v432_v51 = vsel %vm17_vm3, %v4613_v39, %v428_v46 }
  0x21   :  { %v4606_v28 = vld [vmem:[%s10586_s0 + $0x377] sm:$0x40]   ;;  %v375_v35 = vsel %vm29_vm6, %v4599_v13, %v371_v30  ;;  %s5766_s28 = smov 120   ;;  %v401_v41 = vsel %vm21_vm4, %v4605_v27, %v397_v36  ;;  %v4615_v43 = vld [vmem:[%s10586_s0 + $0x34c] sm:$0x40]   ;;  %s5767_s16 = smov 119   ;;  %v436_v56 = vsel %vm21_vm4, %v4614_v40, %v432_v51 }
  0x22   :  { %v4607_v29 = vld [vmem:[%s10586_s0 + $0x3f6] sm:$0x80]   ;;  %376 = vrot.lane.b32.xlu1 %v375_v35, %s5766_s28  ;;  %v4616_v44 = vld [vmem:[%s10586_s0 + $0x3cb] sm:$0x80]   ;;  %v405_v45 = vsel %vm25_vm5, %v4606_v28, %v401_v41  ;;  %v4618_v47 = vld [vmem:[%s10586_s0 + $0x27] sm:$0x1]   ;;  %v440_v61 = vsel %vm25_vm5, %v4615_v43, %v436_v56 }
  0x23   :  { %v4619_v48 = vld [vmem:[%s10586_s0 + $0xa6] sm:$0x2]   ;;  %v409_v50 = vsel %vm29_vm6, %v4607_v29, %v405_v45  ;;  %v4626_v60 = vld [vmem:[%s10586_s0 + $0x7c] sm:$0x1]   ;;  %v444_v2 = vsel %vm29_vm6, %v4616_v44, %v440_v61  ;;  %s5768_s5 = smov 118   ;;  %s5769_s22 = smov 117  }
  0x24   :  { %v4620_v49 = vld [vmem:[%s10586_s0 + $0x125] sm:$0x4]   ;;  %v455_v52 = vsel %vm5_vm0, %v4619_v48, %v4618_v47  ;;  %410 = vrot.lane.b32.xlu0 %v409_v50, %s5767_s16  ;;  %v4627_v63 = vld [vmem:[%s10586_s0 + $0xfb] sm:$0x2]   ;;  %v4635_v11 = vld [vmem:[%s10586_s0 + $0x51] sm:$0x1]  }
  0x25   :  { %v4621_v53 = vld [vmem:[%s10586_s0 + $0x1a4] sm:$0x8]   ;;  %v459_v57 = vsel %vm9_vm1, %v4620_v49, %v455_v52  ;;  %v4628_v0 = vld [vmem:[%s10586_s0 + $0x17a] sm:$0x4]   ;;  %v489_v4 = vsel %vm5_vm0, %v4627_v63, %v4626_v60  ;;  %v4636_v14 = vld [vmem:[%s10586_s0 + $0xd0] sm:$0x2]  }
  0x26   :  { %v4622_v54 = vld [vmem:[%s10586_s0 + $0x223] sm:$0x10]   ;;  %v463_v62 = vsel %vm13_vm2, %v4621_v53, %v459_v57  ;;  %v4629_v1 = vld [vmem:[%s10586_s0 + $0x1f9] sm:$0x8]   ;;  %445 = vrot.lane.b32.xlu1 %v444_v2, %s5768_s5  ;;  %v493_v9 = vsel %vm9_vm1, %v4628_v0, %v489_v4  ;;  %v4637_v15 = vld [vmem:[%s10586_s0 + $0x14f] sm:$0x4]   ;;  %v524_v19 = vsel %vm5_vm0, %v4636_v14, %v4635_v11 }
  0x27   :  { %v4623_v55 = vld [vmem:[%s10586_s0 + $0x2a2] sm:$0x20]   ;;  %v467_v3 = vsel %vm17_vm3, %v4622_v54, %v463_v62  ;;  %v4630_v5 = vld [vmem:[%s10586_s0 + $0x278] sm:$0x10]   ;;  %v497_v13 = vsel %vm13_vm2, %v4629_v1, %v493_v9  ;;  %v4638_v16 = vld [vmem:[%s10586_s0 + $0x1ce] sm:$0x8]   ;;  %v528_v24 = vsel %vm9_vm1, %v4637_v15, %v524_v19 }
  0x28   :  { %v4624_v58 = vld [vmem:[%s10586_s0 + $0x321] sm:$0x40]   ;;  %v4631_v6 = vld [vmem:[%s10586_s0 + $0x2f7] sm:$0x20]   ;;  %v471_v8 = vsel %vm21_vm4, %v4623_v55, %v467_v3  ;;  %v501_v18 = vsel %vm17_vm3, %v4630_v5, %v497_v13  ;;  %v4639_v20 = vld [vmem:[%s10586_s0 + $0x24d] sm:$0x10]   ;;  %v532_v29 = vsel %vm13_vm2, %v4638_v16, %v528_v24 }
  0x29   :  { %v4625_v59 = vld [vmem:[%s10586_s0 + $0x3a0] sm:$0x80]   ;;  %v4632_v7 = vld [vmem:[%s10586_s0 + $0x376] sm:$0x40]   ;;  %v475_v12 = vsel %vm25_vm5, %v4624_v58, %v471_v8  ;;  %v4640_v21 = vld [vmem:[%s10586_s0 + $0x2cc] sm:$0x20]   ;;  %v505_v23 = vsel %vm21_vm4, %v4631_v6, %v501_v18  ;;  %v536_v35 = vsel %vm17_vm3, %v4639_v20, %v532_v29 }
  0x2a   :  { %v4633_v10 = vld [vmem:[%s10586_s0 + $0x3f5] sm:$0x80]   ;;  %v479_v17 = vsel %vm29_vm6, %v4625_v59, %v475_v12  ;;  %v4641_v22 = vld [vmem:[%s10586_s0 + $0x34b] sm:$0x40]   ;;  %v4644_v26 = vld [vmem:[%s10586_s0 + $0x26] sm:$0x1]   ;;  %v509_v28 = vsel %vm25_vm5, %v4632_v7, %v505_v23  ;;  %v540_v40 = vsel %vm21_vm4, %v4640_v21, %v536_v35 }
  0x2b   :  { %480 = vrot.lane.b32.xlu0 %v479_v17, %s5769_s22  ;;  %v4642_v25 = vld [vmem:[%s10586_s0 + $0x3ca] sm:$0x80]   ;;  %v4645_v27 = vld [vmem:[%s10586_s0 + $0xa5] sm:$0x2]   ;;  %v513_v34 = vsel %vm29_vm6, %v4633_v10, %v509_v28  ;;  %s5770_s13 = smov 116   ;;  %v544_v44 = vsel %vm25_vm5, %v4641_v22, %v540_v40  ;;  %s5771_s30 = smov 115  }
  0x2c   :  { %v559_v30 = vsel %vm5_vm0, %v4645_v27, %v4644_v26  ;;  %v4646_v31 = vld [vmem:[%s10586_s0 + $0x124] sm:$0x4]   ;;  %514 = vrot.lane.b32.xlu1 %v513_v34, %s5770_s13  ;;  %v4652_v42 = vld [vmem:[%s10586_s0 + $0x7b] sm:$0x1]   ;;  %v548_v50 = vsel %vm29_vm6, %v4642_v25, %v544_v44  ;;  %v4661_v58 = vld [vmem:[%s10586_s0 + $0x50] sm:$0x1]  }
  0x2d   :  { %v4647_v32 = vld [vmem:[%s10586_s0 + $0x1a3] sm:$0x8]   ;;  %v563_v36 = vsel %vm9_vm1, %v4646_v31, %v559_v30  ;;  %v4653_v43 = vld [vmem:[%s10586_s0 + $0xfa] sm:$0x2]   ;;  %v4662_v59 = vld [vmem:[%s10586_s0 + $0xcf] sm:$0x2]  }
  0x2e   :  { %v4648_v33 = vld [vmem:[%s10586_s0 + $0x222] sm:$0x10]   ;;  %v567_v41 = vsel %vm13_vm2, %v4647_v32, %v563_v36  ;;  %v593_v46 = vsel %vm5_vm0, %v4653_v43, %v4652_v42  ;;  %v4654_v47 = vld [vmem:[%s10586_s0 + $0x179] sm:$0x4]   ;;  %v4663_v60 = vld [vmem:[%s10586_s0 + $0x14e] sm:$0x4]   ;;  %v628_v63 = vsel %vm5_vm0, %v4662_v59, %v4661_v58 }
  0x2f   :  { %v4649_v37 = vld [vmem:[%s10586_s0 + $0x2a1] sm:$0x20]   ;;  %v571_v45 = vsel %vm17_vm3, %v4648_v33, %v567_v41  ;;  %v4655_v48 = vld [vmem:[%s10586_s0 + $0x1f8] sm:$0x8]   ;;  %v597_v52 = vsel %vm9_vm1, %v4654_v47, %v593_v46  ;;  %549 = vrot.lane.b32.xlu0 %v548_v50, %s5771_s30  ;;  %v4664_v0 = vld [vmem:[%s10586_s0 + $0x1cd] sm:$0x8]   ;;  %v632_v4 = vsel %vm9_vm1, %v4663_v60, %v628_v63 }
  0x30   :  { %v4650_v38 = vld [vmem:[%s10586_s0 + $0x320] sm:$0x40]   ;;  %v4656_v49 = vld [vmem:[%s10586_s0 + $0x277] sm:$0x10]   ;;  %v575_v51 = vsel %vm21_vm4, %v4649_v37, %v571_v45  ;;  %v601_v57 = vsel %vm13_vm2, %v4655_v48, %v597_v52  ;;  %v4665_v1 = vld [vmem:[%s10586_s0 + $0x24c] sm:$0x10]   ;;  %v636_v8 = vsel %vm13_vm2, %v4664_v0, %v632_v4 }
  0x31   :  { %v4651_v39 = vld [vmem:[%s10586_s0 + $0x39f] sm:$0x80]   ;;  %v4657_v53 = vld [vmem:[%s10586_s0 + $0x2f6] sm:$0x20]   ;;  %v579_v56 = vsel %vm25_vm5, %v4650_v38, %v575_v51  ;;  %v605_v62 = vsel %vm17_vm3, %v4656_v49, %v601_v57  ;;  %v4666_v2 = vld [vmem:[%s10586_s0 + $0x2cb] sm:$0x20]   ;;  %v640_v13 = vsel %vm17_vm3, %v4665_v1, %v636_v8 }
  0x32   :  { %v4658_v54 = vld [vmem:[%s10586_s0 + $0x375] sm:$0x40]   ;;  %v583_v61 = vsel %vm29_vm6, %v4651_v39, %v579_v56  ;;  %s5772_s14 = smov 114   ;;  %v609_v3 = vsel %vm21_vm4, %v4657_v53, %v605_v62  ;;  %v4667_v5 = vld [vmem:[%s10586_s0 + $0x34a] sm:$0x40]   ;;  %s5773_s27 = smov 113   ;;  %v644_v18 = vsel %vm21_vm4, %v4666_v2, %v640_v13 }
  0x33   :  { %v4659_v55 = vld [vmem:[%s10586_s0 + $0x3f4] sm:$0x80]   ;;  %584 = vrot.lane.b32.xlu1 %v583_v61, %s5772_s14  ;;  %v4668_v6 = vld [vmem:[%s10586_s0 + $0x3c9] sm:$0x80]   ;;  %v613_v7 = vsel %vm25_vm5, %v4658_v54, %v609_v3  ;;  %v4670_v9 = vld [vmem:[%s10586_s0 + $0x25] sm:$0x1]   ;;  %v648_v23 = vsel %vm25_vm5, %v4667_v5, %v644_v18 }
  0x34   :  { %v4671_v10 = vld [vmem:[%s10586_s0 + $0xa4] sm:$0x2]   ;;  %v617_v12 = vsel %vm29_vm6, %v4659_v55, %v613_v7  ;;  %v4678_v22 = vld [vmem:[%s10586_s0 + $0x7a] sm:$0x1]   ;;  %v652_v28 = vsel %vm29_vm6, %v4668_v6, %v648_v23  ;;  %s5774_s20 = smov 112   ;;  %s5775_s8 = smov 111  }
  0x35   :  { %v4672_v11 = vld [vmem:[%s10586_s0 + $0x123] sm:$0x4]   ;;  %v663_v14 = vsel %vm5_vm0, %v4671_v10, %v4670_v9  ;;  %618 = vrot.lane.b32.xlu0 %v617_v12, %s5773_s27  ;;  %v4679_v25 = vld [vmem:[%s10586_s0 + $0xf9] sm:$0x2]   ;;  %v4687_v37 = vld [vmem:[%s10586_s0 + $0x4f] sm:$0x1]  }
  0x36   :  { %v4673_v15 = vld [vmem:[%s10586_s0 + $0x1a2] sm:$0x8]   ;;  %v667_v19 = vsel %vm9_vm1, %v4672_v11, %v663_v14  ;;  %v4680_v26 = vld [vmem:[%s10586_s0 + $0x178] sm:$0x4]   ;;  %v697_v30 = vsel %vm5_vm0, %v4679_v25, %v4678_v22  ;;  %v4688_v40 = vld [vmem:[%s10586_s0 + $0xce] sm:$0x2]  }
  0x37   :  { %v4674_v16 = vld [vmem:[%s10586_s0 + $0x221] sm:$0x10]   ;;  %v671_v24 = vsel %vm13_vm2, %v4673_v15, %v667_v19  ;;  %v4681_v27 = vld [vmem:[%s10586_s0 + $0x1f7] sm:$0x8]   ;;  %653 = vrot.lane.b32.xlu1 %v652_v28, %s5774_s20  ;;  %v701_v35 = vsel %vm9_vm1, %v4680_v26, %v697_v30  ;;  %v4689_v41 = vld [vmem:[%s10586_s0 + $0x14d] sm:$0x4]   ;;  %v732_v45 = vsel %vm5_vm0, %v4688_v40, %v4687_v37 }
  0x38   :  { %v4675_v17 = vld [vmem:[%s10586_s0 + $0x2a0] sm:$0x20]   ;;  %v675_v29 = vsel %vm17_vm3, %v4674_v16, %v671_v24  ;;  %v4682_v31 = vld [vmem:[%s10586_s0 + $0x276] sm:$0x10]   ;;  %v705_v39 = vsel %vm13_vm2, %v4681_v27, %v701_v35  ;;  %v4690_v42 = vld [vmem:[%s10586_s0 + $0x1cc] sm:$0x8]   ;;  %v736_v50 = vsel %vm9_vm1, %v4689_v41, %v732_v45 }
  0x39   :  { %v4676_v20 = vld [vmem:[%s10586_s0 + $0x31f] sm:$0x40]   ;;  %v4683_v32 = vld [vmem:[%s10586_s0 + $0x2f5] sm:$0x20]   ;;  %v679_v34 = vsel %vm21_vm4, %v4675_v17, %v675_v29  ;;  %v709_v44 = vsel %vm17_vm3, %v4682_v31, %v705_v39  ;;  %v4691_v46 = vld [vmem:[%s10586_s0 + $0x24b] sm:$0x10]   ;;  %v740_v55 = vsel %vm13_vm2, %v4690_v42, %v736_v50 }
  0x3a   :  { %v4677_v21 = vld [vmem:[%s10586_s0 + $0x39e] sm:$0x80]   ;;  %v4684_v33 = vld [vmem:[%s10586_s0 + $0x374] sm:$0x40]   ;;  %v683_v38 = vsel %vm25_vm5, %v4676_v20, %v679_v34  ;;  %v4692_v47 = vld [vmem:[%s10586_s0 + $0x2ca] sm:$0x20]   ;;  %v713_v49 = vsel %vm21_vm4, %v4683_v32, %v709_v44  ;;  %v744_v61 = vsel %vm17_vm3, %v4691_v46, %v740_v55 }
  0x3b   :  { %v4685_v36 = vld [vmem:[%s10586_s0 + $0x3f3] sm:$0x80]   ;;  %v687_v43 = vsel %vm29_vm6, %v4677_v21, %v683_v38  ;;  %v4693_v48 = vld [vmem:[%s10586_s0 + $0x349] sm:$0x40]   ;;  %v4696_v52 = vld [vmem:[%s10586_s0 + $0x24] sm:$0x1]   ;;  %v717_v54 = vsel %vm25_vm5, %v4684_v33, %v713_v49  ;;  %v748_v2 = vsel %vm21_vm4, %v4692_v47, %v744_v61 }
  0x3c   :  { %688 = vrot.lane.b32.xlu0 %v687_v43, %s5775_s8  ;;  %v4694_v51 = vld [vmem:[%s10586_s0 + $0x3c8] sm:$0x80]   ;;  %v4697_v53 = vld [vmem:[%s10586_s0 + $0xa3] sm:$0x2]   ;;  %v721_v60 = vsel %vm29_vm6, %v4685_v36, %v717_v54  ;;  %s5776_s28 = smov 110   ;;  %v752_v6 = vsel %vm25_vm5, %v4693_v48, %v748_v2  ;;  %s5777_s16 = smov 109  }
  0x3d   :  { %v767_v56 = vsel %vm5_vm0, %v4697_v53, %v4696_v52  ;;  %v4698_v57 = vld [vmem:[%s10586_s0 + $0x122] sm:$0x4]   ;;  %722 = vrot.lane.b32.xlu1 %v721_v60, %s5776_s28  ;;  %v4704_v4 = vld [vmem:[%s10586_s0 + $0x79] sm:$0x1]   ;;  %v756_v12 = vsel %vm29_vm6, %v4694_v51, %v752_v6  ;;  %v4713_v20 = vld [vmem:[%s10586_s0 + $0x4e] sm:$0x1]  }
  0x3e   :  { %v4699_v58 = vld [vmem:[%s10586_s0 + $0x1a1] sm:$0x8]   ;;  %v771_v62 = vsel %vm9_vm1, %v4698_v57, %v767_v56  ;;  %v4705_v5 = vld [vmem:[%s10586_s0 + $0xf8] sm:$0x2]   ;;  %v4714_v21 = vld [vmem:[%s10586_s0 + $0xcd] sm:$0x2]  }
  0x3f   :  { %v4700_v59 = vld [vmem:[%s10586_s0 + $0x220] sm:$0x10]   ;;  %v775_v3 = vsel %vm13_vm2, %v4699_v58, %v771_v62  ;;  %v801_v8 = vsel %vm5_vm0, %v4705_v5, %v4704_v4  ;;  %v4706_v9 = vld [vmem:[%s10586_s0 + $0x177] sm:$0x4]   ;;  %v4715_v22 = vld [vmem:[%s10586_s0 + $0x14c] sm:$0x4]   ;;  %v836_v25 = vsel %vm5_vm0, %v4714_v21, %v4713_v20 }
  0x40   :  { %v4701_v63 = vld [vmem:[%s10586_s0 + $0x29f] sm:$0x20]   ;;  %v779_v7 = vsel %vm17_vm3, %v4700_v59, %v775_v3  ;;  %v4707_v10 = vld [vmem:[%s10586_s0 + $0x1f6] sm:$0x8]   ;;  %v805_v14 = vsel %vm9_vm1, %v4706_v9, %v801_v8  ;;  %757 = vrot.lane.b32.xlu0 %v756_v12, %s5777_s16  ;;  %v4716_v26 = vld [vmem:[%s10586_s0 + $0x1cb] sm:$0x8]   ;;  %v840_v30 = vsel %vm9_vm1, %v4715_v22, %v836_v25 }
  0x41   :  { %v4702_v0 = vld [vmem:[%s10586_s0 + $0x31e] sm:$0x40]   ;;  %v4708_v11 = vld [vmem:[%s10586_s0 + $0x275] sm:$0x10]   ;;  %v783_v13 = vsel %vm21_vm4, %v4701_v63, %v779_v7  ;;  %v809_v19 = vsel %vm13_vm2, %v4707_v10, %v805_v14  ;;  %v4717_v27 = vld [vmem:[%s10586_s0 + $0x24a] sm:$0x10]   ;;  %v844_v34 = vsel %vm13_vm2, %v4716_v26, %v840_v30 }
  0x42   :  { %v4703_v1 = vld [vmem:[%s10586_s0 + $0x39d] sm:$0x80]   ;;  %v4709_v15 = vld [vmem:[%s10586_s0 + $0x2f4] sm:$0x20]   ;;  %v787_v18 = vsel %vm25_vm5, %v4702_v0, %v783_v13  ;;  %v813_v24 = vsel %vm17_vm3, %v4708_v11, %v809_v19  ;;  %v4718_v28 = vld [vmem:[%s10586_s0 + $0x2c9] sm:$0x20]   ;;  %v848_v39 = vsel %vm17_vm3, %v4717_v27, %v844_v34 }
  0x43   :  { %v4710_v16 = vld [vmem:[%s10586_s0 + $0x373] sm:$0x40]   ;;  %v791_v23 = vsel %vm29_vm6, %v4703_v1, %v787_v18  ;;  %s5778_s29 = smov 108   ;;  %v817_v29 = vsel %vm21_vm4, %v4709_v15, %v813_v24  ;;  %v4719_v31 = vld [vmem:[%s10586_s0 + $0x348] sm:$0x40]   ;;  %s5779_s17 = smov 107   ;;  %v852_v44 = vsel %vm21_vm4, %v4718_v28, %v848_v39 }
  0x44   :  { %v4711_v17 = vld [vmem:[%s10586_s0 + $0x3f2] sm:$0x80]   ;;  %792 = vrot.lane.b32.xlu1 %v791_v23, %s5778_s29  ;;  %v4720_v32 = vld [vmem:[%s10586_s0 + $0x3c7] sm:$0x80]   ;;  %v821_v33 = vsel %vm25_vm5, %v4710_v16, %v817_v29  ;;  %v4722_v35 = vld [vmem:[%s10586_s0 + $0x23] sm:$0x1]   ;;  %v856_v49 = vsel %vm25_vm5, %v4719_v31, %v852_v44 }
  0x45   :  { %v4723_v36 = vld [vmem:[%s10586_s0 + $0xa2] sm:$0x2]   ;;  %v825_v38 = vsel %vm29_vm6, %v4711_v17, %v821_v33  ;;  %v4730_v48 = vld [vmem:[%s10586_s0 + $0x78] sm:$0x1]   ;;  %v860_v54 = vsel %vm29_vm6, %v4720_v32, %v856_v49  ;;  %s5780_s6 = smov 106   ;;  %s5781_s23 = smov 105  }
  0x46   :  { %v4724_v37 = vld [vmem:[%s10586_s0 + $0x121] sm:$0x4]   ;;  %v871_v40 = vsel %vm5_vm0, %v4723_v36, %v4722_v35  ;;  %826 = vrot.lane.b32.xlu0 %v825_v38, %s5779_s17  ;;  %v4731_v51 = vld [vmem:[%s10586_s0 + $0xf7] sm:$0x2]   ;;  %v4739_v63 = vld [vmem:[%s10586_s0 + $0x4d] sm:$0x1]  }
  0x47   :  { %v4725_v41 = vld [vmem:[%s10586_s0 + $0x1a0] sm:$0x8]   ;;  %v875_v45 = vsel %vm9_vm1, %v4724_v37, %v871_v40  ;;  %v4732_v52 = vld [vmem:[%s10586_s0 + $0x176] sm:$0x4]   ;;  %v905_v56 = vsel %vm5_vm0, %v4731_v51, %v4730_v48  ;;  %v4740_v2 = vld [vmem:[%s10586_s0 + $0xcc] sm:$0x2]  }
  0x48   :  { %v4726_v42 = vld [vmem:[%s10586_s0 + $0x21f] sm:$0x10]   ;;  %v879_v50 = vsel %vm13_vm2, %v4725_v41, %v875_v45  ;;  %v4733_v53 = vld [vmem:[%s10586_s0 + $0x1f5] sm:$0x8]   ;;  %861 = vrot.lane.b32.xlu1 %v860_v54, %s5780_s6  ;;  %v909_v61 = vsel %vm9_vm1, %v4732_v52, %v905_v56  ;;  %v4741_v3 = vld [vmem:[%s10586_s0 + $0x14b] sm:$0x4]   ;;  %v940_v7 = vsel %vm5_vm0, %v4740_v2, %v4739_v63 }
  0x49   :  { %v4727_v43 = vld [vmem:[%s10586_s0 + $0x29e] sm:$0x20]   ;;  %v883_v55 = vsel %vm17_vm3, %v4726_v42, %v879_v50  ;;  %v4734_v57 = vld [vmem:[%s10586_s0 + $0x274] sm:$0x10]   ;;  %v913_v1 = vsel %vm13_vm2, %v4733_v53, %v909_v61  ;;  %v4742_v4 = vld [vmem:[%s10586_s0 + $0x1ca] sm:$0x8]   ;;  %v944_v12 = vsel %vm9_vm1, %v4741_v3, %v940_v7 }
  0x4a   :  { %v4728_v46 = vld [vmem:[%s10586_s0 + $0x31d] sm:$0x40]   ;;  %v4735_v58 = vld [vmem:[%s10586_s0 + $0x2f3] sm:$0x20]   ;;  %v887_v60 = vsel %vm21_vm4, %v4727_v43, %v883_v55  ;;  %v917_v6 = vsel %vm17_vm3, %v4734_v57, %v913_v1  ;;  %v4743_v8 = vld [vmem:[%s10586_s0 + $0x249] sm:$0x10]   ;;  %v948_v17 = vsel %vm13_vm2, %v4742_v4, %v944_v12 }
  0x4b   :  { %v4729_v47 = vld [vmem:[%s10586_s0 + $0x39c] sm:$0x80]   ;;  %v4736_v59 = vld [vmem:[%s10586_s0 + $0x372] sm:$0x40]   ;;  %v891_v0 = vsel %vm25_vm5, %v4728_v46, %v887_v60  ;;  %v4744_v9 = vld [vmem:[%s10586_s0 + $0x2c8] sm:$0x20]   ;;  %v921_v11 = vsel %vm21_vm4, %v4735_v58, %v917_v6  ;;  %v952_v23 = vsel %vm17_vm3, %v4743_v8, %v948_v17 }
  0x4c   :  { %v4737_v62 = vld [vmem:[%s10586_s0 + $0x3f1] sm:$0x80]   ;;  %v895_v5 = vsel %vm29_vm6, %v4729_v47, %v891_v0  ;;  %v4745_v10 = vld [vmem:[%s10586_s0 + $0x347] sm:$0x40]   ;;  %v4748_v14 = vld [vmem:[%s10586_s0 + $0x22] sm:$0x1]   ;;  %v925_v16 = vsel %vm25_vm5, %v4736_v59, %v921_v11  ;;  %v956_v28 = vsel %vm21_vm4, %v4744_v9, %v952_v23 }
  0x4d   :  { %896 = vrot.lane.b32.xlu0 %v895_v5, %s5781_s23  ;;  %v4746_v13 = vld [vmem:[%s10586_s0 + $0x3c6] sm:$0x80]   ;;  %v4749_v15 = vld [vmem:[%s10586_s0 + $0xa1] sm:$0x2]   ;;  %v929_v22 = vsel %vm29_vm6, %v4737_v62, %v925_v16  ;;  %s5782_s14 = smov 104   ;;  %v960_v32 = vsel %vm25_vm5, %v4745_v10, %v956_v28  ;;  %s5783_s27 = smov 103  }
  0x4e   :  { %v975_v18 = vsel %vm5_vm0, %v4749_v15, %v4748_v14  ;;  %v4750_v19 = vld [vmem:[%s10586_s0 + $0x120] sm:$0x4]   ;;  %930 = vrot.lane.b32.xlu1 %v929_v22, %s5782_s14  ;;  %v4756_v30 = vld [vmem:[%s10586_s0 + $0x77] sm:$0x1]   ;;  %v964_v38 = vsel %vm29_vm6, %v4746_v13, %v960_v32  ;;  %v4765_v46 = vld [vmem:[%s10586_s0 + $0x4c] sm:$0x1]  }
  0x4f   :  { %v4751_v20 = vld [vmem:[%s10586_s0 + $0x19f] sm:$0x8]   ;;  %v979_v24 = vsel %vm9_vm1, %v4750_v19, %v975_v18  ;;  %v4757_v31 = vld [vmem:[%s10586_s0 + $0xf6] sm:$0x2]   ;;  %v4766_v47 = vld [vmem:[%s10586_s0 + $0xcb] sm:$0x2]  }
  0x50   :  { %v4752_v21 = vld [vmem:[%s10586_s0 + $0x21e] sm:$0x10]   ;;  %v983_v29 = vsel %vm13_vm2, %v4751_v20, %v979_v24  ;;  %v1009_v34 = vsel %vm5_vm0, %v4757_v31, %v4756_v30  ;;  %v4758_v35 = vld [vmem:[%s10586_s0 + $0x175] sm:$0x4]   ;;  %v4767_v48 = vld [vmem:[%s10586_s0 + $0x14a] sm:$0x4]   ;;  %v1044_v51 = vsel %vm5_vm0, %v4766_v47, %v4765_v46 }
  0x51   :  { %v4753_v25 = vld [vmem:[%s10586_s0 + $0x29d] sm:$0x20]   ;;  %v987_v33 = vsel %vm17_vm3, %v4752_v21, %v983_v29  ;;  %v4759_v36 = vld [vmem:[%s10586_s0 + $0x1f4] sm:$0x8]   ;;  %v1013_v40 = vsel %vm9_vm1, %v4758_v35, %v1009_v34  ;;  %965 = vrot.lane.b32.xlu0 %v964_v38, %s5783_s27  ;;  %v4768_v52 = vld [vmem:[%s10586_s0 + $0x1c9] sm:$0x8]   ;;  %v1048_v56 = vsel %vm9_vm1, %v4767_v48, %v1044_v51 }
  0x52   :  { %v4754_v26 = vld [vmem:[%s10586_s0 + $0x31c] sm:$0x40]   ;;  %v4760_v37 = vld [vmem:[%s10586_s0 + $0x273] sm:$0x10]   ;;  %v991_v39 = vsel %vm21_vm4, %v4753_v25, %v987_v33  ;;  %v1017_v45 = vsel %vm13_vm2, %v4759_v36, %v1013_v40  ;;  %v4769_v53 = vld [vmem:[%s10586_s0 + $0x248] sm:$0x10]   ;;  %v1052_v60 = vsel %vm13_vm2, %v4768_v52, %v1048_v56 }
  0x53   :  { %v4755_v27 = vld [vmem:[%s10586_s0 + $0x39b] sm:$0x80]   ;;  %v4761_v41 = vld [vmem:[%s10586_s0 + $0x2f2] sm:$0x20]   ;;  %v995_v44 = vsel %vm25_vm5, %v4754_v26, %v991_v39  ;;  %v1021_v50 = vsel %vm17_vm3, %v4760_v37, %v1017_v45  ;;  %v4770_v54 = vld [vmem:[%s10586_s0 + $0x2c7] sm:$0x20]   ;;  %v1056_v1 = vsel %vm17_vm3, %v4769_v53, %v1052_v60 }
  0x54   :  { %v4762_v42 = vld [vmem:[%s10586_s0 + $0x371] sm:$0x40]   ;;  %v999_v49 = vsel %vm29_vm6, %v4755_v27, %v995_v44  ;;  %s5784_s15 = smov 102   ;;  %v1025_v55 = vsel %vm21_vm4, %v4761_v41, %v1021_v50  ;;  %v4771_v57 = vld [vmem:[%s10586_s0 + $0x346] sm:$0x40]   ;;  %s5785_s2 = smov 101   ;;  %v1060_v6 = vsel %vm21_vm4, %v4770_v54, %v1056_v1 }
  0x55   :  { %v4763_v43 = vld [vmem:[%s10586_s0 + $0x3f0] sm:$0x80]   ;;  %1000 = vrot.lane.b32.xlu1 %v999_v49, %s5784_s15  ;;  %v4772_v58 = vld [vmem:[%s10586_s0 + $0x3c5] sm:$0x80]   ;;  %v1029_v59 = vsel %vm25_vm5, %v4762_v42, %v1025_v55  ;;  %v4774_v61 = vld [vmem:[%s10586_s0 + $0x21] sm:$0x1]   ;;  %v1064_v11 = vsel %vm25_vm5, %v4771_v57, %v1060_v6 }
  0x56   :  { %v4775_v62 = vld [vmem:[%s10586_s0 + $0xa0] sm:$0x2]   ;;  %v1033_v0 = vsel %vm29_vm6, %v4763_v43, %v1029_v59  ;;  %v4782_v10 = vld [vmem:[%s10586_s0 + $0x76] sm:$0x1]   ;;  %v1068_v16 = vsel %vm29_vm6, %v4772_v58, %v1064_v11  ;;  %s5786_s21 = smov 100   ;;  %s5787_s9 = smov 99  }
  0x57   :  { %v4776_v63 = vld [vmem:[%s10586_s0 + $0x11f] sm:$0x4]   ;;  %v1079_v2 = vsel %vm5_vm0, %v4775_v62, %v4774_v61  ;;  %1034 = vrot.lane.b32.xlu0 %v1033_v0, %s5785_s2  ;;  %v4783_v13 = vld [vmem:[%s10586_s0 + $0xf5] sm:$0x2]   ;;  %v4791_v25 = vld [vmem:[%s10586_s0 + $0x4b] sm:$0x1]  }
  0x58   :  { %v4777_v3 = vld [vmem:[%s10586_s0 + $0x19e] sm:$0x8]   ;;  %v1083_v7 = vsel %vm9_vm1, %v4776_v63, %v1079_v2  ;;  %v4784_v14 = vld [vmem:[%s10586_s0 + $0x174] sm:$0x4]   ;;  %v1113_v18 = vsel %vm5_vm0, %v4783_v13, %v4782_v10  ;;  %v4792_v28 = vld [vmem:[%s10586_s0 + $0xca] sm:$0x2]  }
  0x59   :  { %v4778_v4 = vld [vmem:[%s10586_s0 + $0x21d] sm:$0x10]   ;;  %v1087_v12 = vsel %vm13_vm2, %v4777_v3, %v1083_v7  ;;  %v4785_v15 = vld [vmem:[%s10586_s0 + $0x1f3] sm:$0x8]   ;;  %1069 = vrot.lane.b32.xlu1 %v1068_v16, %s5786_s21  ;;  %v1117_v23 = vsel %vm9_vm1, %v4784_v14, %v1113_v18  ;;  %v4793_v29 = vld [vmem:[%s10586_s0 + $0x149] sm:$0x4]   ;;  %v1148_v33 = vsel %vm5_vm0, %v4792_v28, %v4791_v25 }
  0x5a   :  { %v4779_v5 = vld [vmem:[%s10586_s0 + $0x29c] sm:$0x20]   ;;  %v1091_v17 = vsel %vm17_vm3, %v4778_v4, %v1087_v12  ;;  %v4786_v19 = vld [vmem:[%s10586_s0 + $0x272] sm:$0x10]   ;;  %v1121_v27 = vsel %vm13_vm2, %v4785_v15, %v1117_v23  ;;  %v4794_v30 = vld [vmem:[%s10586_s0 + $0x1c8] sm:$0x8]   ;;  %v1152_v38 = vsel %vm9_vm1, %v4793_v29, %v1148_v33 }
  0x5b   :  { %v4780_v8 = vld [vmem:[%s10586_s0 + $0x31b] sm:$0x40]   ;;  %v4787_v20 = vld [vmem:[%s10586_s0 + $0x2f1] sm:$0x20]   ;;  %v1095_v22 = vsel %vm21_vm4, %v4779_v5, %v1091_v17  ;;  %v1125_v32 = vsel %vm17_vm3, %v4786_v19, %v1121_v27  ;;  %v4795_v34 = vld [vmem:[%s10586_s0 + $0x247] sm:$0x10]   ;;  %v1156_v43 = vsel %vm13_vm2, %v4794_v30, %v1152_v38 }
  0x5c   :  { %v4781_v9 = vld [vmem:[%s10586_s0 + $0x39a] sm:$0x80]   ;;  %v4788_v21 = vld [vmem:[%s10586_s0 + $0x370] sm:$0x40]   ;;  %v1099_v26 = vsel %vm25_vm5, %v4780_v8, %v1095_v22  ;;  %v4796_v35 = vld [vmem:[%s10586_s0 + $0x2c6] sm:$0x20]   ;;  %v1129_v37 = vsel %vm21_vm4, %v4787_v20, %v1125_v32  ;;  %v1160_v49 = vsel %vm17_vm3, %v4795_v34, %v1156_v43 }
  0x5d   :  { %v4789_v24 = vld [vmem:[%s10586_s0 + $0x3ef] sm:$0x80]   ;;  %v1103_v31 = vsel %vm29_vm6, %v4781_v9, %v1099_v26  ;;  %v4797_v36 = vld [vmem:[%s10586_s0 + $0x345] sm:$0x40]   ;;  %v4800_v40 = vld [vmem:[%s10586_s0 + $0x20] sm:$0x1]   ;;  %v1133_v42 = vsel %vm25_vm5, %v4788_v21, %v1129_v37  ;;  %v1164_v54 = vsel %vm21_vm4, %v4796_v35, %v1160_v49 }
  0x5e   :  { %1104 = vrot.lane.b32.xlu0 %v1103_v31, %s5787_s9  ;;  %v4798_v39 = vld [vmem:[%s10586_s0 + $0x3c4] sm:$0x80]   ;;  %v4801_v41 = vld [vmem:[%s10586_s0 + $0x9f] sm:$0x2]   ;;  %v1137_v48 = vsel %vm29_vm6, %v4789_v24, %v1133_v42  ;;  %s5788_s29 = smov 98   ;;  %v1168_v58 = vsel %vm25_vm5, %v4797_v36, %v1164_v54  ;;  %s5789_s17 = smov 97  }
  0x5f   :  { %v1183_v44 = vsel %vm5_vm0, %v4801_v41, %v4800_v40  ;;  %v4802_v45 = vld [vmem:[%s10586_s0 + $0x11e] sm:$0x4]   ;;  %1138 = vrot.lane.b32.xlu1 %v1137_v48, %s5788_s29  ;;  %v4808_v56 = vld [vmem:[%s10586_s0 + $0x75] sm:$0x1]   ;;  %v1172_v0 = vsel %vm29_vm6, %v4798_v39, %v1168_v58  ;;  %v4817_v8 = vld [vmem:[%s10586_s0 + $0x4a] sm:$0x1]  }
  0x60   :  { %v4803_v46 = vld [vmem:[%s10586_s0 + $0x19d] sm:$0x8]   ;;  %v1187_v50 = vsel %vm9_vm1, %v4802_v45, %v1183_v44  ;;  %v4809_v57 = vld [vmem:[%s10586_s0 + $0xf4] sm:$0x2]   ;;  %v4818_v9 = vld [vmem:[%s10586_s0 + $0xc9] sm:$0x2]  }
  0x61   :  { %v4804_v47 = vld [vmem:[%s10586_s0 + $0x21c] sm:$0x10]   ;;  %v1191_v55 = vsel %vm13_vm2, %v4803_v46, %v1187_v50  ;;  %v1217_v60 = vsel %vm5_vm0, %v4809_v57, %v4808_v56  ;;  %v4810_v61 = vld [vmem:[%s10586_s0 + $0x173] sm:$0x4]   ;;  %v4819_v10 = vld [vmem:[%s10586_s0 + $0x148] sm:$0x4]   ;;  %v1252_v13 = vsel %vm5_vm0, %v4818_v9, %v4817_v8 }
  0x62   :  { %v4805_v51 = vld [vmem:[%s10586_s0 + $0x29b] sm:$0x20]   ;;  %v1195_v59 = vsel %vm17_vm3, %v4804_v47, %v1191_v55  ;;  %v4811_v62 = vld [vmem:[%s10586_s0 + $0x1f2] sm:$0x8]   ;;  %v1221_v2 = vsel %vm9_vm1, %v4810_v61, %v1217_v60  ;;  %1173 = vrot.lane.b32.xlu0 %v1172_v0, %s5789_s17  ;;  %v4820_v14 = vld [vmem:[%s10586_s0 + $0x1c7] sm:$0x8]   ;;  %v1256_v18 = vsel %vm9_vm1, %v4819_v10, %v1252_v13 }
  0x63   :  { %v4806_v52 = vld [vmem:[%s10586_s0 + $0x31a] sm:$0x40]   ;;  %v4812_v63 = vld [vmem:[%s10586_s0 + $0x271] sm:$0x10]   ;;  %v1199_v1 = vsel %vm21_vm4, %v4805_v51, %v1195_v59  ;;  %v1225_v7 = vsel %vm13_vm2, %v4811_v62, %v1221_v2  ;;  %v4821_v15 = vld [vmem:[%s10586_s0 + $0x246] sm:$0x10]   ;;  %v1260_v22 = vsel %vm13_vm2, %v4820_v14, %v1256_v18 }
  0x64   :  { %v4807_v53 = vld [vmem:[%s10586_s0 + $0x399] sm:$0x80]   ;;  %v4813_v3 = vld [vmem:[%s10586_s0 + $0x2f0] sm:$0x20]   ;;  %v1203_v6 = vsel %vm25_vm5, %v4806_v52, %v1199_v1  ;;  %v1229_v12 = vsel %vm17_vm3, %v4812_v63, %v1225_v7  ;;  %v4822_v16 = vld [vmem:[%s10586_s0 + $0x2c5] sm:$0x20]   ;;  %v1264_v27 = vsel %vm17_vm3, %v4821_v15, %v1260_v22 }
  0x65   :  { %v4814_v4 = vld [vmem:[%s10586_s0 + $0x36f] sm:$0x40]   ;;  %v1207_v11 = vsel %vm29_vm6, %v4807_v53, %v1203_v6  ;;  %s5790_s30 = smov 96   ;;  %v1233_v17 = vsel %vm21_vm4, %v4813_v3, %v1229_v12  ;;  %v4823_v19 = vld [vmem:[%s10586_s0 + $0x344] sm:$0x40]   ;;  %s5791_s11 = smov 95   ;;  %v1268_v32 = vsel %vm21_vm4, %v4822_v16, %v1264_v27 }
  0x66   :  { %v4815_v5 = vld [vmem:[%s10586_s0 + $0x3ee] sm:$0x80]   ;;  %1208 = vrot.lane.b32.xlu1 %v1207_v11, %s5790_s30  ;;  %v4824_v20 = vld [vmem:[%s10586_s0 + $0x3c3] sm:$0x80]   ;;  %v1237_v21 = vsel %vm25_vm5, %v4814_v4, %v1233_v17  ;;  %v4826_v23 = vld [vmem:[%s10586_s0 + $0x1f] sm:$0x1]   ;;  %v1272_v37 = vsel %vm25_vm5, %v4823_v19, %v1268_v32 }
  0x67   :  { %v4827_v24 = vld [vmem:[%s10586_s0 + $0x9e] sm:$0x2]   ;;  %v1241_v26 = vsel %vm29_vm6, %v4815_v5, %v1237_v21  ;;  %v4834_v36 = vld [vmem:[%s10586_s0 + $0x74] sm:$0x1]   ;;  %v1276_v42 = vsel %vm29_vm6, %v4824_v20, %v1272_v37  ;;  %s5792_s7 = smov 94   ;;  %s5793_s24 = smov 93  }
  0x68   :  { %v4828_v25 = vld [vmem:[%s10586_s0 + $0x11d] sm:$0x4]   ;;  %v1287_v28 = vsel %vm5_vm0, %v4827_v24, %v4826_v23  ;;  %1242 = vrot.lane.b32.xlu0 %v1241_v26, %s5791_s11  ;;  %v4835_v39 = vld [vmem:[%s10586_s0 + $0xf3] sm:$0x2]   ;;  %v4843_v51 = vld [vmem:[%s10586_s0 + $0x49] sm:$0x1]  }
  0x69   :  { %v4829_v29 = vld [vmem:[%s10586_s0 + $0x19c] sm:$0x8]   ;;  %v1291_v33 = vsel %vm9_vm1, %v4828_v25, %v1287_v28  ;;  %v4836_v40 = vld [vmem:[%s10586_s0 + $0x172] sm:$0x4]   ;;  %v1321_v44 = vsel %vm5_vm0, %v4835_v39, %v4834_v36  ;;  %v4844_v54 = vld [vmem:[%s10586_s0 + $0xc8] sm:$0x2]  }
  0x6a   :  { %v4830_v30 = vld [vmem:[%s10586_s0 + $0x21b] sm:$0x10]   ;;  %v1295_v38 = vsel %vm13_vm2, %v4829_v29, %v1291_v33  ;;  %v4837_v41 = vld [vmem:[%s10586_s0 + $0x1f1] sm:$0x8]   ;;  %1277 = vrot.lane.b32.xlu1 %v1276_v42, %s5792_s7  ;;  %v1325_v49 = vsel %vm9_vm1, %v4836_v40, %v1321_v44  ;;  %v4845_v55 = vld [vmem:[%s10586_s0 + $0x147] sm:$0x4]   ;;  %v1356_v59 = vsel %vm5_vm0, %v4844_v54, %v4843_v51 }
  0x6b   :  { %v4831_v31 = vld [vmem:[%s10586_s0 + $0x29a] sm:$0x20]   ;;  %v1299_v43 = vsel %vm17_vm3, %v4830_v30, %v1295_v38  ;;  %v4838_v45 = vld [vmem:[%s10586_s0 + $0x270] sm:$0x10]   ;;  %v1329_v53 = vsel %vm13_vm2, %v4837_v41, %v1325_v49  ;;  %v4846_v56 = vld [vmem:[%s10586_s0 + $0x1c6] sm:$0x8]   ;;  %v1360_v0 = vsel %vm9_vm1, %v4845_v55, %v1356_v59 }
  0x6c   :  { %v4832_v34 = vld [vmem:[%s10586_s0 + $0x319] sm:$0x40]   ;;  %v4839_v46 = vld [vmem:[%s10586_s0 + $0x2ef] sm:$0x20]   ;;  %v1303_v48 = vsel %vm21_vm4, %v4831_v31, %v1299_v43  ;;  %v1333_v58 = vsel %vm17_vm3, %v4838_v45, %v1329_v53  ;;  %v4847_v60 = vld [vmem:[%s10586_s0 + $0x245] sm:$0x10]   ;;  %v1364_v5 = vsel %vm13_vm2, %v4846_v56, %v1360_v0 }
  0x6d   :  { %v4833_v35 = vld [vmem:[%s10586_s0 + $0x398] sm:$0x80]   ;;  %v4840_v47 = vld [vmem:[%s10586_s0 + $0x36e] sm:$0x40]   ;;  %v1307_v52 = vsel %vm25_vm5, %v4832_v34, %v1303_v48  ;;  %v4848_v61 = vld [vmem:[%s10586_s0 + $0x2c4] sm:$0x20]   ;;  %v1337_v63 = vsel %vm21_vm4, %v4839_v46, %v1333_v58  ;;  %v1368_v11 = vsel %vm17_vm3, %v4847_v60, %v1364_v5 }
  0x6e   :  { %v4841_v50 = vld [vmem:[%s10586_s0 + $0x3ed] sm:$0x80]   ;;  %v1311_v57 = vsel %vm29_vm6, %v4833_v35, %v1307_v52  ;;  %v4849_v62 = vld [vmem:[%s10586_s0 + $0x343] sm:$0x40]   ;;  %v4852_v2 = vld [vmem:[%s10586_s0 + $0x1e] sm:$0x1]   ;;  %v1341_v4 = vsel %vm25_vm5, %v4840_v47, %v1337_v63  ;;  %v1372_v16 = vsel %vm21_vm4, %v4848_v61, %v1368_v11 }
  0x6f   :  { %1312 = vrot.lane.b32.xlu0 %v1311_v57, %s5793_s24  ;;  %v4850_v1 = vld [vmem:[%s10586_s0 + $0x3c2] sm:$0x80]   ;;  %v4853_v3 = vld [vmem:[%s10586_s0 + $0x9d] sm:$0x2]   ;;  %v1345_v10 = vsel %vm29_vm6, %v4841_v50, %v1341_v4  ;;  %s5794_s15 = smov 92   ;;  %v1376_v20 = vsel %vm25_vm5, %v4849_v62, %v1372_v16  ;;  %s5795_s2 = smov 91  }
  0x70   :  { %v1391_v6 = vsel %vm5_vm0, %v4853_v3, %v4852_v2  ;;  %v4854_v7 = vld [vmem:[%s10586_s0 + $0x11c] sm:$0x4]   ;;  %1346 = vrot.lane.b32.xlu1 %v1345_v10, %s5794_s15  ;;  %v4860_v18 = vld [vmem:[%s10586_s0 + $0x73] sm:$0x1]   ;;  %v1380_v26 = vsel %vm29_vm6, %v4850_v1, %v1376_v20  ;;  %v4869_v34 = vld [vmem:[%s10586_s0 + $0x48] sm:$0x1]  }
  0x71   :  { %v4855_v8 = vld [vmem:[%s10586_s0 + $0x19b] sm:$0x8]   ;;  %v1395_v12 = vsel %vm9_vm1, %v4854_v7, %v1391_v6  ;;  %v4861_v19 = vld [vmem:[%s10586_s0 + $0xf2] sm:$0x2]   ;;  %v4870_v35 = vld [vmem:[%s10586_s0 + $0xc7] sm:$0x2]  }
  0x72   :  { %v4856_v9 = vld [vmem:[%s10586_s0 + $0x21a] sm:$0x10]   ;;  %v1399_v17 = vsel %vm13_vm2, %v4855_v8, %v1395_v12  ;;  %v1425_v22 = vsel %vm5_vm0, %v4861_v19, %v4860_v18  ;;  %v4862_v23 = vld [vmem:[%s10586_s0 + $0x171] sm:$0x4]   ;;  %v4871_v36 = vld [vmem:[%s10586_s0 + $0x146] sm:$0x4]   ;;  %v1460_v39 = vsel %vm5_vm0, %v4870_v35, %v4869_v34 }
  0x73   :  { %v4857_v13 = vld [vmem:[%s10586_s0 + $0x299] sm:$0x20]   ;;  %v1403_v21 = vsel %vm17_vm3, %v4856_v9, %v1399_v17  ;;  %v4863_v24 = vld [vmem:[%s10586_s0 + $0x1f0] sm:$0x8]   ;;  %v1429_v28 = vsel %vm9_vm1, %v4862_v23, %v1425_v22  ;;  %1381 = vrot.lane.b32.xlu0 %v1380_v26, %s5795_s2  ;;  %v4872_v40 = vld [vmem:[%s10586_s0 + $0x1c5] sm:$0x8]   ;;  %v1464_v44 = vsel %vm9_vm1, %v4871_v36, %v1460_v39 }
  0x74   :  { %v4858_v14 = vld [vmem:[%s10586_s0 + $0x318] sm:$0x40]   ;;  %v4864_v25 = vld [vmem:[%s10586_s0 + $0x26f] sm:$0x10]   ;;  %v1407_v27 = vsel %vm21_vm4, %v4857_v13, %v1403_v21  ;;  %v1433_v33 = vsel %vm13_vm2, %v4863_v24, %v1429_v28  ;;  %v4873_v41 = vld [vmem:[%s10586_s0 + $0x244] sm:$0x10]   ;;  %v1468_v48 = vsel %vm13_vm2, %v4872_v40, %v1464_v44 }
  0x75   :  { %v4859_v15 = vld [vmem:[%s10586_s0 + $0x397] sm:$0x80]   ;;  %v4865_v29 = vld [vmem:[%s10586_s0 + $0x2ee] sm:$0x20]   ;;  %v1411_v32 = vsel %vm25_vm5, %v4858_v14, %v1407_v27  ;;  %v1437_v38 = vsel %vm17_vm3, %v4864_v25, %v1433_v33  ;;  %v4874_v42 = vld [vmem:[%s10586_s0 + $0x2c3] sm:$0x20]   ;;  %v1472_v53 = vsel %vm17_vm3, %v4873_v41, %v1468_v48 }
  0x76   :  { %v4866_v30 = vld [vmem:[%s10586_s0 + $0x36d] sm:$0x40]   ;;  %v1415_v37 = vsel %vm29_vm6, %v4859_v15, %v1411_v32  ;;  %s5796_s16 = smov 90   ;;  %v1441_v43 = vsel %vm21_vm4, %v4865_v29, %v1437_v38  ;;  %v4875_v45 = vld [vmem:[%s10586_s0 + $0x342] sm:$0x40]   ;;  %s5797_s3 = smov 89   ;;  %v1476_v58 = vsel %vm21_vm4, %v4874_v42, %v1472_v53 }
  0x77   :  { %v4867_v31 = vld [vmem:[%s10586_s0 + $0x3ec] sm:$0x80]   ;;  %1416 = vrot.lane.b32.xlu1 %v1415_v37, %s5796_s16  ;;  %v4876_v46 = vld [vmem:[%s10586_s0 + $0x3c1] sm:$0x80]   ;;  %v1445_v47 = vsel %vm25_vm5, %v4866_v30, %v1441_v43  ;;  %v4878_v49 = vld [vmem:[%s10586_s0 + $0x1d] sm:$0x1]   ;;  %v1480_v63 = vsel %vm25_vm5, %v4875_v45, %v1476_v58 }
  0x78   :  { %v4879_v50 = vld [vmem:[%s10586_s0 + $0x9c] sm:$0x2]   ;;  %v1449_v52 = vsel %vm29_vm6, %v4867_v31, %v1445_v47  ;;  %v4886_v62 = vld [vmem:[%s10586_s0 + $0x72] sm:$0x1]   ;;  %v1484_v4 = vsel %vm29_vm6, %v4876_v46, %v1480_v63  ;;  %s5798_s22 = smov 88   ;;  %s5799_s10 = smov 87  }
  0x79   :  { %v4880_v51 = vld [vmem:[%s10586_s0 + $0x11b] sm:$0x4]   ;;  %v1495_v54 = vsel %vm5_vm0, %v4879_v50, %v4878_v49  ;;  %1450 = vrot.lane.b32.xlu0 %v1449_v52, %s5797_s3  ;;  %v4887_v1 = vld [vmem:[%s10586_s0 + $0xf1] sm:$0x2]   ;;  %v4895_v14 = vld [vmem:[%s10586_s0 + $0x47] sm:$0x1]  }
  0x7a   :  { %v4881_v55 = vld [vmem:[%s10586_s0 + $0x19a] sm:$0x8]   ;;  %v1499_v59 = vsel %vm9_vm1, %v4880_v51, %v1495_v54  ;;  %v4888_v2 = vld [vmem:[%s10586_s0 + $0x170] sm:$0x4]   ;;  %v1529_v6 = vsel %vm5_vm0, %v4887_v1, %v4886_v62  ;;  %v4896_v17 = vld [vmem:[%s10586_s0 + $0xc6] sm:$0x2]  }
  0x7b   :  { %v4882_v56 = vld [vmem:[%s10586_s0 + $0x219] sm:$0x10]   ;;  %v1503_v0 = vsel %vm13_vm2, %v4881_v55, %v1499_v59  ;;  %v4889_v3 = vld [vmem:[%s10586_s0 + $0x1ef] sm:$0x8]   ;;  %1485 = vrot.lane.b32.xlu1 %v1484_v4, %s5798_s22  ;;  %v1533_v12 = vsel %vm9_vm1, %v4888_v2, %v1529_v6  ;;  %v4897_v18 = vld [vmem:[%s10586_s0 + $0x145] sm:$0x4]   ;;  %v1564_v23 = vsel %vm5_vm0, %v4896_v17, %v4895_v14 }
  0x7c   :  { %v4883_v57 = vld [vmem:[%s10586_s0 + $0x298] sm:$0x20]   ;;  %v1507_v5 = vsel %vm17_vm3, %v4882_v56, %v1503_v0  ;;  %v4890_v7 = vld [vmem:[%s10586_s0 + $0x26e] sm:$0x10]   ;;  %v7252_v10 = vpop.permute.xlu0 %63   ;;  %v1537_v16 = vsel %vm13_vm2, %v4889_v3, %v1533_v12  ;;  %v4898_v19 = vld [vmem:[%s10586_s0 + $0x1c4] sm:$0x8]   ;;  %v1568_v28 = vsel %vm9_vm1, %v4897_v18, %v1564_v23 }
  0x7d   :  { %v4884_v60 = vld [vmem:[%s10586_s0 + $0x317] sm:$0x40]   ;;  %v4891_v8 = vld [vmem:[%s10586_s0 + $0x2ed] sm:$0x20]   ;;  %v1511_v11 = vsel %vm21_vm4, %v4883_v57, %v1507_v5  ;;  %v7273_v20 = vpop.permute.xlu1 %133   ;;  %v1541_v22 = vsel %vm17_vm3, %v4890_v7, %v1537_v16  ;;  %v4899_v24 = vld [vmem:[%s10586_s0 + $0x243] sm:$0x10]   ;;  %v1572_v33 = vsel %vm13_vm2, %v4898_v19, %v1568_v28 }
  0x7e   :  { %v4885_v61 = vld [vmem:[%s10586_s0 + $0x396] sm:$0x80]   ;;  %v4892_v9 = vld [vmem:[%s10586_s0 + $0x36c] sm:$0x40]   ;;  %v1515_v15 = vsel %vm25_vm5, %v4884_v60, %v1511_v11  ;;  %v4900_v25 = vld [vmem:[%s10586_s0 + $0x2c2] sm:$0x20]   ;;  %v1545_v27 = vsel %vm21_vm4, %v4891_v8, %v1541_v22  ;;  %v1576_v40 = vsel %vm17_vm3, %v4899_v24, %v1572_v33 }
  0x7f   :  { %v4893_v13 = vld [vmem:[%s10586_s0 + $0x3eb] sm:$0x80]   ;;  %v1519_v21 = vsel %vm29_vm6, %v4885_v61, %v1515_v15  ;;  %v4901_v26 = vld [vmem:[%s10586_s0 + $0x341] sm:$0x40]   ;;  %v4904_v30 = vld [vmem:[%s10586_s0 + $0x1c] sm:$0x1]   ;;  %v1549_v32 = vsel %vm25_vm5, %v4892_v9, %v1545_v27  ;;  %v1580_v45 = vsel %vm21_vm4, %v4900_v25, %v1576_v40 }
  0x80   :  { %1520 = vrot.lane.b32.xlu0 %v1519_v21, %s5799_s10  ;;  %v4902_v29 = vld [vmem:[%s10586_s0 + $0x3c0] sm:$0x80]   ;;  %v4905_v31 = vld [vmem:[%s10586_s0 + $0x9b] sm:$0x2]   ;;  %v1553_v39 = vsel %vm29_vm6, %v4893_v13, %v1549_v32  ;;  %s5800_s30 = smov 86   ;;  %v1584_v49 = vsel %vm25_vm5, %v4901_v26, %v1580_v45  ;;  %s5801_s11 = smov 85  }
  0x81   :  { %v1599_v34 = vsel %vm5_vm0, %v4905_v31, %v4904_v30  ;;  %v4906_v35 = vld [vmem:[%s10586_s0 + $0x11a] sm:$0x4]   ;;  %1554 = vrot.lane.b32.xlu1 %v1553_v39, %s5800_s30  ;;  %v4912_v47 = vld [vmem:[%s10586_s0 + $0x71] sm:$0x1]   ;;  %v1588_v56 = vsel %vm29_vm6, %v4902_v29, %v1584_v49  ;;  %v4921_v0 = vld [vmem:[%s10586_s0 + $0x46] sm:$0x1]  }
  0x82   :  { %v4907_v36 = vld [vmem:[%s10586_s0 + $0x199] sm:$0x8]   ;;  %v1603_v41 = vsel %vm9_vm1, %v4906_v35, %v1599_v34  ;;  %v4913_v48 = vld [vmem:[%s10586_s0 + $0xf0] sm:$0x2]   ;;  %v4922_v1 = vld [vmem:[%s10586_s0 + $0xc5] sm:$0x2]  }
  0x83   :  { %v4908_v37 = vld [vmem:[%s10586_s0 + $0x218] sm:$0x10]   ;;  %v1607_v46 = vsel %vm13_vm2, %v4907_v36, %v1603_v41  ;;  %v1633_v51 = vsel %vm5_vm0, %v4913_v48, %v4912_v47  ;;  %v4914_v52 = vld [vmem:[%s10586_s0 + $0x16f] sm:$0x4]   ;;  %v4923_v2 = vld [vmem:[%s10586_s0 + $0x144] sm:$0x4]   ;;  %v1668_v6 = vsel %vm5_vm0, %v4922_v1, %v4921_v0 }
  0x84   :  { %v7310_v38 = vpop.permute.xlu0 %98   ;;  %v4909_v42 = vld [vmem:[%s10586_s0 + $0x297] sm:$0x20]   ;;  %v1611_v50 = vsel %vm17_vm3, %v4908_v37, %v1607_v46  ;;  %v4915_v53 = vld [vmem:[%s10586_s0 + $0x1ee] sm:$0x8]   ;;  %v1637_v58 = vsel %vm9_vm1, %v4914_v52, %v1633_v51  ;;  %1589 = vrot.lane.b32.xlu0 %v1588_v56, %s5801_s11  ;;  %v4924_v7 = vld [vmem:[%s10586_s0 + $0x1c3] sm:$0x8]   ;;  %v1672_v12 = vsel %vm9_vm1, %v4923_v2, %v1668_v6 }
  0x85   :  { %v4910_v43 = vld [vmem:[%s10586_s0 + $0x316] sm:$0x40]   ;;  %v4916_v54 = vld [vmem:[%s10586_s0 + $0x26d] sm:$0x10]   ;;  %v7344_v55 = vpop.permute.xlu1 %168   ;;  %v1615_v57 = vsel %vm21_vm4, %v4909_v42, %v1611_v50  ;;  %v1641_v63 = vsel %vm13_vm2, %v4915_v53, %v1637_v58  ;;  %v4925_v8 = vld [vmem:[%s10586_s0 + $0x242] sm:$0x10]   ;;  %v1676_v16 = vsel %vm13_vm2, %v4924_v7, %v1672_v12 }
  0x86   :  { %v4911_v44 = vld [vmem:[%s10586_s0 + $0x395] sm:$0x80]   ;;  %v4917_v59 = vld [vmem:[%s10586_s0 + $0x2ec] sm:$0x20]   ;;  %v1619_v62 = vsel %vm25_vm5, %v4910_v43, %v1615_v57  ;;  %v1645_v5 = vsel %vm17_vm3, %v4916_v54, %v1641_v63  ;;  %v4926_v9 = vld [vmem:[%s10586_s0 + $0x2c1] sm:$0x20]   ;;  %v1680_v23 = vsel %vm17_vm3, %v4925_v8, %v1676_v16 }
  0x87   :  { %v4918_v60 = vld [vmem:[%s10586_s0 + $0x36b] sm:$0x40]   ;;  %v1623_v4 = vsel %vm29_vm6, %v4911_v44, %v1619_v62  ;;  %s5802_s27 = smov 84   ;;  %v1649_v11 = vsel %vm21_vm4, %v4917_v59, %v1645_v5  ;;  %v4927_v13 = vld [vmem:[%s10586_s0 + $0x340] sm:$0x40]   ;;  %s5803_s18 = smov 83   ;;  %v1684_v28 = vsel %vm21_vm4, %v4926_v9, %v1680_v23 }
  0x88   :  { %v4919_v61 = vld [vmem:[%s10586_s0 + $0x3ea] sm:$0x80]   ;;  %v7369_v3 = vpop.permute.xlu0 %202   ;;  %1624 = vrot.lane.b32.xlu1 %v1623_v4, %s5802_s27  ;;  %v4928_v14 = vld [vmem:[%s10586_s0 + $0x3bf] sm:$0x80]   ;;  %v1653_v15 = vsel %vm25_vm5, %v4918_v60, %v1649_v11  ;;  %v4930_v17 = vld [vmem:[%s10586_s0 + $0x1b] sm:$0x1]   ;;  %v1688_v33 = vsel %vm25_vm5, %v4927_v13, %v1684_v28 }
  0x89   :  { %v4931_v18 = vld [vmem:[%s10586_s0 + $0x9a] sm:$0x2]   ;;  %v7402_v21 = vpop.permute.xlu1 %237   ;;  %v1657_v22 = vsel %vm29_vm6, %v4919_v61, %v1653_v15  ;;  %v4938_v32 = vld [vmem:[%s10586_s0 + $0x70] sm:$0x1]   ;;  %v1692_v40 = vsel %vm29_vm6, %v4928_v14, %v1688_v33  ;;  %s5804_s8 = smov 82   ;;  %s5805_s25 = smov 81  }
  0x8a   :  { %v4932_v19 = vld [vmem:[%s10586_s0 + $0x119] sm:$0x4]   ;;  %v1703_v24 = vsel %vm5_vm0, %v4931_v18, %v4930_v17  ;;  %1658 = vrot.lane.b32.xlu0 %v1657_v22, %s5803_s18  ;;  %v4939_v35 = vld [vmem:[%s10586_s0 + $0xef] sm:$0x2]   ;;  %v4947_v49 = vld [vmem:[%s10586_s0 + $0x45] sm:$0x1]  }
  0x8b   :  { %v4933_v25 = vld [vmem:[%s10586_s0 + $0x198] sm:$0x8]   ;;  %v1707_v29 = vsel %vm9_vm1, %v4932_v19, %v1703_v24  ;;  %v4940_v36 = vld [vmem:[%s10586_s0 + $0x16e] sm:$0x4]   ;;  %v1737_v42 = vsel %vm5_vm0, %v4939_v35, %v4938_v32  ;;  %v4948_v52 = vld [vmem:[%s10586_s0 + $0xc4] sm:$0x2]  }
  0x8c   :  { %v4934_v26 = vld [vmem:[%s10586_s0 + $0x217] sm:$0x10]   ;;  %v1711_v34 = vsel %vm13_vm2, %v4933_v25, %v1707_v29  ;;  %v4941_v37 = vld [vmem:[%s10586_s0 + $0x1ed] sm:$0x8]   ;;  %v7438_v39 = vpop.permute.xlu0 %272   ;;  %1693 = vrot.lane.b32.xlu1 %v1692_v40, %s5804_s8  ;;  %v1741_v47 = vsel %vm9_vm1, %v4940_v36, %v1737_v42  ;;  %v4949_v53 = vld [vmem:[%s10586_s0 + $0x143] sm:$0x4]   ;;  %v1772_v59 = vsel %vm5_vm0, %v4948_v52, %v4947_v49 }
  0x8d   :  { %v4935_v27 = vld [vmem:[%s10586_s0 + $0x296] sm:$0x20]   ;;  %v1715_v41 = vsel %vm17_vm3, %v4934_v26, %v1711_v34  ;;  %v4942_v43 = vld [vmem:[%s10586_s0 + $0x26c] sm:$0x10]   ;;  %v1745_v51 = vsel %vm13_vm2, %v4941_v37, %v1741_v47  ;;  %v4950_v54 = vld [vmem:[%s10586_s0 + $0x1c2] sm:$0x8]   ;;  %v7471_v56 = vpop.permute.xlu1 %306   ;;  %v1776_v0 = vsel %vm9_vm1, %v4949_v53, %v1772_v59 }
  0x8e   :  { %v4936_v30 = vld [vmem:[%s10586_s0 + $0x315] sm:$0x40]   ;;  %v4943_v44 = vld [vmem:[%s10586_s0 + $0x2eb] sm:$0x20]   ;;  %v1719_v46 = vsel %vm21_vm4, %v4935_v27, %v1715_v41  ;;  %v1749_v58 = vsel %vm17_vm3, %v4942_v43, %v1745_v51  ;;  %v4951_v60 = vld [vmem:[%s10586_s0 + $0x241] sm:$0x10]   ;;  %v1780_v6 = vsel %vm13_vm2, %v4950_v54, %v1776_v0 }
  0x8f   :  { %v4937_v31 = vld [vmem:[%s10586_s0 + $0x394] sm:$0x80]   ;;  %v4944_v45 = vld [vmem:[%s10586_s0 + $0x36a] sm:$0x40]   ;;  %v1723_v50 = vsel %vm25_vm5, %v4936_v30, %v1719_v46  ;;  %v4952_v61 = vld [vmem:[%s10586_s0 + $0x2c0] sm:$0x20]   ;;  %v1753_v63 = vsel %vm21_vm4, %v4943_v44, %v1749_v58  ;;  %v1784_v14 = vsel %vm17_vm3, %v4951_v60, %v1780_v6 }
  0x90   :  { %v4945_v48 = vld [vmem:[%s10586_s0 + $0x3e9] sm:$0x80]   ;;  %v1727_v57 = vsel %vm29_vm6, %v4937_v31, %v1723_v50  ;;  %v4953_v62 = vld [vmem:[%s10586_s0 + $0x33f] sm:$0x40]   ;;  %v4956_v2 = vld [vmem:[%s10586_s0 + $0x1a] sm:$0x1]   ;;  %v1757_v5 = vsel %vm25_vm5, %v4944_v45, %v1753_v63  ;;  %v7508_v12 = vpop.permute.xlu0 %341   ;;  %v1788_v19 = vsel %vm21_vm4, %v4952_v61, %v1784_v14 }
  0x91   :  { %1728 = vrot.lane.b32.xlu0 %v1727_v57, %s5805_s25  ;;  %v4954_v1 = vld [vmem:[%s10586_s0 + $0x3be] sm:$0x80]   ;;  %v4957_v4 = vld [vmem:[%s10586_s0 + $0x99] sm:$0x2]   ;;  %v1761_v13 = vsel %vm29_vm6, %v4945_v48, %v1757_v5  ;;  %s5806_s16 = smov 80   ;;  %v1792_v26 = vsel %vm25_vm5, %v4953_v62, %v1788_v19  ;;  %s5807_s3 = smov 79  }
  0x92   :  { %v1807_v7 = vsel %vm5_vm0, %v4957_v4, %v4956_v2  ;;  %v4958_v8 = vld [vmem:[%s10586_s0 + $0x118] sm:$0x4]   ;;  %1762 = vrot.lane.b32.xlu1 %v1761_v13, %s5806_s16  ;;  %v4964_v23 = vld [vmem:[%s10586_s0 + $0x6f] sm:$0x1]   ;;  %v1796_v32 = vsel %vm29_vm6, %v4954_v1, %v1792_v26  ;;  %v4973_v42 = vld [vmem:[%s10586_s0 + $0x44] sm:$0x1]  }
  0x93   :  { %v4959_v9 = vld [vmem:[%s10586_s0 + $0x197] sm:$0x8]   ;;  %v1811_v15 = vsel %vm9_vm1, %v4958_v8, %v1807_v7  ;;  %v4965_v24 = vld [vmem:[%s10586_s0 + $0xee] sm:$0x2]   ;;  %v4974_v43 = vld [vmem:[%s10586_s0 + $0xc3] sm:$0x2]  }
  0x94   :  { %v4960_v11 = vld [vmem:[%s10586_s0 + $0x216] sm:$0x10]   ;;  %v1815_v22 = vsel %vm13_vm2, %v4959_v9, %v1811_v15  ;;  %v7530_v25 = vpop.permute.xlu1 %376   ;;  %v1841_v28 = vsel %vm5_vm0, %v4965_v24, %v4964_v23  ;;  %v4966_v29 = vld [vmem:[%s10586_s0 + $0x16d] sm:$0x4]   ;;  %v4975_v44 = vld [vmem:[%s10586_s0 + $0x142] sm:$0x4]   ;;  %v1876_v48 = vsel %vm5_vm0, %v4974_v43, %v4973_v42 }
  0x95   :  { %v4961_v16 = vld [vmem:[%s10586_s0 + $0x295] sm:$0x20]   ;;  %v1819_v27 = vsel %vm17_vm3, %v4960_v11, %v1815_v22  ;;  %v4967_v30 = vld [vmem:[%s10586_s0 + $0x1ec] sm:$0x8]   ;;  %v1845_v34 = vsel %vm9_vm1, %v4966_v29, %v1841_v28  ;;  %1797 = vrot.lane.b32.xlu0 %v1796_v32, %s5807_s3  ;;  %v4976_v49 = vld [vmem:[%s10586_s0 + $0x1c1] sm:$0x8]   ;;  %v1880_v53 = vsel %vm9_vm1, %v4975_v44, %v1876_v48 }
  0x96   :  { %v4962_v17 = vld [vmem:[%s10586_s0 + $0x314] sm:$0x40]   ;;  %v4968_v31 = vld [vmem:[%s10586_s0 + $0x26b] sm:$0x10]   ;;  %v1823_v33 = vsel %vm21_vm4, %v4961_v16, %v1819_v27  ;;  %v1849_v41 = vsel %vm13_vm2, %v4967_v30, %v1845_v34  ;;  %v7567_v45 = vpop.permute.xlu0 %410   ;;  %v4977_v50 = vld [vmem:[%s10586_s0 + $0x240] sm:$0x10]   ;;  %v1884_v59 = vsel %vm13_vm2, %v4976_v49, %v1880_v53 }
  0x97   :  { %v4963_v18 = vld [vmem:[%s10586_s0 + $0x393] sm:$0x80]   ;;  %v4969_v35 = vld [vmem:[%s10586_s0 + $0x2ea] sm:$0x20]   ;;  %v1827_v40 = vsel %vm25_vm5, %v4962_v17, %v1823_v33  ;;  %v1853_v47 = vsel %vm17_vm3, %v4968_v31, %v1849_v41  ;;  %v4978_v51 = vld [vmem:[%s10586_s0 + $0x2bf] sm:$0x20]   ;;  %v1888_v1 = vsel %vm17_vm3, %v4977_v50, %v1884_v59 }
  0x98   :  { %v4970_v36 = vld [vmem:[%s10586_s0 + $0x369] sm:$0x40]   ;;  %v1831_v46 = vsel %vm29_vm6, %v4963_v18, %v1827_v40  ;;  %s5808_s17 = smov 78   ;;  %v1857_v52 = vsel %vm21_vm4, %v4969_v35, %v1853_v47  ;;  %v4979_v54 = vld [vmem:[%s10586_s0 + $0x33e] sm:$0x40]   ;;  %v7600_v63 = vpop.permute.xlu1 %445   ;;  %s5809_s4 = smov 77   ;;  %v1892_v7 = vsel %vm21_vm4, %v4978_v51, %v1888_v1 }
  0x99   :  { %v4971_v37 = vld [vmem:[%s10586_s0 + $0x3e8] sm:$0x80]   ;;  %1832 = vrot.lane.b32.xlu1 %v1831_v46, %s5808_s17  ;;  %v4980_v57 = vld [vmem:[%s10586_s0 + $0x3bd] sm:$0x80]   ;;  %v1861_v58 = vsel %vm25_vm5, %v4970_v36, %v1857_v52  ;;  %v4982_v60 = vld [vmem:[%s10586_s0 + $0x19] sm:$0x1]   ;;  %v1896_v14 = vsel %vm25_vm5, %v4979_v54, %v1892_v7 }
  0x9a   :  { %v4983_v61 = vld [vmem:[%s10586_s0 + $0x98] sm:$0x2]   ;;  %v1865_v0 = vsel %vm29_vm6, %v4971_v37, %v1861_v58  ;;  %v4990_v13 = vld [vmem:[%s10586_s0 + $0x6e] sm:$0x1]   ;;  %v1900_v22 = vsel %vm29_vm6, %v4980_v57, %v1896_v14  ;;  %s5810_s23 = smov 76   ;;  %s5811_s12 = smov 75  }
  0x9b   :  { %v4984_v62 = vld [vmem:[%s10586_s0 + $0x117] sm:$0x4]   ;;  %v1911_v2 = vsel %vm5_vm0, %v4983_v61, %v4982_v60  ;;  %1866 = vrot.lane.b32.xlu0 %v1865_v0, %s5809_s4  ;;  %v4991_v16 = vld [vmem:[%s10586_s0 + $0xed] sm:$0x2]   ;;  %v4999_v32 = vld [vmem:[%s10586_s0 + $0x43] sm:$0x1]  }
  0x9c   :  { %v4985_v4 = vld [vmem:[%s10586_s0 + $0x196] sm:$0x8]   ;;  %v1915_v8 = vsel %vm9_vm1, %v4984_v62, %v1911_v2  ;;  %v4992_v17 = vld [vmem:[%s10586_s0 + $0x16c] sm:$0x4]   ;;  %v1945_v24 = vsel %vm5_vm0, %v4991_v16, %v4990_v13  ;;  %v5000_v35 = vld [vmem:[%s10586_s0 + $0xc2] sm:$0x2]  }
  0x9d   :  { %v4986_v5 = vld [vmem:[%s10586_s0 + $0x215] sm:$0x10]   ;;  %v1919_v15 = vsel %vm13_vm2, %v4985_v4, %v1915_v8  ;;  %v4993_v18 = vld [vmem:[%s10586_s0 + $0x1eb] sm:$0x8]   ;;  %v7636_v19 = vpop.permute.xlu0 %480   ;;  %1901 = vrot.lane.b32.xlu1 %v1900_v22, %s5810_s23  ;;  %v1949_v30 = vsel %vm9_vm1, %v4992_v17, %v1945_v24  ;;  %v5001_v36 = vld [vmem:[%s10586_s0 + $0x141] sm:$0x4]   ;;  %v1980_v43 = vsel %vm5_vm0, %v5000_v35, %v4999_v32 }
  0x9e   :  { %v4987_v6 = vld [vmem:[%s10586_s0 + $0x294] sm:$0x20]   ;;  %v1923_v23 = vsel %vm17_vm3, %v4986_v5, %v1919_v15  ;;  %v4994_v26 = vld [vmem:[%s10586_s0 + $0x26a] sm:$0x10]   ;;  %v1953_v34 = vsel %vm13_vm2, %v4993_v18, %v1949_v30  ;;  %v5002_v37 = vld [vmem:[%s10586_s0 + $0x1c0] sm:$0x8]   ;;  %v7669_v40 = vpop.permute.xlu1 %514   ;;  %v1984_v49 = vsel %vm9_vm1, %v5001_v36, %v1980_v43 }
  0x9f   :  { %v4988_v9 = vld [vmem:[%s10586_s0 + $0x313] sm:$0x40]   ;;  %v4995_v27 = vld [vmem:[%s10586_s0 + $0x2e9] sm:$0x20]   ;;  %v1927_v29 = vsel %vm21_vm4, %v4987_v6, %v1923_v23  ;;  %v1957_v42 = vsel %vm17_vm3, %v4994_v26, %v1953_v34  ;;  %v5003_v44 = vld [vmem:[%s10586_s0 + $0x23f] sm:$0x10]   ;;  %v1988_v53 = vsel %vm13_vm2, %v5002_v37, %v1984_v49 }
  0xa0   :  { %v4989_v11 = vld [vmem:[%s10586_s0 + $0x392] sm:$0x80]   ;;  %v4996_v28 = vld [vmem:[%s10586_s0 + $0x368] sm:$0x40]   ;;  %v1931_v33 = vsel %vm25_vm5, %v4988_v9, %v1927_v29  ;;  %v5004_v46 = vld [vmem:[%s10586_s0 + $0x2be] sm:$0x20]   ;;  %v1961_v48 = vsel %vm21_vm4, %v4995_v27, %v1957_v42  ;;  %v1992_v60 = vsel %vm17_vm3, %v5003_v44, %v1988_v53 }
  0xa1   :  { %v4997_v31 = vld [vmem:[%s10586_s0 + $0x3e7] sm:$0x80]   ;;  %v1935_v41 = vsel %vm29_vm6, %v4989_v11, %v1931_v33  ;;  %v5005_v47 = vld [vmem:[%s10586_s0 + $0x33d] sm:$0x40]   ;;  %vm65_vm7 = vcmask 15360   ;;  %v1965_v52 = vsel %vm25_vm5, %v4996_v28, %v1961_v48  ;;  %v7706_v58 = vpop.permute.xlu0 %549   ;;  %s5812_s27 = smov 74   ;;  %v1996_v2 = vsel %vm21_vm4, %v5004_v46, %v1992_v60 }
  0xa2   :  { %1936 = vrot.lane.b32.xlu0 %v1935_v41, %s5811_s12  ;;  %v5006_v50 = vld [vmem:[%s10586_s0 + $0x3bc] sm:$0x80]   ;;  %v5008_v51 = vld [vmem:[%s10586_s0 + $0x18] sm:$0x1]   ;;  %4521 = vst.msk [vmem:[%s10587_s1 + $0x2] ss:$3 sm:$0xff] %vm65_vm7, %v7252_v10   ;;  %v1969_v59 = vsel %vm29_vm6, %v4997_v31, %v1965_v52  ;;  %v2000_v9 = vsel %vm25_vm5, %v5005_v47, %v1996_v2 }
  0xa3   :  { %v5009_v10 = vld [vmem:[%s10586_s0 + $0x97] sm:$0x2]   ;;  %1970 = vrot.lane.b32.xlu1 %v1969_v59, %s5812_s27  ;;  %v5016_v6 = vld [vmem:[%s10586_s0 + $0x6d] sm:$0x1]   ;;  %v2004_v17 = vsel %vm29_vm6, %v5006_v50, %v2000_v9  ;;  %s5813_s20 = smov 73   ;;  %vm135_vm8 = vcmask 7168  }
  0xa4   :  { %v5010_v54 = vld [vmem:[%s10586_s0 + $0x116] sm:$0x4]   ;;  %v2015_v61 = vsel %vm5_vm0, %v5009_v10, %v5008_v51  ;;  %v5017_v7 = vld [vmem:[%s10586_s0 + $0xec] sm:$0x2]   ;;  %vm100_vm9 = vcmask 1048568   ;;  %s5814_s10 = smov 72  }
  0xa5   :  { %v5011_v57 = vld [vmem:[%s10586_s0 + $0x195] sm:$0x8]   ;;  %v2019_v4 = vsel %vm9_vm1, %v5010_v54, %v2015_v61  ;;  %v7731_v8 = vpop.permute.xlu1 %584   ;;  %v2049_v13 = vsel %vm5_vm0, %v5017_v7, %v5016_v6  ;;  %v5018_v14 = vld [vmem:[%s10586_s0 + $0x16b] sm:$0x4]   ;;  %v5025_v29 = vld [vmem:[%s10586_s0 + $0x42] sm:$0x1]  }
  0xa6   :  { %v5012_v62 = vld [vmem:[%s10586_s0 + $0x214] sm:$0x10]   ;;  %v2023_v11 = vsel %vm13_vm2, %v5011_v57, %v2019_v4  ;;  %v5019_v15 = vld [vmem:[%s10586_s0 + $0x1ea] sm:$0x8]   ;;  %v2053_v22 = vsel %vm9_vm1, %v5018_v14, %v2049_v13  ;;  %2005 = vrot.lane.b32.xlu0 %v2004_v17, %s5813_s20  ;;  %4530 = vst.msk [vmem:[%s10587_s1 + $0x1] ss:$3 sm:$0xff] %vm100_vm9, %v7310_v38  }
  0xa7   :  { %v5013_v0 = vld [vmem:[%s10586_s0 + $0x293] sm:$0x20]   ;;  %v5020_v16 = vld [vmem:[%s10586_s0 + $0x269] sm:$0x10]   ;;  %v2027_v18 = vsel %vm17_vm3, %v5012_v62, %v2023_v11  ;;  %v2057_v28 = vsel %vm13_vm2, %v5019_v15, %v2053_v22  ;;  %v7762_v30 = vpop.permute.xlu0 %618   ;;  %v5026_v38 = vld [vmem:[%s10586_s0 + $0xc1] sm:$0x2]  }
  0xa8   :  { %v5014_v1 = vld [vmem:[%s10586_s0 + $0x312] sm:$0x40]   ;;  %v5021_v23 = vld [vmem:[%s10586_s0 + $0x2e8] sm:$0x20]   ;;  %v2031_v27 = vsel %vm21_vm4, %v5013_v0, %v2027_v18  ;;  %v2061_v32 = vsel %vm17_vm3, %v5020_v16, %v2057_v28  ;;  %v5027_v33 = vld [vmem:[%s10586_s0 + $0x140] sm:$0x4]  }
  0xa9   :  { %v5015_v5 = vld [vmem:[%s10586_s0 + $0x391] sm:$0x80]   ;;  %v5022_v24 = vld [vmem:[%s10586_s0 + $0x367] sm:$0x40]   ;;  %v2035_v31 = vsel %vm25_vm5, %v5014_v1, %v2031_v27  ;;  %v5028_v34 = vld [vmem:[%s10586_s0 + $0x1bf] sm:$0x8]   ;;  %v2065_v36 = vsel %vm21_vm4, %v5021_v23, %v2061_v32  ;;  %v7806_v49 = vpop.permute.xlu1 %653  }
  0xaa   :  { %v5023_v26 = vld [vmem:[%s10586_s0 + $0x3e6] sm:$0x80]   ;;  %v2039_v35 = vsel %vm29_vm6, %v5015_v5, %v2035_v31  ;;  %4539 = vst.msk [vmem:[%s10587_s1 + $0x1] ss:$3 sm:$0xff] %vm135_vm8, %v7273_v20   ;;  %v2084_v20 = vsel %vm5_vm0, %v5026_v38, %v5025_v29  ;;  %v5029_v37 = vld [vmem:[%s10586_s0 + $0x23e] sm:$0x10]   ;;  %v2069_v43 = vsel %vm25_vm5, %v5022_v24, %v2065_v36 }
  0xab   :  { %v5030_v41 = vld [vmem:[%s10586_s0 + $0x2bd] sm:$0x20]   ;;  %2040 = vrot.lane.b32.xlu1 %v2039_v35, %s5814_s10  ;;  %v2088_v44 = vsel %vm9_vm1, %v5027_v33, %v2084_v20  ;;  %v5034_v47 = vld [vmem:[%s10586_s0 + $0x17] sm:$0x1]   ;;  %v2073_v50 = vsel %vm29_vm6, %v5023_v26, %v2069_v43  ;;  %s5815_s23 = smov 71   ;;  %vm31_vm10 = vcmask 23552  }
  0xac   :  { %v5031_v42 = vld [vmem:[%s10586_s0 + $0x33c] sm:$0x40]   ;;  %v5035_v48 = vld [vmem:[%s10586_s0 + $0x96] sm:$0x2]   ;;  %v2092_v51 = vsel %vm13_vm2, %v5028_v34, %v2088_v44  ;;  %2074 = vrot.lane.b32.xlu0 %v2073_v50, %s5815_s23  ;;  %vm170_vm11 = vcmask 1048560   ;;  %s5816_s16 = smov 70  }
  0xad   :  { %v5032_v46 = vld [vmem:[%s10586_s0 + $0x3bb] sm:$0x80]   ;;  %v2119_v52 = vsel %vm5_vm0, %v5035_v48, %v5034_v47  ;;  %v5036_v53 = vld [vmem:[%s10586_s0 + $0x115] sm:$0x4]   ;;  %v2096_v57 = vsel %vm17_vm3, %v5029_v37, %v2092_v51  ;;  %v2_v2 = vld [vmem:[%s10586_s0] sm:$0x1]  }
  0xae   :  { %v5037_v10 = vld [vmem:[%s10586_s0 + $0x194] sm:$0x8]   ;;  %v2123_v59 = vsel %vm9_vm1, %v5036_v53, %v2119_v52  ;;  %v2100_v0 = vsel %vm21_vm4, %v5030_v41, %v2096_v57  ;;  %v7836_v4 = vpop.permute.xlu0 %688   ;;  %v4506_v7 = vld [vmem:[%s10586_s0 + $0x7f] sm:$0x2]   ;;  %vm204_vm12 = vcmask 1048552   ;;  %s5817_s29 = smov 69  }
  0xaf   :  { %v5038_v54 = vld [vmem:[%s10586_s0 + $0x213] sm:$0x10]   ;;  %v2127_v1 = vsel %vm13_vm2, %v5037_v10, %v2123_v59  ;;  %v2104_v5 = vsel %vm25_vm5, %v5031_v42, %v2100_v0  ;;  %v4507_v9 = vld [vmem:[%s10586_s0 + $0xfe] sm:$0x4]   ;;  %v6_v15 = vsel %vm5_vm0, %v4506_v7, %v2_v2  ;;  %v5042_v26 = vld [vmem:[%s10586_s0 + $0x6c] sm:$0x1]   ;;  %v7869_v27 = vpop.permute.xlu1 %722  }
  0xb0   :  { %v5039_v60 = vld [vmem:[%s10586_s0 + $0x292] sm:$0x20]   ;;  %v2131_v6 = vsel %vm17_vm3, %v5038_v54, %v2127_v1  ;;  %v4508_v11 = vld [vmem:[%s10586_s0 + $0x17d] sm:$0x8]   ;;  %v2108_v13 = vsel %vm29_vm6, %v5032_v46, %v2104_v5  ;;  %v10_v23 = vsel %vm9_vm1, %v4507_v9, %v6_v15  ;;  %4556 = vst.msk [vmem:[%s10587_s1 + $0x2] ss:$3 sm:$0xff] %vm204_vm12, %v7369_v3  }
  0xb1   :  { %v5040_v61 = vld [vmem:[%s10586_s0 + $0x311] sm:$0x40]   ;;  %v2135_v14 = vsel %vm21_vm4, %v5039_v60, %v2131_v6  ;;  %v4509_v16 = vld [vmem:[%s10586_s0 + $0x1fc] sm:$0x10]   ;;  %2109 = vrot.lane.b32.xlu1 %v2108_v13, %s5816_s16  ;;  %v14_v29 = vsel %vm13_vm2, %v4508_v11, %v10_v23  ;;  %v5043_v3 = vld [vmem:[%s10586_s0 + $0xeb] sm:$0x2]  }
  0xb2   :  { %v5041_v62 = vld [vmem:[%s10586_s0 + $0x390] sm:$0x80]   ;;  %v4510_v17 = vld [vmem:[%s10586_s0 + $0x27b] sm:$0x20]   ;;  %v2139_v22 = vsel %vm25_vm5, %v5040_v61, %v2135_v14  ;;  %v5044_v31 = vld [vmem:[%s10586_s0 + $0x16a] sm:$0x4]   ;;  %v18_v38 = vsel %vm17_vm3, %v4509_v16, %v14_v29  ;;  %v2153_v33 = vsel %vm5_vm0, %v5043_v3, %v5042_v26  ;;  %v7908_v44 = vpop.permute.xlu0 %757  }
  0xb3   :  { %v4511_v18 = vld [vmem:[%s10586_s0 + $0x2fa] sm:$0x40]   ;;  %v2143_v28 = vsel %vm29_vm6, %v5041_v62, %v2139_v22  ;;  %v5045_v32 = vld [vmem:[%s10586_s0 + $0x1e9] sm:$0x8]   ;;  %v22_v20 = vsel %vm21_vm4, %v4510_v17, %v18_v38  ;;  %v2157_v37 = vsel %vm9_vm1, %v5044_v31, %v2153_v33  ;;  %v5051_v42 = vld [vmem:[%s10586_s0 + $0x41] sm:$0x1]  }
  0xb4   :  { %v4512_v24 = vld [vmem:[%s10586_s0 + $0x379] sm:$0x80]   ;;  %2144 = vrot.lane.b32.xlu0 %v2143_v28, %s5817_s29  ;;  %v5046_v34 = vld [vmem:[%s10586_s0 + $0x268] sm:$0x10]   ;;  %v5052_v43 = vld [vmem:[%s10586_s0 + $0xc0] sm:$0x2]   ;;  %v26_v46 = vsel %vm25_vm5, %v4511_v18, %v22_v20  ;;  %v2161_v47 = vsel %vm13_vm2, %v5045_v32, %v2157_v37 }
  0xb5   :  { %v5047_v35 = vld [vmem:[%s10586_s0 + $0x2e7] sm:$0x20]   ;;  %v2188_v48 = vsel %vm5_vm0, %v5052_v43, %v5051_v42  ;;  %v5053_v50 = vld [vmem:[%s10586_s0 + $0x13f] sm:$0x4]   ;;  %v30_v53 = vsel %vm29_vm6, %v4512_v24, %v26_v46  ;;  %v2165_v10 = vsel %vm17_vm3, %v5046_v34, %v2161_v47  ;;  %vm239_vm13 = vcmask 1040352   ;;  %s5818_s19 = smov 68  }
  0xb6   :  { %v5048_v36 = vld [vmem:[%s10586_s0 + $0x366] sm:$0x40]   ;;  %v5054_v51 = vld [vmem:[%s10586_s0 + $0x1be] sm:$0x8]   ;;  %v2192_v54 = vsel %vm9_vm1, %v5053_v50, %v2188_v48  ;;  %v7934_v61 = vpop.permute.xlu1 %792   ;;  %32 = vst.msk [vmem:[%s10587_s1] ss:$3 sm:$0xff] %vm31_vm10, %v30_v53   ;;  %v2169_v62 = vsel %vm21_vm4, %v5047_v35, %v2165_v10 }
  0xb7   :  { %v5049_v41 = vld [vmem:[%s10586_s0 + $0x3e5] sm:$0x80]   ;;  %v5055_v52 = vld [vmem:[%s10586_s0 + $0x23d] sm:$0x10]   ;;  %v2196_v0 = vsel %vm13_vm2, %v5054_v51, %v2192_v54  ;;  %vm274_vm14 = vcmask 1032152   ;;  %s5819_s27 = smov 67  }
  0xb8   :  { %v5056_v57 = vld [vmem:[%s10586_s0 + $0x2bc] sm:$0x20]   ;;  %v5060_v1 = vld [vmem:[%s10586_s0 + $0x16] sm:$0x1]   ;;  %171 = vst.msk [vmem:[%s10587_s1] ss:$3 sm:$0xff] %vm170_vm11, %v7344_v55   ;;  %v2173_v55 = vsel %vm25_vm5, %v5048_v36, %v2169_v62  ;;  %v2200_v5 = vsel %vm17_vm3, %v5055_v52, %v2196_v0  ;;  %v7985_v17 = vpop.permute.xlu0 %826  }
  0xb9   :  { %v5057_v59 = vld [vmem:[%s10586_s0 + $0x33b] sm:$0x40]   ;;  %v5061_v2 = vld [vmem:[%s10586_s0 + $0x95] sm:$0x2]   ;;  %4565 = vst.msk [vmem:[%s10587_s1 + $0x1] ss:$3 sm:$0xff] %vm239_vm13, %v7402_v21   ;;  %v2177_v11 = vsel %vm29_vm6, %v5049_v41, %v2173_v55  ;;  %v2204_v13 = vsel %vm21_vm4, %v5056_v57, %v2200_v5 }
  0xba   :  { %v5058_v60 = vld [vmem:[%s10586_s0 + $0x3ba] sm:$0x80]   ;;  %v2223_v21 = vsel %vm5_vm0, %v5061_v2, %v5060_v1  ;;  %v5062_v6 = vld [vmem:[%s10586_s0 + $0x114] sm:$0x4]   ;;  %275 = vst.msk [vmem:[%s10587_s1] ss:$3 sm:$0xff] %vm274_vm14, %v7438_v39   ;;  %2178 = vrot.lane.b32.xlu1 %v2177_v11, %s5818_s19  ;;  %v2208_v18 = vsel %vm25_vm5, %v5057_v59, %v2204_v13  ;;  %v8018_v20 = vpop.permute.xlu1 %861  }
  0xbb   :  { %v5063_v7 = vld [vmem:[%s10586_s0 + $0x193] sm:$0x8]   ;;  %v2227_v39 = vsel %vm9_vm1, %v5062_v6, %v2223_v21  ;;  %v5068_v23 = vld [vmem:[%s10586_s0 + $0x6b] sm:$0x1]   ;;  %v2212_v26 = vsel %vm29_vm6, %v5058_v60, %v2208_v18  ;;  %vm308_vm15 = vcmask 1023952   ;;  %vm343_vm7 = vcmask 1015752  }
  0xbc   :  { %v5064_v9 = vld [vmem:[%s10586_s0 + $0x212] sm:$0x10]   ;;  %v2231_v22 = vsel %vm13_vm2, %v5063_v7, %v2227_v39  ;;  %v5069_v24 = vld [vmem:[%s10586_s0 + $0xea] sm:$0x2]   ;;  %2213 = vrot.lane.b32.xlu0 %v2212_v26, %s5819_s27  ;;  %v5077_v42 = vld [vmem:[%s10586_s0 + $0x40] sm:$0x1]  }
  0xbd   :  { %v5065_v14 = vld [vmem:[%s10586_s0 + $0x291] sm:$0x20]   ;;  %v2235_v28 = vsel %vm17_vm3, %v5064_v9, %v2231_v22  ;;  %v2257_v29 = vsel %vm5_vm0, %v5069_v24, %v5068_v23  ;;  %v5070_v3 = vld [vmem:[%s10586_s0 + $0x169] sm:$0x4]   ;;  %v5078_v43 = vld [vmem:[%s10586_s0 + $0xbf] sm:$0x2]  }
  0xbe   :  { %v5066_v15 = vld [vmem:[%s10586_s0 + $0x310] sm:$0x40]   ;;  %v5071_v31 = vld [vmem:[%s10586_s0 + $0x1e8] sm:$0x8]   ;;  %v2239_v38 = vsel %vm21_vm4, %v5065_v14, %v2235_v28  ;;  %v2261_v33 = vsel %vm9_vm1, %v5070_v3, %v2257_v29  ;;  %4582 = vst.msk [vmem:[%s10587_s1 + $0x2] ss:$3 sm:$0xff] %vm308_vm15, %v7471_v56   ;;  %v2292_v56 = vsel %vm5_vm0, %v5078_v43, %v5077_v42 }
  0xbf   :  { %v5067_v16 = vld [vmem:[%s10586_s0 + $0x38f] sm:$0x80]   ;;  %v5072_v32 = vld [vmem:[%s10586_s0 + $0x267] sm:$0x10]   ;;  %v2243_v37 = vsel %vm25_vm5, %v5066_v15, %v2239_v38  ;;  %v2265_v41 = vsel %vm13_vm2, %v5071_v31, %v2261_v33  ;;  %4591 = vst.msk [vmem:[%s10587_s1 + $0x1] ss:$3 sm:$0xff] %vm343_vm7, %v7508_v12   ;;  %v8059_v57 = vpop.permute.xlu0 %896  }
  0xc0   :  { %v5073_v34 = vld [vmem:[%s10586_s0 + $0x2e6] sm:$0x20]   ;;  %v2247_v46 = vsel %vm29_vm6, %v5067_v16, %v2243_v37  ;;  %v2269_v47 = vsel %vm17_vm3, %v5072_v32, %v2265_v41  ;;  %v5079_v12 = vld [vmem:[%s10586_s0 + $0x13e] sm:$0x4]   ;;  %s5820_s22 = smov 66   ;;  %s5821_s10 = smov 65   ;;  %v8092_v14 = vpop.permute.xlu1 %930  }
  0xc1   :  { %v5074_v35 = vld [vmem:[%s10586_s0 + $0x365] sm:$0x40]   ;;  %v5080_v48 = vld [vmem:[%s10586_s0 + $0x1bd] sm:$0x8]   ;;  %2248 = vrot.lane.b32.xlu1 %v2247_v46, %s5820_s22  ;;  %v2273_v51 = vsel %vm21_vm4, %v5073_v34, %v2269_v47  ;;  %v2296_v52 = vsel %vm9_vm1, %v5079_v12, %v2292_v56  ;;  %v5086_v62 = vld [vmem:[%s10586_s0 + $0x15] sm:$0x1]  }
  0xc2   :  { %v5075_v36 = vld [vmem:[%s10586_s0 + $0x3e4] sm:$0x80]   ;;  %v5081_v50 = vld [vmem:[%s10586_s0 + $0x23c] sm:$0x10]   ;;  %v2277_v59 = vsel %vm25_vm5, %v5074_v35, %v2273_v51  ;;  %v2300_v60 = vsel %vm13_vm2, %v5080_v48, %v2296_v52  ;;  %v5087_v0 = vld [vmem:[%s10586_s0 + $0x94] sm:$0x2]  }
  0xc3   :  { %v5082_v53 = vld [vmem:[%s10586_s0 + $0x2bb] sm:$0x20]   ;;  %v2281_v1 = vsel %vm29_vm6, %v5075_v36, %v2277_v59  ;;  %v2304_v2 = vsel %vm17_vm3, %v5081_v50, %v2300_v60  ;;  %v2327_v55 = vsel %vm5_vm0, %v5087_v0, %v5086_v62  ;;  %v5088_v5 = vld [vmem:[%s10586_s0 + $0x113] sm:$0x4]   ;;  %vm378_vm8 = vcmask 1007552   ;;  %s5822_s2 = smov 64   ;;  %v8133_v33 = vpop.permute.xlu0 %965  }
  0xc4   :  { %v5083_v10 = vld [vmem:[%s10586_s0 + $0x33a] sm:$0x40]   ;;  %v5089_v21 = vld [vmem:[%s10586_s0 + $0x192] sm:$0x8]   ;;  %2282 = vrot.lane.b32.xlu0 %v2281_v1, %s5821_s10  ;;  %v2308_v7 = vsel %vm21_vm4, %v5082_v53, %v2304_v2  ;;  %v2331_v9 = vsel %vm9_vm1, %v5088_v5, %v2327_v55  ;;  %vm412_vm9 = vcmask 999352   ;;  %s5823_s19 = smov 63  }
  0xc5   :  { %v5084_v54 = vld [vmem:[%s10586_s0 + $0x3b9] sm:$0x80]   ;;  %v5090_v6 = vld [vmem:[%s10586_s0 + $0x211] sm:$0x10]   ;;  %v2312_v15 = vsel %vm25_vm5, %v5083_v10, %v2308_v7  ;;  %v2335_v16 = vsel %vm13_vm2, %v5089_v21, %v2331_v9  ;;  %v5094_v18 = vld [vmem:[%s10586_s0 + $0x6a] sm:$0x1]  }
  0xc6   :  { %v5091_v11 = vld [vmem:[%s10586_s0 + $0x290] sm:$0x20]   ;;  %v5095_v22 = vld [vmem:[%s10586_s0 + $0xe9] sm:$0x2]   ;;  %v2316_v23 = vsel %vm29_vm6, %v5084_v54, %v2312_v15  ;;  %v2339_v24 = vsel %vm17_vm3, %v5090_v6, %v2335_v16  ;;  %379 = vst.msk [vmem:[%s10587_s1] ss:$3 sm:$0xff] %vm378_vm8, %v7530_v25  }
  0xc7   :  { %v5092_v13 = vld [vmem:[%s10586_s0 + $0x30f] sm:$0x40]   ;;  %4608 = vst.msk [vmem:[%s10587_s1 + $0x2] ss:$3 sm:$0xff] %vm412_vm9, %v7567_v45   ;;  %v2361_v25 = vsel %vm5_vm0, %v5095_v22, %v5094_v18  ;;  %v5096_v45 = vld [vmem:[%s10586_s0 + $0x168] sm:$0x4]   ;;  %2317 = vrot.lane.b32.xlu1 %v2316_v23, %s5822_s2  ;;  %v2343_v29 = vsel %vm21_vm4, %v5091_v11, %v2339_v24  ;;  %v8155_v12 = vpop.permute.xlu1 %1000  }
  0xc8   :  { %v5093_v39 = vld [vmem:[%s10586_s0 + $0x38e] sm:$0x80]   ;;  %v5097_v26 = vld [vmem:[%s10586_s0 + $0x1e7] sm:$0x8]   ;;  %v2365_v3 = vsel %vm9_vm1, %v5096_v45, %v2361_v25  ;;  %v2347_v34 = vsel %vm25_vm5, %v5092_v13, %v2343_v29  ;;  %v5103_v36 = vld [vmem:[%s10586_s0 + $0x3f] sm:$0x1]  }
  0xc9   :  { %v5098_v28 = vld [vmem:[%s10586_s0 + $0x266] sm:$0x10]   ;;  %v2369_v35 = vsel %vm13_vm2, %v5097_v26, %v2365_v3  ;;  %v5104_v37 = vld [vmem:[%s10586_s0 + $0xbe] sm:$0x2]   ;;  %v2351_v41 = vsel %vm29_vm6, %v5093_v39, %v2347_v34  ;;  %vm447_vm10 = vcmask 991152   ;;  %vm482_vm11 = vcmask 982952   ;;  %v8196_v55 = vpop.permute.xlu0 %1034  }
  0xca   :  { %v5099_v31 = vld [vmem:[%s10586_s0 + $0x2e5] sm:$0x20]   ;;  %v2373_v42 = vsel %vm17_vm3, %v5098_v28, %v2369_v35  ;;  %v2396_v43 = vsel %vm5_vm0, %v5104_v37, %v5103_v36  ;;  %v5105_v46 = vld [vmem:[%s10586_s0 + $0x13d] sm:$0x4]   ;;  %2352 = vrot.lane.b32.xlu0 %v2351_v41, %s5823_s19  ;;  %v5112_v59 = vld [vmem:[%s10586_s0 + $0x14] sm:$0x1]  }
  0xcb   :  { %v5100_v32 = vld [vmem:[%s10586_s0 + $0x364] sm:$0x40]   ;;  %v5106_v47 = vld [vmem:[%s10586_s0 + $0x1bc] sm:$0x8]   ;;  %v2377_v48 = vsel %vm21_vm4, %v5099_v31, %v2373_v42  ;;  %v2400_v50 = vsel %vm9_vm1, %v5105_v46, %v2396_v43  ;;  %v5113_v60 = vld [vmem:[%s10586_s0 + $0x93] sm:$0x2]   ;;  %v8229_v45 = vpop.permute.xlu1 %1069  }
  0xcc   :  { %v5101_v38 = vld [vmem:[%s10586_s0 + $0x3e3] sm:$0x80]   ;;  %v5107_v56 = vld [vmem:[%s10586_s0 + $0x23b] sm:$0x10]   ;;  %v2381_v10 = vsel %vm25_vm5, %v5100_v32, %v2377_v48  ;;  %v2404_v54 = vsel %vm13_vm2, %v5106_v47, %v2400_v50  ;;  %4617 = vst.msk [vmem:[%s10587_s1 + $0x1] ss:$3 sm:$0xff] %vm447_vm10, %v7600_v63   ;;  %v2431_v63 = vsel %vm5_vm0, %v5113_v60, %v5112_v59 }
  0xcd   :  { %v5108_v51 = vld [vmem:[%s10586_s0 + $0x2ba] sm:$0x20]   ;;  %v2385_v62 = vsel %vm29_vm6, %v5101_v38, %v2381_v10  ;;  %v2408_v0 = vsel %vm17_vm3, %v5107_v56, %v2404_v54  ;;  %483 = vst.msk [vmem:[%s10587_s1] ss:$3 sm:$0xff] %vm482_vm11, %v7636_v19   ;;  %v5114_v19 = vld [vmem:[%s10586_s0 + $0x112] sm:$0x4]  }
  0xce   :  { %v5109_v52 = vld [vmem:[%s10586_s0 + $0x339] sm:$0x40]   ;;  %v5115_v1 = vld [vmem:[%s10586_s0 + $0x191] sm:$0x8]   ;;  %s5824_s12 = smov 62   ;;  %v2412_v5 = vsel %vm21_vm4, %v5108_v51, %v2408_v0  ;;  %v2435_v21 = vsel %vm9_vm1, %v5114_v19, %v2431_v63  ;;  %s5825_s29 = smov 61  }
  0xcf   :  { %v5110_v53 = vld [vmem:[%s10586_s0 + $0x3b8] sm:$0x80]   ;;  %v5116_v2 = vld [vmem:[%s10586_s0 + $0x210] sm:$0x10]   ;;  %2386 = vrot.lane.b32.xlu1 %v2385_v62, %s5824_s12  ;;  %v2416_v11 = vsel %vm25_vm5, %v5109_v52, %v2412_v5  ;;  %v2439_v13 = vsel %vm13_vm2, %v5115_v1, %v2435_v21  ;;  %v5120_v39 = vld [vmem:[%s10586_s0 + $0x69] sm:$0x1]  }
  0xd0   :  { %v5117_v6 = vld [vmem:[%s10586_s0 + $0x28f] sm:$0x20]   ;;  %v5121_v15 = vld [vmem:[%s10586_s0 + $0xe8] sm:$0x2]   ;;  %v2420_v16 = vsel %vm29_vm6, %v5110_v53, %v2416_v11  ;;  %v2443_v18 = vsel %vm17_vm3, %v5116_v2, %v2439_v13  ;;  %vm516_vm12 = vcmask 974752   ;;  %vm551_vm13 = vcmask 966552   ;;  %v8270_v43 = vpop.permute.xlu0 %1104  }
  0xd1   :  { %v5118_v7 = vld [vmem:[%s10586_s0 + $0x30e] sm:$0x40]   ;;  %v2465_v22 = vsel %vm5_vm0, %v5121_v15, %v5120_v39  ;;  %v5122_v23 = vld [vmem:[%s10586_s0 + $0x167] sm:$0x4]   ;;  %2421 = vrot.lane.b32.xlu0 %v2420_v16, %s5825_s29  ;;  %v2447_v26 = vsel %vm21_vm4, %v5117_v6, %v2443_v18  ;;  %v5129_v34 = vld [vmem:[%s10586_s0 + $0x3e] sm:$0x1]   ;;  %v8303_v19 = vpop.permute.xlu1 %1138  }
  0xd2   :  { %v5119_v9 = vld [vmem:[%s10586_s0 + $0x38d] sm:$0x80]   ;;  %v5123_v24 = vld [vmem:[%s10586_s0 + $0x1e6] sm:$0x8]   ;;  %v2469_v28 = vsel %vm9_vm1, %v5122_v23, %v2465_v22  ;;  %v2451_v32 = vsel %vm25_vm5, %v5118_v7, %v2447_v26  ;;  %v5130_v35 = vld [vmem:[%s10586_s0 + $0xbd] sm:$0x2]  }
  0xd3   :  { %v5124_v25 = vld [vmem:[%s10586_s0 + $0x265] sm:$0x10]   ;;  %v2473_v38 = vsel %vm13_vm2, %v5123_v24, %v2469_v28  ;;  %v2455_v36 = vsel %vm29_vm6, %v5119_v9, %v2451_v32  ;;  %4634 = vst.msk [vmem:[%s10587_s1 + $0x2] ss:$3 sm:$0xff] %vm516_vm12, %v7669_v40   ;;  %v2500_v40 = vsel %vm5_vm0, %v5130_v35, %v5129_v34  ;;  %v5132_v41 = vld [vmem:[%s10586_s0 + $0x1bb] sm:$0x8]  }
  0xd4   :  { %v5125_v29 = vld [vmem:[%s10586_s0 + $0x2e4] sm:$0x20]   ;;  %v2477_v37 = vsel %vm17_vm3, %v5124_v25, %v2473_v38  ;;  %4643 = vst.msk [vmem:[%s10587_s1 + $0x1] ss:$3 sm:$0xff] %vm551_vm13, %v7706_v58   ;;  %v5131_v58 = vld [vmem:[%s10586_s0 + $0x13c] sm:$0x4]   ;;  %v8344_v22 = vpop.permute.xlu0 %1173  }
  0xd5   :  { %v5126_v3 = vld [vmem:[%s10586_s0 + $0x363] sm:$0x40]   ;;  %v5133_v42 = vld [vmem:[%s10586_s0 + $0x23a] sm:$0x10]   ;;  %s5826_s20 = smov 60   ;;  %v2481_v46 = vsel %vm21_vm4, %v5125_v29, %v2477_v37  ;;  %v2504_v47 = vsel %vm9_vm1, %v5131_v58, %v2500_v40  ;;  %s5827_s8 = smov 59  }
  0xd6   :  { %v5127_v31 = vld [vmem:[%s10586_s0 + $0x3e2] sm:$0x80]   ;;  %2456 = vrot.lane.b32.xlu1 %v2455_v36, %s5826_s20  ;;  %v5134_v56 = vld [vmem:[%s10586_s0 + $0x2b9] sm:$0x20]   ;;  %v2485_v51 = vsel %vm25_vm5, %v5126_v3, %v2481_v46  ;;  %v2508_v52 = vsel %vm13_vm2, %v5132_v41, %v2504_v47  ;;  %v5138_v53 = vld [vmem:[%s10586_s0 + $0x13] sm:$0x1]  }
  0xd7   :  { %v5135_v48 = vld [vmem:[%s10586_s0 + $0x338] sm:$0x40]   ;;  %v5139_v10 = vld [vmem:[%s10586_s0 + $0x92] sm:$0x2]   ;;  %v2489_v54 = vsel %vm29_vm6, %v5127_v31, %v2485_v51  ;;  %v2512_v59 = vsel %vm17_vm3, %v5133_v42, %v2508_v52  ;;  %vm586_vm14 = vcmask 958352   ;;  %vm620_vm15 = vcmask 950152  }
  0xd8   :  { %v5136_v50 = vld [vmem:[%s10586_s0 + $0x3b7] sm:$0x80]   ;;  %v2535_v60 = vsel %vm5_vm0, %v5139_v10, %v5138_v53  ;;  %v5140_v62 = vld [vmem:[%s10586_s0 + $0x111] sm:$0x4]   ;;  %2490 = vrot.lane.b32.xlu0 %v2489_v54, %s5827_s8  ;;  %v2516_v1 = vsel %vm21_vm4, %v5134_v56, %v2512_v59  ;;  %v5146_v11 = vld [vmem:[%s10586_s0 + $0x68] sm:$0x1]   ;;  %v8365_v38 = vpop.permute.xlu1 %1208  }
  0xd9   :  { %v5141_v0 = vld [vmem:[%s10586_s0 + $0x190] sm:$0x8]   ;;  %v2539_v2 = vsel %vm9_vm1, %v5140_v62, %v2535_v60  ;;  %v2520_v7 = vsel %vm25_vm5, %v5135_v48, %v2516_v1  ;;  %v5147_v13 = vld [vmem:[%s10586_s0 + $0xe7] sm:$0x2]   ;;  %587 = vst.msk [vmem:[%s10587_s1] ss:$3 sm:$0xff] %vm586_vm14, %v7731_v8  }
  0xda   :  { %v5142_v63 = vld [vmem:[%s10586_s0 + $0x20f] sm:$0x10]   ;;  %v2543_v9 = vsel %vm13_vm2, %v5141_v0, %v2539_v2  ;;  %v2524_v39 = vsel %vm29_vm6, %v5136_v50, %v2520_v7  ;;  %4660 = vst.msk [vmem:[%s10587_s1 + $0x2] ss:$3 sm:$0xff] %vm620_vm15, %v7762_v30   ;;  %v2569_v8 = vsel %vm5_vm0, %v5147_v13, %v5146_v11  ;;  %v5148_v30 = vld [vmem:[%s10586_s0 + $0x166] sm:$0x4]   ;;  %v8398_v53 = vpop.permute.xlu0 %1242  }
  0xdb   :  { %v5143_v5 = vld [vmem:[%s10586_s0 + $0x28e] sm:$0x20]   ;;  %v2547_v15 = vsel %vm17_vm3, %v5142_v63, %v2543_v9  ;;  %v5149_v16 = vld [vmem:[%s10586_s0 + $0x1e5] sm:$0x8]   ;;  %s5828_s30 = smov 58   ;;  %v2573_v24 = vsel %vm9_vm1, %v5148_v30, %v2569_v8  ;;  %s5829_s11 = smov 57  }
  0xdc   :  { %v5144_v21 = vld [vmem:[%s10586_s0 + $0x30d] sm:$0x40]   ;;  %v5150_v18 = vld [vmem:[%s10586_s0 + $0x264] sm:$0x10]   ;;  %2525 = vrot.lane.b32.xlu1 %v2524_v39, %s5828_s30  ;;  %v2551_v23 = vsel %vm21_vm4, %v5143_v5, %v2547_v15  ;;  %v2577_v3 = vsel %vm13_vm2, %v5149_v16, %v2573_v24  ;;  %v5155_v31 = vld [vmem:[%s10586_s0 + $0x3d] sm:$0x1]   ;;  %v8439_v9 = vpop.permute.xlu1 %1277  }
  0xdd   :  { %v5145_v6 = vld [vmem:[%s10586_s0 + $0x38c] sm:$0x80]   ;;  %v5151_v25 = vld [vmem:[%s10586_s0 + $0x2e3] sm:$0x20]   ;;  %v2555_v29 = vsel %vm25_vm5, %v5144_v21, %v2551_v23  ;;  %v5156_v32 = vld [vmem:[%s10586_s0 + $0xbc] sm:$0x2]   ;;  %v2581_v35 = vsel %vm17_vm3, %v5150_v18, %v2577_v3 }
  0xde   :  { %v5152_v26 = vld [vmem:[%s10586_s0 + $0x362] sm:$0x40]   ;;  %v2559_v34 = vsel %vm29_vm6, %v5145_v6, %v2555_v29  ;;  %v2604_v36 = vsel %vm5_vm0, %v5156_v32, %v5155_v31  ;;  %v5157_v37 = vld [vmem:[%s10586_s0 + $0x13b] sm:$0x4]   ;;  %v2585_v41 = vsel %vm21_vm4, %v5151_v25, %v2581_v35  ;;  %vm655_vm7 = vcmask 941952   ;;  %s5830_s9 = smov 56  }
  0xdf   :  { %v5153_v28 = vld [vmem:[%s10586_s0 + $0x3e1] sm:$0x80]   ;;  %v5158_v40 = vld [vmem:[%s10586_s0 + $0x1ba] sm:$0x8]   ;;  %2560 = vrot.lane.b32.xlu0 %v2559_v34, %s5829_s11  ;;  %v2608_v42 = vsel %vm9_vm1, %v5157_v37, %v2604_v36  ;;  %v2589_v48 = vsel %vm25_vm5, %v5152_v26, %v2585_v41  ;;  %vm690_vm8 = vcmask 933752   ;;  %s5831_s26 = smov 55  }
  0xe0   :  { %v5159_v58 = vld [vmem:[%s10586_s0 + $0x239] sm:$0x10]   ;;  %v2612_v50 = vsel %vm13_vm2, %v5158_v40, %v2608_v42  ;;  %v5164_v51 = vld [vmem:[%s10586_s0 + $0x12] sm:$0x1]   ;;  %v2593_v10 = vsel %vm29_vm6, %v5153_v28, %v2589_v48  ;;  %4669 = vst.msk [vmem:[%s10587_s1 + $0x1] ss:$3 sm:$0xff] %vm655_vm7, %v7806_v49  }
  0xe1   :  { %v5160_v46 = vld [vmem:[%s10586_s0 + $0x2b8] sm:$0x20]   ;;  %v5165_v52 = vld [vmem:[%s10586_s0 + $0x91] sm:$0x2]   ;;  %v2616_v54 = vsel %vm17_vm3, %v5159_v58, %v2612_v50  ;;  %691 = vst.msk [vmem:[%s10587_s1] ss:$3 sm:$0xff] %vm690_vm8, %v7836_v4   ;;  %2594 = vrot.lane.b32.xlu1 %v2593_v10, %s5830_s9  ;;  %v8472_v31 = vpop.permute.xlu0 %1312  }
  0xe2   :  { %v5161_v47 = vld [vmem:[%s10586_s0 + $0x337] sm:$0x40]   ;;  %v2639_v49 = vsel %vm5_vm0, %v5165_v52, %v5164_v51  ;;  %v5166_v4 = vld [vmem:[%s10586_s0 + $0x110] sm:$0x4]   ;;  %v2620_v62 = vsel %vm21_vm4, %v5160_v46, %v2616_v54  ;;  %v5172_v6 = vld [vmem:[%s10586_s0 + $0x67] sm:$0x1]   ;;  %v8513_v50 = vpop.permute.xlu1 %1346  }
  0xe3   :  { %v5162_v56 = vld [vmem:[%s10586_s0 + $0x3b6] sm:$0x80]   ;;  %v5167_v59 = vld [vmem:[%s10586_s0 + $0x18f] sm:$0x8]   ;;  %v2643_v0 = vsel %vm9_vm1, %v5166_v4, %v2639_v49  ;;  %v2624_v5 = vsel %vm25_vm5, %v5161_v47, %v2620_v62  ;;  %v5173_v7 = vld [vmem:[%s10586_s0 + $0xe6] sm:$0x2]  }
  0xe4   :  { %v5168_v60 = vld [vmem:[%s10586_s0 + $0x20e] sm:$0x10]   ;;  %v2647_v21 = vsel %vm13_vm2, %v5167_v59, %v2643_v0  ;;  %v2628_v11 = vsel %vm29_vm6, %v5162_v56, %v2624_v5  ;;  %v2673_v39 = vsel %vm5_vm0, %v5173_v7, %v5172_v6  ;;  %v5174_v15 = vld [vmem:[%s10586_s0 + $0x165] sm:$0x4]   ;;  %vm724_vm9 = vcmask 925552   ;;  %s5832_s18 = smov 54  }
  0xe5   :  { %v5169_v63 = vld [vmem:[%s10586_s0 + $0x28d] sm:$0x20]   ;;  %v2651_v13 = vsel %vm17_vm3, %v5168_v60, %v2647_v21  ;;  %v5175_v8 = vld [vmem:[%s10586_s0 + $0x1e4] sm:$0x8]   ;;  %2629 = vrot.lane.b32.xlu0 %v2628_v11, %s5831_s26  ;;  %v2677_v18 = vsel %vm9_vm1, %v5174_v15, %v2673_v39  ;;  %vm759_vm10 = vcmask 917352   ;;  %s5833_s6 = smov 53   ;;  %v8546_v6 = vpop.permute.xlu0 %1381  }
  0xe6   :  { %v5170_v1 = vld [vmem:[%s10586_s0 + $0x30c] sm:$0x40]   ;;  %v5176_v30 = vld [vmem:[%s10586_s0 + $0x263] sm:$0x10]   ;;  %v2655_v16 = vsel %vm21_vm4, %v5169_v63, %v2651_v13  ;;  %v2681_v28 = vsel %vm13_vm2, %v5175_v8, %v2677_v18  ;;  %v5181_v29 = vld [vmem:[%s10586_s0 + $0x3c] sm:$0x1]  }
  0xe7   :  { %v5171_v2 = vld [vmem:[%s10586_s0 + $0x38b] sm:$0x80]   ;;  %v5177_v23 = vld [vmem:[%s10586_s0 + $0x2e2] sm:$0x20]   ;;  %v2659_v26 = vsel %vm25_vm5, %v5170_v1, %v2655_v16  ;;  %v5182_v3 = vld [vmem:[%s10586_s0 + $0xbb] sm:$0x2]   ;;  %v2685_v34 = vsel %vm17_vm3, %v5176_v30, %v2681_v28 }
  0xe8   :  { %v5178_v24 = vld [vmem:[%s10586_s0 + $0x361] sm:$0x40]   ;;  %v2663_v32 = vsel %vm29_vm6, %v5171_v2, %v2659_v26  ;;  %4686 = vst.msk [vmem:[%s10587_s1 + $0x2] ss:$3 sm:$0xff] %vm724_vm9, %v7869_v27   ;;  %v2708_v27 = vsel %vm5_vm0, %v5182_v3, %v5181_v29  ;;  %v5184_v35 = vld [vmem:[%s10586_s0 + $0x1b9] sm:$0x8]   ;;  %v2689_v37 = vsel %vm21_vm4, %v5177_v23, %v2685_v34 }
  0xe9   :  { %v5179_v25 = vld [vmem:[%s10586_s0 + $0x3e0] sm:$0x80]   ;;  %4695 = vst.msk [vmem:[%s10587_s1 + $0x1] ss:$3 sm:$0xff] %vm759_vm10, %v7908_v44   ;;  %v5183_v44 = vld [vmem:[%s10586_s0 + $0x13a] sm:$0x4]   ;;  %2664 = vrot.lane.b32.xlu1 %v2663_v32, %s5832_s18  ;;  %v2693_v46 = vsel %vm25_vm5, %v5178_v24, %v2689_v37  ;;  %v8579_v23 = vpop.permute.xlu1 %1416  }
  0xea   :  { %v5185_v36 = vld [vmem:[%s10586_s0 + $0x238] sm:$0x10]   ;;  %v2712_v40 = vsel %vm9_vm1, %v5183_v44, %v2708_v27  ;;  %v5190_v56 = vld [vmem:[%s10586_s0 + $0x11] sm:$0x1]   ;;  %v2697_v51 = vsel %vm29_vm6, %v5179_v25, %v2693_v46  ;;  %vm794_vm11 = vcmask 909152   ;;  %vm828_vm12 = vcmask 900952  }
  0xeb   :  { %v5186_v58 = vld [vmem:[%s10586_s0 + $0x2b7] sm:$0x20]   ;;  %v2716_v47 = vsel %vm13_vm2, %v5184_v35, %v2712_v40  ;;  %v5191_v48 = vld [vmem:[%s10586_s0 + $0x90] sm:$0x2]   ;;  %2698 = vrot.lane.b32.xlu0 %v2697_v51, %s5833_s6  ;;  %v5198_v5 = vld [vmem:[%s10586_s0 + $0x66] sm:$0x1]  }
  0xec   :  { %v5187_v41 = vld [vmem:[%s10586_s0 + $0x336] sm:$0x40]   ;;  %v2720_v52 = vsel %vm17_vm3, %v5185_v36, %v2716_v47  ;;  %v2743_v10 = vsel %vm5_vm0, %v5191_v48, %v5190_v56  ;;  %v5192_v54 = vld [vmem:[%s10586_s0 + $0x10f] sm:$0x4]   ;;  %v5199_v21 = vld [vmem:[%s10586_s0 + $0xe5] sm:$0x2]  }
  0xed   :  { %v5188_v42 = vld [vmem:[%s10586_s0 + $0x3b5] sm:$0x80]   ;;  %v5193_v49 = vld [vmem:[%s10586_s0 + $0x18e] sm:$0x8]   ;;  %v2724_v59 = vsel %vm21_vm4, %v5186_v58, %v2720_v52  ;;  %v2747_v60 = vsel %vm9_vm1, %v5192_v54, %v2743_v10  ;;  %795 = vst.msk [vmem:[%s10587_s1] ss:$3 sm:$0xff] %vm794_vm11, %v7934_v61   ;;  %v2777_v61 = vsel %vm5_vm0, %v5199_v21, %v5198_v5 }
  0xee   :  { %v5194_v4 = vld [vmem:[%s10586_s0 + $0x20d] sm:$0x10]   ;;  %v2728_v1 = vsel %vm25_vm5, %v5187_v41, %v2724_v59  ;;  %v2751_v2 = vsel %vm13_vm2, %v5193_v49, %v2747_v60  ;;  %4712 = vst.msk [vmem:[%s10587_s1 + $0x2] ss:$3 sm:$0xff] %vm828_vm12, %v7985_v17   ;;  %v5200_v17 = vld [vmem:[%s10586_s0 + $0x164] sm:$0x4]   ;;  %v8612_v41 = vpop.permute.xlu0 %1450  }
  0xef   :  { %v5195_v62 = vld [vmem:[%s10586_s0 + $0x28c] sm:$0x20]   ;;  %v2732_v7 = vsel %vm29_vm6, %v5188_v42, %v2728_v1  ;;  %v2755_v11 = vsel %vm17_vm3, %v5194_v4, %v2751_v2  ;;  %v5201_v13 = vld [vmem:[%s10586_s0 + $0x1e3] sm:$0x8]   ;;  %s5834_s28 = smov 52   ;;  %v2781_v8 = vsel %vm9_vm1, %v5200_v17, %v2777_v61  ;;  %s5835_s16 = smov 51  }
  0xf0   :  { %v5196_v0 = vld [vmem:[%s10586_s0 + $0x30b] sm:$0x40]   ;;  %v5202_v39 = vld [vmem:[%s10586_s0 + $0x262] sm:$0x10]   ;;  %2733 = vrot.lane.b32.xlu1 %v2732_v7, %s5834_s28  ;;  %v2759_v15 = vsel %vm21_vm4, %v5195_v62, %v2755_v11  ;;  %v2785_v25 = vsel %vm13_vm2, %v5201_v13, %v2781_v8  ;;  %v5207_v26 = vld [vmem:[%s10586_s0 + $0x3b] sm:$0x1]   ;;  %v8653_v62 = vpop.permute.xlu1 %1485  }
  0xf1   :  { %v5197_v63 = vld [vmem:[%s10586_s0 + $0x38a] sm:$0x80]   ;;  %v5203_v30 = vld [vmem:[%s10586_s0 + $0x2e1] sm:$0x20]   ;;  %v2763_v24 = vsel %vm25_vm5, %v5196_v0, %v2759_v15  ;;  %v5208_v28 = vld [vmem:[%s10586_s0 + $0xba] sm:$0x2]   ;;  %v2789_v3 = vsel %vm17_vm3, %v5202_v39, %v2785_v25 }
  0xf2   :  { %v5204_v16 = vld [vmem:[%s10586_s0 + $0x360] sm:$0x40]   ;;  %v2767_v29 = vsel %vm29_vm6, %v5197_v63, %v2763_v24  ;;  %v2812_v32 = vsel %vm5_vm0, %v5208_v28, %v5207_v26  ;;  %v5209_v34 = vld [vmem:[%s10586_s0 + $0x139] sm:$0x4]   ;;  %v2793_v35 = vsel %vm21_vm4, %v5203_v30, %v2789_v3  ;;  %vm863_vm13 = vcmask 892752   ;;  %s5836_s7 = smov 50  }
  0xf3   :  { %v5205_v18 = vld [vmem:[%s10586_s0 + $0x3df] sm:$0x80]   ;;  %v5210_v27 = vld [vmem:[%s10586_s0 + $0x1b8] sm:$0x8]   ;;  %2768 = vrot.lane.b32.xlu0 %v2767_v29, %s5835_s16  ;;  %v2816_v36 = vsel %vm9_vm1, %v5209_v34, %v2812_v32  ;;  %v2797_v42 = vsel %vm25_vm5, %v5204_v16, %v2793_v35  ;;  %vm898_vm14 = vcmask 884552   ;;  %s5837_s24 = smov 49   ;;  %v8686_v16 = vpop.permute.xlu0 %1520  }
  0xf4   :  { %v5211_v44 = vld [vmem:[%s10586_s0 + $0x237] sm:$0x10]   ;;  %v2820_v46 = vsel %vm13_vm2, %v5210_v27, %v2816_v36  ;;  %v5216_v47 = vld [vmem:[%s10586_s0 + $0x10] sm:$0x1]   ;;  %v2801_v48 = vsel %vm29_vm6, %v5205_v18, %v2797_v42  ;;  %4721 = vst.msk [vmem:[%s10587_s1 + $0x1] ss:$3 sm:$0xff] %vm863_vm13, %v8018_v20  }
  0xf5   :  { %v5212_v37 = vld [vmem:[%s10586_s0 + $0x2b6] sm:$0x20]   ;;  %v5217_v56 = vld [vmem:[%s10586_s0 + $0x8f] sm:$0x2]   ;;  %v2824_v51 = vsel %vm17_vm3, %v5211_v44, %v2820_v46  ;;  %899 = vst.msk [vmem:[%s10587_s1] ss:$3 sm:$0xff] %vm898_vm14, %v8059_v57   ;;  %2802 = vrot.lane.b32.xlu1 %v2801_v48, %s5836_s7 }
  0xf6   :  { %v5213_v40 = vld [vmem:[%s10586_s0 + $0x335] sm:$0x40]   ;;  %v2847_v20 = vsel %vm5_vm0, %v5217_v56, %v5216_v47  ;;  %v5218_v57 = vld [vmem:[%s10586_s0 + $0x10e] sm:$0x4]   ;;  %v2828_v54 = vsel %vm21_vm4, %v5212_v37, %v2824_v51  ;;  %v5224_v1 = vld [vmem:[%s10586_s0 + $0x65] sm:$0x1]   ;;  %v8727_v37 = vpop.permute.xlu1 %1554  }
  0xf7   :  { %v5214_v58 = vld [vmem:[%s10586_s0 + $0x3b4] sm:$0x80]   ;;  %v5219_v52 = vld [vmem:[%s10586_s0 + $0x18d] sm:$0x8]   ;;  %v2851_v49 = vsel %vm9_vm1, %v5218_v57, %v2847_v20  ;;  %v2832_v0 = vsel %vm25_vm5, %v5213_v40, %v2828_v54  ;;  %v5225_v2 = vld [vmem:[%s10586_s0 + $0xe4] sm:$0x2]  }
  0xf8   :  { %v5220_v10 = vld [vmem:[%s10586_s0 + $0x20c] sm:$0x10]   ;;  %v2855_v63 = vsel %vm13_vm2, %v5219_v52, %v2851_v49  ;;  %v2836_v5 = vsel %vm29_vm6, %v5214_v58, %v2832_v0  ;;  %v2881_v7 = vsel %vm5_vm0, %v5225_v2, %v5224_v1  ;;  %v5226_v11 = vld [vmem:[%s10586_s0 + $0x163] sm:$0x4]   ;;  %vm932_vm15 = vcmask 876352   ;;  %s5838_s17 = smov 48  }
  0xf9   :  { %v5221_v4 = vld [vmem:[%s10586_s0 + $0x28b] sm:$0x20]   ;;  %v2859_v21 = vsel %vm17_vm3, %v5220_v10, %v2855_v63  ;;  %v5227_v61 = vld [vmem:[%s10586_s0 + $0x1e2] sm:$0x8]   ;;  %2837 = vrot.lane.b32.xlu0 %v2836_v5, %s5837_s24  ;;  %v2885_v39 = vsel %vm9_vm1, %v5226_v11, %v2881_v7  ;;  %vm967_vm7 = vcmask 868152   ;;  %s5839_s4 = smov 47  }
  0xfa   :  { %v5222_v59 = vld [vmem:[%s10586_s0 + $0x30a] sm:$0x40]   ;;  %v5228_v17 = vld [vmem:[%s10586_s0 + $0x261] sm:$0x10]   ;;  %v2863_v13 = vsel %vm21_vm4, %v5221_v4, %v2859_v21  ;;  %v2889_v24 = vsel %vm13_vm2, %v5227_v61, %v2885_v39  ;;  %v5233_v25 = vld [vmem:[%s10586_s0 + $0x3a] sm:$0x1]   ;;  %v8790_v11 = vpop.permute.xlu1 %1624  }
  0xfb   :  { %v5223_v60 = vld [vmem:[%s10586_s0 + $0x389] sm:$0x80]   ;;  %v5229_v15 = vld [vmem:[%s10586_s0 + $0x2e0] sm:$0x20]   ;;  %v2867_v18 = vsel %vm25_vm5, %v5222_v59, %v2863_v13  ;;  %v5234_v26 = vld [vmem:[%s10586_s0 + $0xb9] sm:$0x2]   ;;  %v2893_v29 = vsel %vm17_vm3, %v5228_v17, %v2889_v24  ;;  %v8760_v59 = vpop.permute.xlu0 %1589  }
  0xfc   :  { %v5230_v8 = vld [vmem:[%s10586_s0 + $0x35f] sm:$0x40]   ;;  %v2871_v28 = vsel %vm29_vm6, %v5223_v60, %v2867_v18  ;;  %4738 = vst.msk [vmem:[%s10587_s1 + $0x2] ss:$3 sm:$0xff] %vm932_vm15, %v8092_v14   ;;  %v2916_v14 = vsel %vm5_vm0, %v5234_v26, %v5233_v25  ;;  %v5236_v3 = vld [vmem:[%s10586_s0 + $0x1b7] sm:$0x8]   ;;  %v2897_v34 = vsel %vm21_vm4, %v5229_v15, %v2893_v29 }
  0xfd   :  { %v5231_v30 = vld [vmem:[%s10586_s0 + $0x3de] sm:$0x80]   ;;  %4747 = vst.msk [vmem:[%s10587_s1 + $0x1] ss:$3 sm:$0xff] %vm967_vm7, %v8133_v33   ;;  %v5235_v33 = vld [vmem:[%s10586_s0 + $0x138] sm:$0x4]   ;;  %2872 = vrot.lane.b32.xlu1 %v2871_v28, %s5838_s17  ;;  %v2901_v40 = vsel %vm25_vm5, %v5230_v8, %v2897_v34 }
  0xfe   :  { %v5237_v32 = vld [vmem:[%s10586_s0 + $0x236] sm:$0x10]   ;;  %v2920_v27 = vsel %vm9_vm1, %v5235_v33, %v2916_v14  ;;  %v5242_v42 = vld [vmem:[%s10586_s0 + $0xf] sm:$0x1]   ;;  %v2905_v47 = vsel %vm29_vm6, %v5231_v30, %v2901_v40  ;;  %vm1002_vm8 = vcmask 859952   ;;  %vm1036_vm9 = vcmask 851752  }
  0xff   :  { %v5238_v44 = vld [vmem:[%s10586_s0 + $0x2b5] sm:$0x20]   ;;  %v2924_v58 = vsel %vm13_vm2, %v5236_v3, %v2920_v27  ;;  %v5243_v46 = vld [vmem:[%s10586_s0 + $0x8e] sm:$0x2]   ;;  %2906 = vrot.lane.b32.xlu0 %v2905_v47, %s5839_s4  ;;  %v5250_v63 = vld [vmem:[%s10586_s0 + $0x64] sm:$0x1]   ;;  %v8823_v3 = vpop.permute.xlu0 %1658  }
 0x100   :  { %v5239_v35 = vld [vmem:[%s10586_s0 + $0x334] sm:$0x40]   ;;  %v2928_v56 = vsel %vm17_vm3, %v5237_v32, %v2924_v58  ;;  %v2951_v48 = vsel %vm5_vm0, %v5243_v46, %v5242_v42  ;;  %v5244_v51 = vld [vmem:[%s10586_s0 + $0x10d] sm:$0x4]   ;;  %v5251_v1 = vld [vmem:[%s10586_s0 + $0xe3] sm:$0x2]  }
 0x101   :  { %v5240_v36 = vld [vmem:[%s10586_s0 + $0x3b3] sm:$0x80]   ;;  %v5245_v20 = vld [vmem:[%s10586_s0 + $0x18c] sm:$0x8]   ;;  %v2932_v52 = vsel %vm21_vm4, %v5238_v44, %v2928_v56  ;;  %v2955_v10 = vsel %vm9_vm1, %v5244_v51, %v2951_v48  ;;  %1003 = vst.msk [vmem:[%s10587_s1] ss:$3 sm:$0xff] %vm1002_vm8, %v8155_v12   ;;  %v2985_v12 = vsel %vm5_vm0, %v5251_v1, %v5250_v63  ;;  %v8864_v51 = vpop.permute.xlu1 %1693  }
 0x102   :  { %v5246_v57 = vld [vmem:[%s10586_s0 + $0x20b] sm:$0x10]   ;;  %v2936_v60 = vsel %vm25_vm5, %v5239_v35, %v2932_v52  ;;  %v2959_v0 = vsel %vm13_vm2, %v5245_v20, %v2955_v10  ;;  %4764 = vst.msk [vmem:[%s10587_s1 + $0x2] ss:$3 sm:$0xff] %vm1036_vm9, %v8196_v55   ;;  %v5252_v55 = vld [vmem:[%s10586_s0 + $0x162] sm:$0x4]  }
 0x103   :  { %v5247_v54 = vld [vmem:[%s10586_s0 + $0x28a] sm:$0x20]   ;;  %v2940_v2 = vsel %vm29_vm6, %v5240_v36, %v2936_v60  ;;  %v2963_v5 = vsel %vm17_vm3, %v5246_v57, %v2959_v0  ;;  %v5253_v21 = vld [vmem:[%s10586_s0 + $0x1e1] sm:$0x8]   ;;  %s5840_s25 = smov 46   ;;  %v2989_v17 = vsel %vm9_vm1, %v5252_v55, %v2985_v12  ;;  %s5841_s14 = smov 45  }
 0x104   :  { %v5248_v49 = vld [vmem:[%s10586_s0 + $0x309] sm:$0x40]   ;;  %v5254_v7 = vld [vmem:[%s10586_s0 + $0x260] sm:$0x10]   ;;  %2941 = vrot.lane.b32.xlu1 %v2940_v2, %s5840_s25  ;;  %v2967_v61 = vsel %vm21_vm4, %v5247_v54, %v2963_v5  ;;  %v2993_v30 = vsel %vm13_vm2, %v5253_v21, %v2989_v17  ;;  %v5259_v18 = vld [vmem:[%s10586_s0 + $0x39] sm:$0x1]   ;;  %v8897_v21 = vpop.permute.xlu0 %1728  }
 0x105   :  { %v5249_v4 = vld [vmem:[%s10586_s0 + $0x388] sm:$0x80]   ;;  %v5255_v13 = vld [vmem:[%s10586_s0 + $0x2df] sm:$0x20]   ;;  %v2971_v8 = vsel %vm25_vm5, %v5248_v49, %v2967_v61  ;;  %v5260_v24 = vld [vmem:[%s10586_s0 + $0xb8] sm:$0x2]   ;;  %v2997_v26 = vsel %vm17_vm3, %v5254_v7, %v2993_v30 }
 0x106   :  { %v5256_v39 = vld [vmem:[%s10586_s0 + $0x35e] sm:$0x40]   ;;  %v2975_v25 = vsel %vm29_vm6, %v5249_v4, %v2971_v8  ;;  %v3020_v28 = vsel %vm5_vm0, %v5260_v24, %v5259_v18  ;;  %v5261_v29 = vld [vmem:[%s10586_s0 + $0x137] sm:$0x4]   ;;  %v3001_v32 = vsel %vm21_vm4, %v5255_v13, %v2997_v26  ;;  %vm1071_vm10 = vcmask 843552   ;;  %s5842_s5 = smov 44  }
 0x107   :  { %v5257_v15 = vld [vmem:[%s10586_s0 + $0x3dd] sm:$0x80]   ;;  %v5262_v14 = vld [vmem:[%s10586_s0 + $0x1b6] sm:$0x8]   ;;  %2976 = vrot.lane.b32.xlu0 %v2975_v25, %s5841_s14  ;;  %v3024_v34 = vsel %vm9_vm1, %v5261_v29, %v3020_v28  ;;  %v3005_v36 = vsel %vm25_vm5, %v5256_v39, %v3001_v32  ;;  %vm1106_vm11 = vcmask 835352   ;;  %s5843_s22 = smov 43   ;;  %v8938_v29 = vpop.permute.xlu1 %1762  }
 0x108   :  { %v5263_v33 = vld [vmem:[%s10586_s0 + $0x235] sm:$0x10]   ;;  %v3028_v40 = vsel %vm13_vm2, %v5262_v14, %v3024_v34  ;;  %v5268_v58 = vld [vmem:[%s10586_s0 + $0xe] sm:$0x1]   ;;  %v3009_v46 = vsel %vm29_vm6, %v5257_v15, %v3005_v36  ;;  %4773 = vst.msk [vmem:[%s10587_s1 + $0x1] ss:$3 sm:$0xff] %vm1071_vm10, %v8229_v45  }
 0x109   :  { %v5264_v27 = vld [vmem:[%s10586_s0 + $0x2b4] sm:$0x20]   ;;  %v5269_v42 = vld [vmem:[%s10586_s0 + $0x8d] sm:$0x2]   ;;  %v3032_v47 = vsel %vm17_vm3, %v5263_v33, %v3028_v40  ;;  %1107 = vst.msk [vmem:[%s10587_s1] ss:$3 sm:$0xff] %vm1106_vm11, %v8270_v43   ;;  %3010 = vrot.lane.b32.xlu1 %v3009_v46, %s5842_s5 }
 0x10a   :  { %v5265_v44 = vld [vmem:[%s10586_s0 + $0x333] sm:$0x40]   ;;  %v3055_v45 = vsel %vm5_vm0, %v5269_v42, %v5268_v58  ;;  %v5270_v43 = vld [vmem:[%s10586_s0 + $0x10c] sm:$0x4]   ;;  %v3036_v20 = vsel %vm21_vm4, %v5264_v27, %v3032_v47  ;;  %v5276_v60 = vld [vmem:[%s10586_s0 + $0x63] sm:$0x1]  }
 0x10b   :  { %v5266_v35 = vld [vmem:[%s10586_s0 + $0x3b2] sm:$0x80]   ;;  %v5271_v56 = vld [vmem:[%s10586_s0 + $0x18b] sm:$0x8]   ;;  %v3059_v57 = vsel %vm9_vm1, %v5270_v43, %v3055_v45  ;;  %v3040_v49 = vsel %vm25_vm5, %v5265_v44, %v3036_v20  ;;  %v5277_v0 = vld [vmem:[%s10586_s0 + $0xe2] sm:$0x2]  }
 0x10c   :  { %v5272_v48 = vld [vmem:[%s10586_s0 + $0x20a] sm:$0x10]   ;;  %v3063_v4 = vsel %vm13_vm2, %v5271_v56, %v3059_v57  ;;  %v3044_v63 = vsel %vm29_vm6, %v5266_v35, %v3040_v49  ;;  %v3089_v2 = vsel %vm5_vm0, %v5277_v0, %v5276_v60  ;;  %v5278_v5 = vld [vmem:[%s10586_s0 + $0x161] sm:$0x4]   ;;  %vm1140_vm12 = vcmask 827152   ;;  %s5844_s15 = smov 42   ;;  %v8971_v56 = vpop.permute.xlu0 %1797   ;;  %v8992_v0 = vpop.permute.xlu1 %1832  }
 0x10d   :  { %v5273_v52 = vld [vmem:[%s10586_s0 + $0x289] sm:$0x20]   ;;  %v3067_v1 = vsel %vm17_vm3, %v5272_v48, %v3063_v4  ;;  %v5279_v12 = vld [vmem:[%s10586_s0 + $0x1e0] sm:$0x8]   ;;  %3045 = vrot.lane.b32.xlu0 %v3044_v63, %s5843_s22  ;;  %v3093_v61 = vsel %vm9_vm1, %v5278_v5, %v3089_v2  ;;  %vm1175_vm13 = vcmask 818952   ;;  %s5845_s2 = smov 41  }
 0x10e   :  { %v5274_v10 = vld [vmem:[%s10586_s0 + $0x308] sm:$0x40]   ;;  %v5280_v55 = vld [vmem:[%s10586_s0 + $0x25f] sm:$0x10]   ;;  %v3071_v7 = vsel %vm21_vm4, %v5273_v52, %v3067_v1  ;;  %v3097_v8 = vsel %vm13_vm2, %v5279_v12, %v3093_v61  ;;  %v5285_v30 = vld [vmem:[%s10586_s0 + $0x38] sm:$0x1]  }
 0x10f   :  { %v5275_v54 = vld [vmem:[%s10586_s0 + $0x387] sm:$0x80]   ;;  %v5281_v17 = vld [vmem:[%s10586_s0 + $0x2de] sm:$0x20]   ;;  %v3075_v15 = vsel %vm25_vm5, %v5274_v10, %v3071_v7  ;;  %v5286_v18 = vld [vmem:[%s10586_s0 + $0xb7] sm:$0x2]   ;;  %v3101_v25 = vsel %vm17_vm3, %v5280_v55, %v3097_v8 }
 0x110   :  { %v5282_v13 = vld [vmem:[%s10586_s0 + $0x35d] sm:$0x40]   ;;  %v3079_v24 = vsel %vm29_vm6, %v5275_v54, %v3075_v15  ;;  %4790 = vst.msk [vmem:[%s10587_s1 + $0x2] ss:$3 sm:$0xff] %vm1140_vm12, %v8303_v19   ;;  %v3124_v19 = vsel %vm5_vm0, %v5286_v18, %v5285_v30  ;;  %v5288_v26 = vld [vmem:[%s10586_s0 + $0x1b5] sm:$0x8]   ;;  %v3105_v14 = vsel %vm21_vm4, %v5281_v17, %v3101_v25  ;;  %v9033_v30 = vpop.permute.xlu0 %1866  }
 0x111   :  { %v5283_v39 = vld [vmem:[%s10586_s0 + $0x3dc] sm:$0x80]   ;;  %4799 = vst.msk [vmem:[%s10587_s1 + $0x1] ss:$3 sm:$0xff] %vm1175_vm13, %v8344_v22   ;;  %v5287_v22 = vld [vmem:[%s10586_s0 + $0x136] sm:$0x4]   ;;  %3080 = vrot.lane.b32.xlu1 %v3079_v24, %s5844_s15  ;;  %v3109_v44 = vsel %vm25_vm5, %v5282_v13, %v3105_v14 }
 0x112   :  { %v5289_v28 = vld [vmem:[%s10586_s0 + $0x234] sm:$0x10]   ;;  %v3128_v33 = vsel %vm9_vm1, %v5287_v22, %v3124_v19  ;;  %v5294_v36 = vld [vmem:[%s10586_s0 + $0xd] sm:$0x1]   ;;  %v3113_v58 = vsel %vm29_vm6, %v5283_v39, %v3109_v44  ;;  %vm1210_vm14 = vcmask 810752   ;;  %vm1244_vm15 = vcmask 802552  }
 0x113   :  { %v5290_v32 = vld [vmem:[%s10586_s0 + $0x2b3] sm:$0x20]   ;;  %v3132_v35 = vsel %vm13_vm2, %v5288_v26, %v3128_v33  ;;  %v5295_v40 = vld [vmem:[%s10586_s0 + $0x8c] sm:$0x2]   ;;  %3114 = vrot.lane.b32.xlu0 %v3113_v58, %s5845_s2  ;;  %v5302_v4 = vld [vmem:[%s10586_s0 + $0x62] sm:$0x1]  }
 0x114   :  { %v5291_v34 = vld [vmem:[%s10586_s0 + $0x332] sm:$0x40]   ;;  %v3136_v42 = vsel %vm17_vm3, %v5289_v28, %v3132_v35  ;;  %v3159_v46 = vsel %vm5_vm0, %v5295_v40, %v5294_v36  ;;  %v5296_v47 = vld [vmem:[%s10586_s0 + $0x10b] sm:$0x4]   ;;  %v5303_v60 = vld [vmem:[%s10586_s0 + $0xe1] sm:$0x2]   ;;  %v9066_v40 = vpop.permute.xlu1 %1901  }
 0x115   :  { %v5292_v27 = vld [vmem:[%s10586_s0 + $0x3b1] sm:$0x80]   ;;  %v5297_v45 = vld [vmem:[%s10586_s0 + $0x18a] sm:$0x8]   ;;  %v3140_v48 = vsel %vm21_vm4, %v5290_v32, %v3136_v42  ;;  %v3163_v20 = vsel %vm9_vm1, %v5296_v47, %v3159_v46  ;;  %1211 = vst.msk [vmem:[%s10587_s1] ss:$3 sm:$0xff] %vm1210_vm14, %v8365_v38   ;;  %v3193_v38 = vsel %vm5_vm0, %v5303_v60, %v5302_v4  ;;  %v9107_v4 = vpop.permute.xlu0 %1936  }
 0x116   :  { %v5298_v43 = vld [vmem:[%s10586_s0 + $0x209] sm:$0x10]   ;;  %v3144_v54 = vsel %vm25_vm5, %v5291_v34, %v3140_v48  ;;  %v3167_v49 = vsel %vm13_vm2, %v5297_v45, %v3163_v20  ;;  %4816 = vst.msk [vmem:[%s10587_s1 + $0x2] ss:$3 sm:$0xff] %vm1244_vm15, %v8398_v53   ;;  %v5304_v53 = vld [vmem:[%s10586_s0 + $0x160] sm:$0x4]  }
 0x117   :  { %v5299_v57 = vld [vmem:[%s10586_s0 + $0x288] sm:$0x20]   ;;  %v3148_v63 = vsel %vm29_vm6, %v5292_v27, %v3144_v54  ;;  %v3171_v1 = vsel %vm17_vm3, %v5298_v43, %v3167_v49  ;;  %v5305_v2 = vld [vmem:[%s10586_s0 + $0x1df] sm:$0x8]   ;;  %s5846_s23 = smov 40   ;;  %v3197_v55 = vsel %vm9_vm1, %v5304_v53, %v3193_v38  ;;  %s5847_s12 = smov 39  }
 0x118   :  { %v5300_v52 = vld [vmem:[%s10586_s0 + $0x307] sm:$0x40]   ;;  %v5306_v5 = vld [vmem:[%s10586_s0 + $0x25e] sm:$0x10]   ;;  %3149 = vrot.lane.b32.xlu1 %v3148_v63, %s5846_s23  ;;  %v3175_v12 = vsel %vm21_vm4, %v5299_v57, %v3171_v1  ;;  %v3201_v39 = vsel %vm13_vm2, %v5305_v2, %v3197_v55  ;;  %v5311_v15 = vld [vmem:[%s10586_s0 + $0x37] sm:$0x1]  }
 0x119   :  { %v5301_v10 = vld [vmem:[%s10586_s0 + $0x386] sm:$0x80]   ;;  %v5307_v7 = vld [vmem:[%s10586_s0 + $0x2dd] sm:$0x20]   ;;  %v3179_v13 = vsel %vm25_vm5, %v5300_v52, %v3175_v12  ;;  %v5312_v8 = vld [vmem:[%s10586_s0 + $0xb6] sm:$0x2]   ;;  %v3205_v24 = vsel %vm17_vm3, %v5306_v5, %v3201_v39 }
 0x11a   :  { %v5308_v61 = vld [vmem:[%s10586_s0 + $0x35c] sm:$0x40]   ;;  %v3183_v18 = vsel %vm29_vm6, %v5301_v10, %v3179_v13  ;;  %v3228_v25 = vsel %vm5_vm0, %v5312_v8, %v5311_v15  ;;  %v5313_v19 = vld [vmem:[%s10586_s0 + $0x135] sm:$0x4]   ;;  %v3209_v28 = vsel %vm21_vm4, %v5307_v7, %v3205_v24  ;;  %vm1279_vm7 = vcmask 794352   ;;  %s5848_s3 = smov 38   ;;  %v9140_v8 = vpop.permute.xlu1 %1970  }
 0x11b   :  { %v5309_v17 = vld [vmem:[%s10586_s0 + $0x3db] sm:$0x80]   ;;  %v5314_v22 = vld [vmem:[%s10586_s0 + $0x1b4] sm:$0x8]   ;;  %3184 = vrot.lane.b32.xlu0 %v3183_v18, %s5847_s12  ;;  %v3232_v14 = vsel %vm9_vm1, %v5313_v19, %v3228_v25  ;;  %v3213_v27 = vsel %vm25_vm5, %v5308_v61, %v3209_v28  ;;  %vm1314_vm8 = vcmask 786152   ;;  %s5849_s20 = smov 37  }
 0x11c   :  { %v5315_v26 = vld [vmem:[%s10586_s0 + $0x233] sm:$0x10]   ;;  %v3236_v44 = vsel %vm13_vm2, %v5314_v22, %v3232_v14  ;;  %v5320_v35 = vld [vmem:[%s10586_s0 + $0xc] sm:$0x1]   ;;  %v3217_v58 = vsel %vm29_vm6, %v5309_v17, %v3213_v27  ;;  %4825 = vst.msk [vmem:[%s10587_s1 + $0x1] ss:$3 sm:$0xff] %vm1279_vm7, %v8439_v9  }
 0x11d   :  { %v5316_v33 = vld [vmem:[%s10586_s0 + $0x2b2] sm:$0x20]   ;;  %v5321_v36 = vld [vmem:[%s10586_s0 + $0x8b] sm:$0x2]   ;;  %v3240_v42 = vsel %vm17_vm3, %v5315_v26, %v3236_v44  ;;  %1315 = vst.msk [vmem:[%s10587_s1] ss:$3 sm:$0xff] %vm1314_vm8, %v8472_v31   ;;  %3218 = vrot.lane.b32.xlu1 %v3217_v58, %s5848_s3 }
 0x11e   :  { %v5317_v32 = vld [vmem:[%s10586_s0 + $0x331] sm:$0x40]   ;;  %v3263_v9 = vsel %vm5_vm0, %v5321_v36, %v5320_v35  ;;  %v5322_v31 = vld [vmem:[%s10586_s0 + $0x10a] sm:$0x4]   ;;  %v3244_v45 = vsel %vm21_vm4, %v5316_v33, %v3240_v42  ;;  %v5328_v54 = vld [vmem:[%s10586_s0 + $0x61] sm:$0x1]   ;;  %v9181_v35 = vpop.permute.xlu0 %2005  }
 0x11f   :  { %v5318_v34 = vld [vmem:[%s10586_s0 + $0x3b0] sm:$0x80]   ;;  %v5323_v46 = vld [vmem:[%s10586_s0 + $0x189] sm:$0x8]   ;;  %v3267_v43 = vsel %vm9_vm1, %v5322_v31, %v3263_v9  ;;  %v3248_v52 = vsel %vm25_vm5, %v5317_v32, %v3244_v45  ;;  %v5329_v49 = vld [vmem:[%s10586_s0 + $0xe0] sm:$0x2]  }
 0x120   :  { %v5324_v47 = vld [vmem:[%s10586_s0 + $0x208] sm:$0x10]   ;;  %v3271_v10 = vsel %vm13_vm2, %v5323_v46, %v3267_v43  ;;  %v3252_v60 = vsel %vm29_vm6, %v5318_v34, %v3248_v52  ;;  %v3297_v1 = vsel %vm5_vm0, %v5329_v49, %v5328_v54  ;;  %v5330_v38 = vld [vmem:[%s10586_s0 + $0x15f] sm:$0x4]   ;;  %vm1348_vm9 = vcmask 777952   ;;  %s5850_s13 = smov 36   ;;  %v9214_v49 = vpop.permute.xlu1 %2040  }
 0x121   :  { %v5325_v48 = vld [vmem:[%s10586_s0 + $0x287] sm:$0x20]   ;;  %v3275_v63 = vsel %vm17_vm3, %v5324_v47, %v3271_v10  ;;  %v5331_v53 = vld [vmem:[%s10586_s0 + $0x1de] sm:$0x8]   ;;  %3253 = vrot.lane.b32.xlu0 %v3252_v60, %s5849_s20  ;;  %v3301_v12 = vsel %vm9_vm1, %v5330_v38, %v3297_v1  ;;  %vm1383_vm10 = vcmask 769752   ;;  %s5851_s30 = smov 35  }
 0x122   :  { %v5326_v20 = vld [vmem:[%s10586_s0 + $0x306] sm:$0x40]   ;;  %v5332_v2 = vld [vmem:[%s10586_s0 + $0x25d] sm:$0x10]   ;;  %v3279_v5 = vsel %vm21_vm4, %v5325_v48, %v3275_v63  ;;  %v3305_v13 = vsel %vm13_vm2, %v5331_v53, %v3301_v12  ;;  %v5337_v39 = vld [vmem:[%s10586_s0 + $0x36] sm:$0x1]  }
 0x123   :  { %v5327_v57 = vld [vmem:[%s10586_s0 + $0x385] sm:$0x80]   ;;  %v5333_v55 = vld [vmem:[%s10586_s0 + $0x2dc] sm:$0x20]   ;;  %v3283_v17 = vsel %vm25_vm5, %v5326_v20, %v3279_v5  ;;  %v5338_v15 = vld [vmem:[%s10586_s0 + $0xb5] sm:$0x2]   ;;  %v3309_v24 = vsel %vm17_vm3, %v5332_v2, %v3305_v13 }
 0x124   :  { %v5334_v7 = vld [vmem:[%s10586_s0 + $0x35b] sm:$0x40]   ;;  %v3287_v18 = vsel %vm29_vm6, %v5327_v57, %v3283_v17  ;;  %4842 = vst.msk [vmem:[%s10587_s1 + $0x2] ss:$3 sm:$0xff] %vm1348_vm9, %v8513_v50   ;;  %v3332_v50 = vsel %vm5_vm0, %v5338_v15, %v5337_v39  ;;  %v5340_v25 = vld [vmem:[%s10586_s0 + $0x1b3] sm:$0x8]   ;;  %v3313_v22 = vsel %vm21_vm4, %v5333_v55, %v3309_v24 }
 0x125   :  { %v5335_v61 = vld [vmem:[%s10586_s0 + $0x3da] sm:$0x80]   ;;  %4851 = vst.msk [vmem:[%s10587_s1 + $0x1] ss:$3 sm:$0xff] %vm1383_vm10, %v8546_v6   ;;  %v5339_v6 = vld [vmem:[%s10586_s0 + $0x134] sm:$0x4]   ;;  %3288 = vrot.lane.b32.xlu1 %v3287_v18, %s5850_s13  ;;  %v3317_v32 = vsel %vm25_vm5, %v5334_v7, %v3313_v22  ;;  %v9247_v7 = vpop.permute.xlu0 %2074  }
 0x126   :  { %v5341_v19 = vld [vmem:[%s10586_s0 + $0x232] sm:$0x10]   ;;  %v3336_v26 = vsel %vm9_vm1, %v5339_v6, %v3332_v50  ;;  %v5346_v27 = vld [vmem:[%s10586_s0 + $0xb] sm:$0x1]   ;;  %v3321_v36 = vsel %vm29_vm6, %v5335_v61, %v3317_v32  ;;  %vm1418_vm11 = vcmask 761552   ;;  %vm1452_vm12 = vcmask 753352  }
 0x127   :  { %v5342_v28 = vld [vmem:[%s10586_s0 + $0x2b1] sm:$0x20]   ;;  %v3340_v34 = vsel %vm13_vm2, %v5340_v25, %v3336_v26  ;;  %v5347_v44 = vld [vmem:[%s10586_s0 + $0x8a] sm:$0x2]   ;;  %3322 = vrot.lane.b32.xlu0 %v3321_v36, %s5851_s30  ;;  %v5354_v10 = vld [vmem:[%s10586_s0 + $0x60] sm:$0x1]  }
 0x128   :  { %v5343_v14 = vld [vmem:[%s10586_s0 + $0x330] sm:$0x40]   ;;  %v3344_v58 = vsel %vm17_vm3, %v5341_v19, %v3340_v34  ;;  %v3367_v42 = vsel %vm5_vm0, %v5347_v44, %v5346_v27  ;;  %v5348_v9 = vld [vmem:[%s10586_s0 + $0x109] sm:$0x4]   ;;  %v5355_v54 = vld [vmem:[%s10586_s0 + $0xdf] sm:$0x2]   ;;  %v9288_v44 = vpop.permute.xlu1 %2109  }
 0x129   :  { %v5344_v33 = vld [vmem:[%s10586_s0 + $0x3af] sm:$0x80]   ;;  %v5349_v31 = vld [vmem:[%s10586_s0 + $0x188] sm:$0x8]   ;;  %v3348_v47 = vsel %vm21_vm4, %v5342_v28, %v3344_v58  ;;  %v3371_v45 = vsel %vm9_vm1, %v5348_v9, %v3367_v42  ;;  %1419 = vst.msk [vmem:[%s10587_s1] ss:$3 sm:$0xff] %vm1418_vm11, %v8579_v23   ;;  %v3401_v23 = vsel %vm5_vm0, %v5355_v54, %v5354_v10 }
 0x12a   :  { %v5350_v46 = vld [vmem:[%s10586_s0 + $0x207] sm:$0x10]   ;;  %v3352_v57 = vsel %vm25_vm5, %v5343_v14, %v3348_v47  ;;  %v3375_v52 = vsel %vm13_vm2, %v5349_v31, %v3371_v45  ;;  %4868 = vst.msk [vmem:[%s10587_s1 + $0x2] ss:$3 sm:$0xff] %vm1452_vm12, %v8612_v41   ;;  %v5356_v41 = vld [vmem:[%s10586_s0 + $0x15e] sm:$0x4]  }
 0x12b   :  { %v5351_v43 = vld [vmem:[%s10586_s0 + $0x286] sm:$0x20]   ;;  %v3356_v60 = vsel %vm29_vm6, %v5344_v33, %v3352_v57  ;;  %v3379_v63 = vsel %vm17_vm3, %v5350_v46, %v3375_v52  ;;  %v5357_v1 = vld [vmem:[%s10586_s0 + $0x1dd] sm:$0x8]   ;;  %s5852_s21 = smov 34   ;;  %v3405_v2 = vsel %vm9_vm1, %v5356_v41, %v3401_v23  ;;  %s5853_s9 = smov 33  }
 0x12c   :  { %v5352_v48 = vld [vmem:[%s10586_s0 + $0x305] sm:$0x40]   ;;  %v5358_v38 = vld [vmem:[%s10586_s0 + $0x25c] sm:$0x10]   ;;  %3357 = vrot.lane.b32.xlu1 %v3356_v60, %s5852_s21  ;;  %v3383_v53 = vsel %vm21_vm4, %v5351_v43, %v3379_v63  ;;  %v3409_v17 = vsel %vm13_vm2, %v5357_v1, %v3405_v2  ;;  %v5363_v13 = vld [vmem:[%s10586_s0 + $0x35] sm:$0x1]  }
 0x12d   :  { %v5353_v20 = vld [vmem:[%s10586_s0 + $0x384] sm:$0x80]   ;;  %v5359_v5 = vld [vmem:[%s10586_s0 + $0x2db] sm:$0x20]   ;;  %v3387_v61 = vsel %vm25_vm5, %v5352_v48, %v3383_v53  ;;  %v5364_v39 = vld [vmem:[%s10586_s0 + $0xb4] sm:$0x2]   ;;  %v3413_v18 = vsel %vm17_vm3, %v5358_v38, %v3409_v17  ;;  %v9321_v48 = vpop.permute.xlu0 %2144  }
 0x12e   :  { %v5360_v12 = vld [vmem:[%s10586_s0 + $0x35a] sm:$0x40]   ;;  %v3391_v15 = vsel %vm29_vm6, %v5353_v20, %v3387_v61  ;;  %v3436_v24 = vsel %vm5_vm0, %v5364_v39, %v5363_v13  ;;  %v5365_v50 = vld [vmem:[%s10586_s0 + $0x133] sm:$0x4]   ;;  %v3417_v19 = vsel %vm21_vm4, %v5359_v5, %v3413_v18  ;;  %vm1487_vm13 = vcmask 745152   ;;  %s5854_s27 = smov 32  }
 0x12f   :  { %v5361_v55 = vld [vmem:[%s10586_s0 + $0x3d9] sm:$0x80]   ;;  %v5366_v6 = vld [vmem:[%s10586_s0 + $0x1b2] sm:$0x8]   ;;  %3392 = vrot.lane.b32.xlu0 %v3391_v15, %s5853_s9  ;;  %v3440_v22 = vsel %vm9_vm1, %v5365_v50, %v3436_v24  ;;  %v3421_v33 = vsel %vm25_vm5, %v5360_v12, %v3417_v19  ;;  %vm1522_vm14 = vcmask 736952   ;;  %s5855_s18 = smov 31  }
 0x130   :  { %v5367_v25 = vld [vmem:[%s10586_s0 + $0x231] sm:$0x10]   ;;  %v3444_v32 = vsel %vm13_vm2, %v5366_v6, %v3440_v22  ;;  %v5372_v34 = vld [vmem:[%s10586_s0 + $0xa] sm:$0x1]   ;;  %v3425_v36 = vsel %vm29_vm6, %v5361_v55, %v3421_v33  ;;  %4877 = vst.msk [vmem:[%s10587_s1 + $0x1] ss:$3 sm:$0xff] %vm1487_vm13, %v8653_v62  }
 0x131   :  { %v5368_v26 = vld [vmem:[%s10586_s0 + $0x2b0] sm:$0x20]   ;;  %v5373_v27 = vld [vmem:[%s10586_s0 + $0x89] sm:$0x2]   ;;  %v3448_v58 = vsel %vm17_vm3, %v5367_v25, %v3444_v32  ;;  %1523 = vst.msk [vmem:[%s10587_s1] ss:$3 sm:$0xff] %vm1522_vm14, %v8686_v16   ;;  %3426 = vrot.lane.b32.xlu1 %v3425_v36, %s5854_s27  ;;  %v9401_v32 = vpop.permute.xlu1 %2178  }
 0x132   :  { %v5369_v28 = vld [vmem:[%s10586_s0 + $0x32f] sm:$0x40]   ;;  %v3471_v62 = vsel %vm5_vm0, %v5373_v27, %v5372_v34  ;;  %v5374_v16 = vld [vmem:[%s10586_s0 + $0x108] sm:$0x4]   ;;  %v3452_v31 = vsel %vm21_vm4, %v5368_v26, %v3448_v58  ;;  %v5380_v52 = vld [vmem:[%s10586_s0 + $0x5f] sm:$0x1]  }
 0x133   :  { %v5370_v14 = vld [vmem:[%s10586_s0 + $0x3ae] sm:$0x80]   ;;  %v5375_v42 = vld [vmem:[%s10586_s0 + $0x187] sm:$0x8]   ;;  %v3475_v46 = vsel %vm9_vm1, %v5374_v16, %v3471_v62  ;;  %v3456_v20 = vsel %vm25_vm5, %v5369_v28, %v3452_v31  ;;  %v5381_v10 = vld [vmem:[%s10586_s0 + $0xde] sm:$0x2]  }
 0x134   :  { %v5376_v9 = vld [vmem:[%s10586_s0 + $0x206] sm:$0x10]   ;;  %v3479_v57 = vsel %vm13_vm2, %v5375_v42, %v3475_v46  ;;  %v3460_v54 = vsel %vm29_vm6, %v5370_v14, %v3456_v20  ;;  %v3505_v63 = vsel %vm5_vm0, %v5381_v10, %v5380_v52  ;;  %v5382_v23 = vld [vmem:[%s10586_s0 + $0x15d] sm:$0x4]   ;;  %vm1556_vm15 = vcmask 728752   ;;  %s5856_s10 = smov 30  }
 0x135   :  { %v5377_v47 = vld [vmem:[%s10586_s0 + $0x285] sm:$0x20]   ;;  %v3483_v60 = vsel %vm17_vm3, %v5376_v9, %v3479_v57  ;;  %v5383_v41 = vld [vmem:[%s10586_s0 + $0x1dc] sm:$0x8]   ;;  %3461 = vrot.lane.b32.xlu0 %v3460_v54, %s5855_s18  ;;  %v3509_v53 = vsel %vm9_vm1, %v5382_v23, %v3505_v63  ;;  %vm1591_vm7 = vcmask 720552   ;;  %s5857_s28 = smov 29  }
 0x136   :  { %v5378_v45 = vld [vmem:[%s10586_s0 + $0x304] sm:$0x40]   ;;  %v5384_v1 = vld [vmem:[%s10586_s0 + $0x25b] sm:$0x10]   ;;  %v3487_v38 = vsel %vm21_vm4, %v5377_v47, %v3483_v60  ;;  %v3513_v61 = vsel %vm13_vm2, %v5383_v41, %v3509_v53  ;;  %v5389_v17 = vld [vmem:[%s10586_s0 + $0x34] sm:$0x1]  }
 0x137   :  { %v5379_v43 = vld [vmem:[%s10586_s0 + $0x383] sm:$0x80]   ;;  %v5385_v2 = vld [vmem:[%s10586_s0 + $0x2da] sm:$0x20]   ;;  %v3491_v55 = vsel %vm25_vm5, %v5378_v45, %v3487_v38  ;;  %v5390_v13 = vld [vmem:[%s10586_s0 + $0xb3] sm:$0x2]   ;;  %v3517_v15 = vsel %vm17_vm3, %v5384_v1, %v3513_v61  ;;  %v9426_v45 = vpop.permute.xlu0 %2213  }
 0x138   :  { %v5386_v5 = vld [vmem:[%s10586_s0 + $0x359] sm:$0x40]   ;;  %v3495_v39 = vsel %vm29_vm6, %v5379_v43, %v3491_v55  ;;  %4894 = vst.msk [vmem:[%s10587_s1 + $0x2] ss:$3 sm:$0xff] %vm1556_vm15, %v8727_v37   ;;  %v3540_v37 = vsel %vm5_vm0, %v5390_v13, %v5389_v17  ;;  %v5392_v18 = vld [vmem:[%s10586_s0 + $0x1b1] sm:$0x8]   ;;  %v3521_v50 = vsel %vm21_vm4, %v5385_v2, %v3517_v15  ;;  %v9467_v2 = vpop.permute.xlu1 %2248  }
 0x139   :  { %v5387_v12 = vld [vmem:[%s10586_s0 + $0x3d8] sm:$0x80]   ;;  %4903 = vst.msk [vmem:[%s10587_s1 + $0x1] ss:$3 sm:$0xff] %vm1591_vm7, %v8760_v59   ;;  %v5391_v59 = vld [vmem:[%s10586_s0 + $0x132] sm:$0x4]   ;;  %3496 = vrot.lane.b32.xlu1 %v3495_v39, %s5856_s10  ;;  %v3525_v26 = vsel %vm25_vm5, %v5386_v5, %v3521_v50 }
 0x13a   :  { %v5393_v24 = vld [vmem:[%s10586_s0 + $0x230] sm:$0x10]   ;;  %v3544_v6 = vsel %vm9_vm1, %v5391_v59, %v3540_v37  ;;  %v5398_v14 = vld [vmem:[%s10586_s0 + $0x9] sm:$0x1]   ;;  %v3529_v34 = vsel %vm29_vm6, %v5387_v12, %v3525_v26  ;;  %vm1626_vm8 = vcmask 712352   ;;  %vm1660_vm9 = vcmask 704152  }
 0x13b   :  { %v5394_v25 = vld [vmem:[%s10586_s0 + $0x2af] sm:$0x20]   ;;  %v3548_v28 = vsel %vm13_vm2, %v5392_v18, %v3544_v6  ;;  %v5399_v33 = vld [vmem:[%s10586_s0 + $0x88] sm:$0x2]   ;;  %3530 = vrot.lane.b32.xlu0 %v3529_v34, %s5857_s28  ;;  %v5406_v57 = vld [vmem:[%s10586_s0 + $0x5e] sm:$0x1]  }
 0x13c   :  { %v5395_v19 = vld [vmem:[%s10586_s0 + $0x32e] sm:$0x40]   ;;  %v3552_v27 = vsel %vm17_vm3, %v5393_v24, %v3548_v28  ;;  %v3575_v36 = vsel %vm5_vm0, %v5399_v33, %v5398_v14  ;;  %v5400_v58 = vld [vmem:[%s10586_s0 + $0x107] sm:$0x4]   ;;  %v5407_v52 = vld [vmem:[%s10586_s0 + $0xdd] sm:$0x2]  }
 0x13d   :  { %v5396_v22 = vld [vmem:[%s10586_s0 + $0x3ad] sm:$0x80]   ;;  %v5401_v62 = vld [vmem:[%s10586_s0 + $0x186] sm:$0x8]   ;;  %v3556_v42 = vsel %vm21_vm4, %v5394_v25, %v3552_v27  ;;  %v3579_v9 = vsel %vm9_vm1, %v5400_v58, %v3575_v36  ;;  %1627 = vst.msk [vmem:[%s10587_s1] ss:$3 sm:$0xff] %vm1626_vm8, %v8790_v11   ;;  %v3609_v11 = vsel %vm5_vm0, %v5407_v52, %v5406_v57 }
 0x13e   :  { %v5402_v16 = vld [vmem:[%s10586_s0 + $0x205] sm:$0x10]   ;;  %v3560_v43 = vsel %vm25_vm5, %v5395_v19, %v3556_v42  ;;  %v3583_v20 = vsel %vm13_vm2, %v5401_v62, %v3579_v9  ;;  %4920 = vst.msk [vmem:[%s10587_s1 + $0x2] ss:$3 sm:$0xff] %vm1660_vm9, %v8823_v3   ;;  %v5408_v3 = vld [vmem:[%s10586_s0 + $0x15c] sm:$0x4]   ;;  %v9500_v19 = vpop.permute.xlu0 %2282  }
 0x13f   :  { %v5403_v31 = vld [vmem:[%s10586_s0 + $0x284] sm:$0x20]   ;;  %v3564_v10 = vsel %vm29_vm6, %v5396_v22, %v3560_v43  ;;  %v3587_v54 = vsel %vm17_vm3, %v5402_v16, %v3583_v20  ;;  %v5409_v60 = vld [vmem:[%s10586_s0 + $0x1db] sm:$0x8]   ;;  %s5858_s19 = smov 28   ;;  %v3613_v41 = vsel %vm9_vm1, %v5408_v3, %v3609_v11  ;;  %s5859_s7 = smov 27  }
 0x140   :  { %v5404_v46 = vld [vmem:[%s10586_s0 + $0x303] sm:$0x40]   ;;  %v5410_v63 = vld [vmem:[%s10586_s0 + $0x25a] sm:$0x10]   ;;  %3565 = vrot.lane.b32.xlu1 %v3564_v10, %s5858_s19  ;;  %v3591_v23 = vsel %vm21_vm4, %v5403_v31, %v3587_v54  ;;  %v3617_v12 = vsel %vm13_vm2, %v5409_v60, %v3613_v41  ;;  %v5415_v55 = vld [vmem:[%s10586_s0 + $0x33] sm:$0x1]   ;;  %v9541_v31 = vpop.permute.xlu1 %2317  }
 0x141   :  { %v5405_v47 = vld [vmem:[%s10586_s0 + $0x382] sm:$0x80]   ;;  %v5411_v1 = vld [vmem:[%s10586_s0 + $0x2d9] sm:$0x20]   ;;  %v3595_v5 = vsel %vm25_vm5, %v5404_v46, %v3591_v23  ;;  %v5416_v61 = vld [vmem:[%s10586_s0 + $0xb2] sm:$0x2]   ;;  %v3621_v13 = vsel %vm17_vm3, %v5410_v63, %v3617_v12 }
 0x142   :  { %v5412_v38 = vld [vmem:[%s10586_s0 + $0x358] sm:$0x40]   ;;  %v3599_v17 = vsel %vm29_vm6, %v5405_v47, %v3595_v5  ;;  %v3644_v39 = vsel %vm5_vm0, %v5416_v61, %v5415_v55  ;;  %v5417_v15 = vld [vmem:[%s10586_s0 + $0x131] sm:$0x4]   ;;  %v3625_v18 = vsel %vm21_vm4, %v5411_v1, %v3621_v13  ;;  %vm1695_vm10 = vcmask 695952   ;;  %s5860_s29 = smov 26  }
 0x143   :  { %v5413_v53 = vld [vmem:[%s10586_s0 + $0x3d7] sm:$0x80]   ;;  %v5418_v37 = vld [vmem:[%s10586_s0 + $0x1b0] sm:$0x8]   ;;  %3600 = vrot.lane.b32.xlu0 %v3599_v17, %s5859_s7  ;;  %v3648_v24 = vsel %vm9_vm1, %v5417_v15, %v3644_v39  ;;  %v3629_v22 = vsel %vm25_vm5, %v5412_v38, %v3625_v18  ;;  %vm1730_vm11 = vcmask 687752   ;;  %s5861_s17 = smov 25   ;;  %v9574_v38 = vpop.permute.xlu0 %2352  }
 0x144   :  { %v5419_v59 = vld [vmem:[%s10586_s0 + $0x22f] sm:$0x10]   ;;  %v3652_v26 = vsel %vm13_vm2, %v5418_v37, %v3648_v24  ;;  %v5424_v28 = vld [vmem:[%s10586_s0 + $0x8] sm:$0x1]   ;;  %v3633_v33 = vsel %vm29_vm6, %v5413_v53, %v3629_v22  ;;  %4929 = vst.msk [vmem:[%s10587_s1 + $0x1] ss:$3 sm:$0xff] %vm1695_vm10, %v8864_v51  }
 0x145   :  { %v5420_v50 = vld [vmem:[%s10586_s0 + $0x2ae] sm:$0x20]   ;;  %v5425_v14 = vld [vmem:[%s10586_s0 + $0x87] sm:$0x2]   ;;  %v3656_v34 = vsel %vm17_vm3, %v5419_v59, %v3652_v26  ;;  %1731 = vst.msk [vmem:[%s10587_s1] ss:$3 sm:$0xff] %vm1730_vm11, %v8897_v21   ;;  %3634 = vrot.lane.b32.xlu1 %v3633_v33, %s5860_s29 }
 0x146   :  { %v5421_v6 = vld [vmem:[%s10586_s0 + $0x32d] sm:$0x40]   ;;  %v3679_v51 = vsel %vm5_vm0, %v5425_v14, %v5424_v28  ;;  %v5426_v21 = vld [vmem:[%s10586_s0 + $0x106] sm:$0x4]   ;;  %v3660_v58 = vsel %vm21_vm4, %v5420_v50, %v3656_v34  ;;  %v5432_v43 = vld [vmem:[%s10586_s0 + $0x5d] sm:$0x1]   ;;  %v9615_v50 = vpop.permute.xlu1 %2386  }
 0x147   :  { %v5422_v25 = vld [vmem:[%s10586_s0 + $0x3ac] sm:$0x80]   ;;  %v5427_v27 = vld [vmem:[%s10586_s0 + $0x185] sm:$0x8]   ;;  %v3683_v62 = vsel %vm9_vm1, %v5426_v21, %v3679_v51  ;;  %v3664_v46 = vsel %vm25_vm5, %v5421_v6, %v3660_v58  ;;  %v5433_v20 = vld [vmem:[%s10586_s0 + $0xdc] sm:$0x2]  }
 0x148   :  { %v5428_v36 = vld [vmem:[%s10586_s0 + $0x204] sm:$0x10]   ;;  %v3687_v47 = vsel %vm13_vm2, %v5427_v27, %v3683_v62  ;;  %v3668_v57 = vsel %vm29_vm6, %v5422_v25, %v3664_v46  ;;  %v3713_v10 = vsel %vm5_vm0, %v5433_v20, %v5432_v43  ;;  %v5434_v54 = vld [vmem:[%s10586_s0 + $0x15b] sm:$0x4]   ;;  %vm1764_vm12 = vcmask 679552   ;;  %s5862_s8 = smov 24  }
 0x149   :  { %v5429_v16 = vld [vmem:[%s10586_s0 + $0x283] sm:$0x20]   ;;  %v3691_v52 = vsel %vm17_vm3, %v5428_v36, %v3687_v47  ;;  %v5435_v11 = vld [vmem:[%s10586_s0 + $0x1da] sm:$0x8]   ;;  %3669 = vrot.lane.b32.xlu0 %v3668_v57, %s5861_s17  ;;  %v3717_v63 = vsel %vm9_vm1, %v5434_v54, %v3713_v10  ;;  %vm1799_vm13 = vcmask 671352   ;;  %s5863_s25 = smov 23  }
 0x14a   :  { %v5430_v42 = vld [vmem:[%s10586_s0 + $0x302] sm:$0x40]   ;;  %v5436_v3 = vld [vmem:[%s10586_s0 + $0x259] sm:$0x10]   ;;  %v3695_v60 = vsel %vm21_vm4, %v5429_v16, %v3691_v52  ;;  %v3721_v5 = vsel %vm13_vm2, %v5435_v11, %v3717_v63  ;;  %v5441_v12 = vld [vmem:[%s10586_s0 + $0x32] sm:$0x1]  }
 0x14b   :  { %v5431_v9 = vld [vmem:[%s10586_s0 + $0x381] sm:$0x80]   ;;  %v5437_v23 = vld [vmem:[%s10586_s0 + $0x2d8] sm:$0x20]   ;;  %v3699_v53 = vsel %vm25_vm5, %v5430_v42, %v3695_v60  ;;  %v5442_v55 = vld [vmem:[%s10586_s0 + $0xb1] sm:$0x2]   ;;  %v3725_v17 = vsel %vm17_vm3, %v5436_v3, %v3721_v5  ;;  %v9648_v42 = vpop.permute.xlu0 %2421  }
 0x14c   :  { %v5438_v41 = vld [vmem:[%s10586_s0 + $0x357] sm:$0x40]   ;;  %v3703_v61 = vsel %vm29_vm6, %v5431_v9, %v3699_v53  ;;  %4946 = vst.msk [vmem:[%s10587_s1 + $0x2] ss:$3 sm:$0xff] %vm1764_vm12, %v8938_v29   ;;  %v3748_v29 = vsel %vm5_vm0, %v5442_v55, %v5441_v12  ;;  %v5444_v13 = vld [vmem:[%s10586_s0 + $0x1af] sm:$0x8]   ;;  %v3729_v15 = vsel %vm21_vm4, %v5437_v23, %v3725_v17  ;;  %v9689_v23 = vpop.permute.xlu1 %2456  }
 0x14d   :  { %v5439_v1 = vld [vmem:[%s10586_s0 + $0x3d6] sm:$0x80]   ;;  %4955 = vst.msk [vmem:[%s10587_s1 + $0x1] ss:$3 sm:$0xff] %vm1799_vm13, %v8971_v56   ;;  %v5443_v56 = vld [vmem:[%s10586_s0 + $0x130] sm:$0x4]   ;;  %3704 = vrot.lane.b32.xlu1 %v3703_v61, %s5862_s8  ;;  %v3733_v6 = vsel %vm25_vm5, %v5438_v41, %v3729_v15 }
 0x14e   :  { %v5445_v39 = vld [vmem:[%s10586_s0 + $0x22e] sm:$0x10]   ;;  %v3752_v37 = vsel %vm9_vm1, %v5443_v56, %v3748_v29  ;;  %v5450_v22 = vld [vmem:[%s10586_s0 + $0x7] sm:$0x1]   ;;  %v3737_v28 = vsel %vm29_vm6, %v5439_v1, %v3733_v6  ;;  %vm1834_vm14 = vcmask 663152   ;;  %vm1868_vm15 = vcmask 654952  }
 0x14f   :  { %v5446_v59 = vld [vmem:[%s10586_s0 + $0x2ad] sm:$0x20]   ;;  %v3756_v25 = vsel %vm13_vm2, %v5444_v13, %v3752_v37  ;;  %v5451_v26 = vld [vmem:[%s10586_s0 + $0x86] sm:$0x2]   ;;  %3738 = vrot.lane.b32.xlu0 %v3737_v28, %s5863_s25  ;;  %v5458_v47 = vld [vmem:[%s10586_s0 + $0x5c] sm:$0x1]  }
 0x150   :  { %v5447_v18 = vld [vmem:[%s10586_s0 + $0x32c] sm:$0x40]   ;;  %v3760_v14 = vsel %vm17_vm3, %v5445_v39, %v3756_v25  ;;  %v3783_v33 = vsel %vm5_vm0, %v5451_v26, %v5450_v22  ;;  %v5452_v34 = vld [vmem:[%s10586_s0 + $0x105] sm:$0x4]   ;;  %v5459_v43 = vld [vmem:[%s10586_s0 + $0xdb] sm:$0x2]  }
 0x151   :  { %v5448_v24 = vld [vmem:[%s10586_s0 + $0x3ab] sm:$0x80]   ;;  %v5453_v51 = vld [vmem:[%s10586_s0 + $0x184] sm:$0x8]   ;;  %v3764_v27 = vsel %vm21_vm4, %v5446_v59, %v3760_v14  ;;  %v3787_v36 = vsel %vm9_vm1, %v5452_v34, %v3783_v33  ;;  %1835 = vst.msk [vmem:[%s10587_s1] ss:$3 sm:$0xff] %vm1834_vm14, %v8992_v0   ;;  %v3817_v0 = vsel %vm5_vm0, %v5459_v43, %v5458_v47 }
 0x152   :  { %v5454_v21 = vld [vmem:[%s10586_s0 + $0x203] sm:$0x10]   ;;  %v3768_v9 = vsel %vm25_vm5, %v5447_v18, %v3764_v27  ;;  %v3791_v46 = vsel %vm13_vm2, %v5453_v51, %v3787_v36  ;;  %4972 = vst.msk [vmem:[%s10587_s1 + $0x2] ss:$3 sm:$0xff] %vm1868_vm15, %v9033_v30   ;;  %v5460_v30 = vld [vmem:[%s10586_s0 + $0x15a] sm:$0x4]   ;;  %v9722_v18 = vpop.permute.xlu0 %2490  }
 0x153   :  { %v5455_v58 = vld [vmem:[%s10586_s0 + $0x282] sm:$0x20]   ;;  %v3772_v20 = vsel %vm29_vm6, %v5448_v24, %v3768_v9  ;;  %v3795_v57 = vsel %vm17_vm3, %v5454_v21, %v3791_v46  ;;  %v5461_v52 = vld [vmem:[%s10586_s0 + $0x1d9] sm:$0x8]   ;;  %s5864_s11 = smov 22   ;;  %v3821_v11 = vsel %vm9_vm1, %v5460_v30, %v3817_v0  ;;  %s5865_s5 = smov 21  }
 0x154   :  { %v5456_v62 = vld [vmem:[%s10586_s0 + $0x301] sm:$0x40]   ;;  %v5462_v10 = vld [vmem:[%s10586_s0 + $0x258] sm:$0x10]   ;;  %3773 = vrot.lane.b32.xlu1 %v3772_v20, %s5864_s11  ;;  %v3799_v54 = vsel %vm21_vm4, %v5455_v58, %v3795_v57  ;;  %v3825_v1 = vsel %vm13_vm2, %v5461_v52, %v3821_v11  ;;  %v5467_v53 = vld [vmem:[%s10586_s0 + $0x31] sm:$0x1]   ;;  %v9763_v58 = vpop.permute.xlu1 %2525  }
 0x155   :  { %v5457_v16 = vld [vmem:[%s10586_s0 + $0x380] sm:$0x80]   ;;  %v5463_v3 = vld [vmem:[%s10586_s0 + $0x2d7] sm:$0x20]   ;;  %v3803_v41 = vsel %vm25_vm5, %v5456_v62, %v3799_v54  ;;  %v5468_v5 = vld [vmem:[%s10586_s0 + $0xb0] sm:$0x2]   ;;  %v3829_v55 = vsel %vm17_vm3, %v5462_v10, %v3825_v1 }
 0x156   :  { %v5464_v60 = vld [vmem:[%s10586_s0 + $0x356] sm:$0x40]   ;;  %v3807_v12 = vsel %vm29_vm6, %v5457_v16, %v3803_v41  ;;  %v3852_v61 = vsel %vm5_vm0, %v5468_v5, %v5467_v53  ;;  %v5469_v17 = vld [vmem:[%s10586_s0 + $0x12f] sm:$0x4]   ;;  %v3833_v13 = vsel %vm21_vm4, %v5463_v3, %v3829_v55  ;;  %vm1903_vm7 = vcmask 646752   ;;  %s5866_s26 = smov 20  }
 0x157   :  { %v5465_v63 = vld [vmem:[%s10586_s0 + $0x3d5] sm:$0x80]   ;;  %v5470_v29 = vld [vmem:[%s10586_s0 + $0x1ae] sm:$0x8]   ;;  %3808 = vrot.lane.b32.xlu0 %v3807_v12, %s5865_s5  ;;  %v3856_v39 = vsel %vm9_vm1, %v5469_v17, %v3852_v61  ;;  %v3837_v24 = vsel %vm25_vm5, %v5464_v60, %v3833_v13  ;;  %vm1938_vm8 = vcmask 638552   ;;  %s5867_s15 = smov 19   ;;  %v9796_v60 = vpop.permute.xlu0 %2560  }
 0x158   :  { %v5471_v56 = vld [vmem:[%s10586_s0 + $0x22d] sm:$0x10]   ;;  %v3860_v6 = vsel %vm13_vm2, %v5470_v29, %v3856_v39  ;;  %v5476_v25 = vld [vmem:[%s10586_s0 + $0x6] sm:$0x1]   ;;  %v3841_v26 = vsel %vm29_vm6, %v5465_v63, %v3837_v24  ;;  %4981 = vst.msk [vmem:[%s10587_s1 + $0x1] ss:$3 sm:$0xff] %vm1903_vm7, %v9066_v40  }
 0x159   :  { %v5472_v15 = vld [vmem:[%s10586_s0 + $0x2ac] sm:$0x20]   ;;  %v5477_v22 = vld [vmem:[%s10586_s0 + $0x85] sm:$0x2]   ;;  %v3864_v28 = vsel %vm17_vm3, %v5471_v56, %v3860_v6  ;;  %1939 = vst.msk [vmem:[%s10587_s1] ss:$3 sm:$0xff] %vm1938_vm8, %v9107_v4   ;;  %3842 = vrot.lane.b32.xlu1 %v3841_v26, %s5866_s26 }
 0x15a   :  { %v5473_v37 = vld [vmem:[%s10586_s0 + $0x32b] sm:$0x40]   ;;  %v3887_v40 = vsel %vm5_vm0, %v5477_v22, %v5476_v25  ;;  %v5478_v4 = vld [vmem:[%s10586_s0 + $0x104] sm:$0x4]   ;;  %v3868_v34 = vsel %vm21_vm4, %v5472_v15, %v3864_v28  ;;  %v5484_v9 = vld [vmem:[%s10586_s0 + $0x5b] sm:$0x1]   ;;  %v9837_v15 = vpop.permute.xlu1 %2594  }
 0x15b   :  { %v5474_v59 = vld [vmem:[%s10586_s0 + $0x3aa] sm:$0x80]   ;;  %v5479_v14 = vld [vmem:[%s10586_s0 + $0x183] sm:$0x8]   ;;  %v3891_v51 = vsel %vm9_vm1, %v5478_v4, %v3887_v40  ;;  %v3872_v62 = vsel %vm25_vm5, %v5473_v37, %v3868_v34  ;;  %v5485_v46 = vld [vmem:[%s10586_s0 + $0xda] sm:$0x2]  }
 0x15c   :  { %v5480_v33 = vld [vmem:[%s10586_s0 + $0x202] sm:$0x10]   ;;  %v3895_v16 = vsel %vm13_vm2, %v5479_v14, %v3891_v51  ;;  %v3876_v47 = vsel %vm29_vm6, %v5474_v59, %v3872_v62  ;;  %v3921_v20 = vsel %vm5_vm0, %v5485_v46, %v5484_v9  ;;  %v5486_v57 = vld [vmem:[%s10586_s0 + $0x159] sm:$0x4]   ;;  %vm1972_vm9 = vcmask 630352   ;;  %s5868_s6 = smov 18  }
 0x15d   :  { %v5481_v21 = vld [vmem:[%s10586_s0 + $0x281] sm:$0x20]   ;;  %v3899_v43 = vsel %vm17_vm3, %v5480_v33, %v3895_v16  ;;  %v5487_v0 = vld [vmem:[%s10586_s0 + $0x1d8] sm:$0x8]   ;;  %3877 = vrot.lane.b32.xlu0 %v3876_v47, %s5867_s15  ;;  %v3925_v10 = vsel %vm9_vm1, %v5486_v57, %v3921_v20  ;;  %vm2007_vm10 = vcmask 622152   ;;  %s5869_s23 = smov 17  }
 0x15e   :  { %v5482_v27 = vld [vmem:[%s10586_s0 + $0x300] sm:$0x40]   ;;  %v5488_v30 = vld [vmem:[%s10586_s0 + $0x257] sm:$0x10]   ;;  %v3903_v52 = vsel %vm21_vm4, %v5481_v21, %v3899_v43  ;;  %v3929_v41 = vsel %vm13_vm2, %v5487_v0, %v3925_v10  ;;  %v5493_v1 = vld [vmem:[%s10586_s0 + $0x30] sm:$0x1]  }
 0x15f   :  { %v5483_v36 = vld [vmem:[%s10586_s0 + $0x37f] sm:$0x80]   ;;  %v5489_v54 = vld [vmem:[%s10586_s0 + $0x2d6] sm:$0x20]   ;;  %v3907_v63 = vsel %vm25_vm5, %v5482_v27, %v3903_v52  ;;  %v5494_v53 = vld [vmem:[%s10586_s0 + $0xaf] sm:$0x2]   ;;  %v3933_v12 = vsel %vm17_vm3, %v5488_v30, %v3929_v41  ;;  %v9870_v27 = vpop.permute.xlu0 %2629  }
 0x160   :  { %v5490_v11 = vld [vmem:[%s10586_s0 + $0x355] sm:$0x40]   ;;  %v3911_v5 = vsel %vm29_vm6, %v5483_v36, %v3907_v63  ;;  %4998 = vst.msk [vmem:[%s10587_s1 + $0x2] ss:$3 sm:$0xff] %vm1972_vm9, %v9140_v8   ;;  %v3956_v8 = vsel %vm5_vm0, %v5494_v53, %v5493_v1  ;;  %v5496_v55 = vld [vmem:[%s10586_s0 + $0x1ad] sm:$0x8]   ;;  %v3937_v17 = vsel %vm21_vm4, %v5489_v54, %v3933_v12  ;;  %v9911_v54 = vpop.permute.xlu1 %2664  }
 0x161   :  { %v5491_v3 = vld [vmem:[%s10586_s0 + $0x3d4] sm:$0x80]   ;;  %5007 = vst.msk [vmem:[%s10587_s1 + $0x1] ss:$3 sm:$0xff] %vm2007_vm10, %v9181_v35   ;;  %v5495_v35 = vld [vmem:[%s10586_s0 + $0x12e] sm:$0x4]   ;;  %3912 = vrot.lane.b32.xlu1 %v3911_v5, %s5868_s6  ;;  %v3941_v37 = vsel %vm25_vm5, %v5490_v11, %v3937_v17 }
 0x162   :  { %v5497_v61 = vld [vmem:[%s10586_s0 + $0x22c] sm:$0x10]   ;;  %v3960_v29 = vsel %vm9_vm1, %v5495_v35, %v3956_v8  ;;  %v5502_v24 = vld [vmem:[%s10586_s0 + $0x5] sm:$0x1]   ;;  %v3945_v25 = vsel %vm29_vm6, %v5491_v3, %v3941_v37  ;;  %vm2042_vm11 = vcmask 613952   ;;  %vm2076_vm12 = vcmask 605752  }
 0x163   :  { %v5498_v56 = vld [vmem:[%s10586_s0 + $0x2ab] sm:$0x20]   ;;  %v3964_v59 = vsel %vm13_vm2, %v5496_v55, %v3960_v29  ;;  %v5503_v6 = vld [vmem:[%s10586_s0 + $0x84] sm:$0x2]   ;;  %3946 = vrot.lane.b32.xlu0 %v3945_v25, %s5869_s23  ;;  %v5510_v16 = vld [vmem:[%s10586_s0 + $0x5a] sm:$0x1]  }
 0x164   :  { %v5499_v13 = vld [vmem:[%s10586_s0 + $0x32a] sm:$0x40]   ;;  %v3968_v22 = vsel %vm17_vm3, %v5497_v61, %v3964_v59  ;;  %v3991_v26 = vsel %vm5_vm0, %v5503_v6, %v5502_v24  ;;  %v5504_v28 = vld [vmem:[%s10586_s0 + $0x103] sm:$0x4]   ;;  %v5511_v9 = vld [vmem:[%s10586_s0 + $0xd9] sm:$0x2]  }
 0x165   :  { %v5500_v39 = vld [vmem:[%s10586_s0 + $0x3a9] sm:$0x80]   ;;  %v5505_v40 = vld [vmem:[%s10586_s0 + $0x182] sm:$0x8]   ;;  %v3972_v14 = vsel %vm21_vm4, %v5498_v56, %v3968_v22  ;;  %v3995_v33 = vsel %vm9_vm1, %v5504_v28, %v3991_v26  ;;  %2043 = vst.msk [vmem:[%s10587_s1] ss:$3 sm:$0xff] %vm2042_vm11, %v9214_v49   ;;  %v4025_v49 = vsel %vm5_vm0, %v5511_v9, %v5510_v16 }
 0x166   :  { %v5506_v4 = vld [vmem:[%s10586_s0 + $0x201] sm:$0x10]   ;;  %v3976_v36 = vsel %vm25_vm5, %v5499_v13, %v3972_v14  ;;  %v3999_v62 = vsel %vm13_vm2, %v5505_v40, %v3995_v33  ;;  %5024 = vst.msk [vmem:[%s10587_s1 + $0x2] ss:$3 sm:$0xff] %vm2076_vm12, %v9247_v7   ;;  %v5512_v7 = vld [vmem:[%s10586_s0 + $0x158] sm:$0x4]   ;;  %v9944_v13 = vpop.permute.xlu0 %2698  }
 0x167   :  { %v5507_v34 = vld [vmem:[%s10586_s0 + $0x280] sm:$0x20]   ;;  %v3980_v46 = vsel %vm29_vm6, %v5500_v39, %v3976_v36  ;;  %v4003_v47 = vsel %vm17_vm3, %v5506_v4, %v3999_v62  ;;  %v5513_v43 = vld [vmem:[%s10586_s0 + $0x1d7] sm:$0x8]   ;;  %s5870_s16 = smov 16   ;;  %v4029_v0 = vsel %vm9_vm1, %v5512_v7, %v4025_v49  ;;  %s5871_s3 = smov 15  }
 0x168   :  { %v5508_v51 = vld [vmem:[%s10586_s0 + $0x2ff] sm:$0x40]   ;;  %v5514_v20 = vld [vmem:[%s10586_s0 + $0x256] sm:$0x10]   ;;  %3981 = vrot.lane.b32.xlu1 %v3980_v46, %s5870_s16  ;;  %v4007_v57 = vsel %vm21_vm4, %v5507_v34, %v4003_v47  ;;  %v4033_v3 = vsel %vm13_vm2, %v5513_v43, %v4029_v0  ;;  %v5519_v63 = vld [vmem:[%s10586_s0 + $0x2f] sm:$0x1]   ;;  %v9985_v34 = vpop.permute.xlu1 %2733  }
 0x169   :  { %v5509_v21 = vld [vmem:[%s10586_s0 + $0x37e] sm:$0x80]   ;;  %v5515_v30 = vld [vmem:[%s10586_s0 + $0x2d5] sm:$0x20]   ;;  %v4011_v11 = vsel %vm25_vm5, %v5508_v51, %v4007_v57  ;;  %v5520_v41 = vld [vmem:[%s10586_s0 + $0xae] sm:$0x2]   ;;  %v4037_v53 = vsel %vm17_vm3, %v5514_v20, %v4033_v3 }
 0x16a   :  { %v5516_v52 = vld [vmem:[%s10586_s0 + $0x354] sm:$0x40]   ;;  %v4015_v1 = vsel %vm29_vm6, %v5509_v21, %v4011_v11  ;;  %v4060_v5 = vsel %vm5_vm0, %v5520_v41, %v5519_v63  ;;  %v5521_v12 = vld [vmem:[%s10586_s0 + $0x12d] sm:$0x4]   ;;  %v4041_v55 = vsel %vm21_vm4, %v5515_v30, %v4037_v53  ;;  %vm2111_vm13 = vcmask 597552   ;;  %s5872_s24 = smov 14  }
 0x16b   :  { %v5517_v10 = vld [vmem:[%s10586_s0 + $0x3d3] sm:$0x80]   ;;  %v5522_v8 = vld [vmem:[%s10586_s0 + $0x1ac] sm:$0x8]   ;;  %4016 = vrot.lane.b32.xlu0 %v4015_v1, %s5871_s3  ;;  %v4064_v61 = vsel %vm9_vm1, %v5521_v12, %v4060_v5  ;;  %v4045_v39 = vsel %vm25_vm5, %v5516_v52, %v4041_v55  ;;  %vm2146_vm14 = vcmask 589352   ;;  %s5873_s13 = smov 13   ;;  %v10018_v52 = vpop.permute.xlu0 %2768  }
 0x16c   :  { %v5523_v35 = vld [vmem:[%s10586_s0 + $0x22b] sm:$0x10]   ;;  %v4068_v37 = vsel %vm13_vm2, %v5522_v8, %v4064_v61  ;;  %v5528_v59 = vld [vmem:[%s10586_s0 + $0x4] sm:$0x1]   ;;  %v4049_v6 = vsel %vm29_vm6, %v5517_v10, %v4045_v39  ;;  %5033 = vst.msk [vmem:[%s10587_s1 + $0x1] ss:$3 sm:$0xff] %vm2111_vm13, %v9288_v44  }
 0x16d   :  { %v5524_v17 = vld [vmem:[%s10586_s0 + $0x2aa] sm:$0x20]   ;;  %v5529_v24 = vld [vmem:[%s10586_s0 + $0x83] sm:$0x2]   ;;  %v4072_v25 = vsel %vm17_vm3, %v5523_v35, %v4068_v37  ;;  %2147 = vst.msk [vmem:[%s10587_s1] ss:$3 sm:$0xff] %vm2146_vm14, %v9321_v48   ;;  %4050 = vrot.lane.b32.xlu1 %v4049_v6, %s5872_s24 }
 0x16e   :  { %v5525_v29 = vld [vmem:[%s10586_s0 + $0x329] sm:$0x40]   ;;  %v4095_v44 = vsel %vm5_vm0, %v5529_v24, %v5528_v59  ;;  %v5530_v48 = vld [vmem:[%s10586_s0 + $0x102] sm:$0x4]   ;;  %v4076_v28 = vsel %vm21_vm4, %v5524_v17, %v4072_v25  ;;  %v5536_v36 = vld [vmem:[%s10586_s0 + $0x59] sm:$0x1]   ;;  %v10059_v17 = vpop.permute.xlu1 %2802  }
 0x16f   :  { %v5526_v56 = vld [vmem:[%s10586_s0 + $0x3a8] sm:$0x80]   ;;  %v5531_v22 = vld [vmem:[%s10586_s0 + $0x181] sm:$0x8]   ;;  %v4099_v40 = vsel %vm9_vm1, %v5530_v48, %v4095_v44  ;;  %v4080_v51 = vsel %vm25_vm5, %v5525_v29, %v4076_v28  ;;  %v5537_v62 = vld [vmem:[%s10586_s0 + $0xd8] sm:$0x2]  }
 0x170   :  { %v5532_v26 = vld [vmem:[%s10586_s0 + $0x200] sm:$0x10]   ;;  %v4103_v21 = vsel %vm13_vm2, %v5531_v22, %v4099_v40  ;;  %v4084_v16 = vsel %vm29_vm6, %v5526_v56, %v4080_v51  ;;  %v4129_v46 = vsel %vm5_vm0, %v5537_v62, %v5536_v36  ;;  %v5538_v47 = vld [vmem:[%s10586_s0 + $0x157] sm:$0x4]   ;;  %vm2180_vm15 = vcmask 581152   ;;  %s5874_s4 = smov 12  }
 0x171   :  { %v5533_v4 = vld [vmem:[%s10586_s0 + $0x27f] sm:$0x20]   ;;  %v4107_v9 = vsel %vm17_vm3, %v5532_v26, %v4103_v21  ;;  %v5539_v49 = vld [vmem:[%s10586_s0 + $0x1d6] sm:$0x8]   ;;  %4085 = vrot.lane.b32.xlu0 %v4084_v16, %s5873_s13  ;;  %v4133_v20 = vsel %vm9_vm1, %v5538_v47, %v4129_v46  ;;  %vm2215_vm7 = vcmask 572952   ;;  %s5875_s21 = smov 11  }
 0x172   :  { %v5534_v14 = vld [vmem:[%s10586_s0 + $0x2fe] sm:$0x40]   ;;  %v5540_v7 = vld [vmem:[%s10586_s0 + $0x255] sm:$0x10]   ;;  %v4111_v43 = vsel %vm21_vm4, %v5533_v4, %v4107_v9  ;;  %v4137_v11 = vsel %vm13_vm2, %v5539_v49, %v4133_v20  ;;  %v5545_v3 = vld [vmem:[%s10586_s0 + $0x2e] sm:$0x1]  }
 0x173   :  { %v5535_v33 = vld [vmem:[%s10586_s0 + $0x37d] sm:$0x80]   ;;  %v5541_v57 = vld [vmem:[%s10586_s0 + $0x2d4] sm:$0x20]   ;;  %v4115_v10 = vsel %vm25_vm5, %v5534_v14, %v4111_v43  ;;  %v5546_v63 = vld [vmem:[%s10586_s0 + $0xad] sm:$0x2]   ;;  %v4141_v1 = vsel %vm17_vm3, %v5540_v7, %v4137_v11  ;;  %v10092_v14 = vpop.permute.xlu0 %2837  }
 0x174   :  { %v5542_v0 = vld [vmem:[%s10586_s0 + $0x353] sm:$0x40]   ;;  %v4119_v41 = vsel %vm29_vm6, %v5535_v33, %v4115_v10  ;;  %5050 = vst.msk [vmem:[%s10587_s1 + $0x2] ss:$3 sm:$0xff] %vm2180_vm15, %v9401_v32   ;;  %v4164_v32 = vsel %vm5_vm0, %v5546_v63, %v5545_v3  ;;  %v5548_v53 = vld [vmem:[%s10586_s0 + $0x1ab] sm:$0x8]   ;;  %v4145_v12 = vsel %vm21_vm4, %v5541_v57, %v4141_v1  ;;  %v10133_v57 = vpop.permute.xlu1 %2872  }
 0x175   :  { %v5543_v30 = vld [vmem:[%s10586_s0 + $0x3d2] sm:$0x80]   ;;  %5059 = vst.msk [vmem:[%s10587_s1 + $0x1] ss:$3 sm:$0xff] %vm2215_vm7, %v9426_v45   ;;  %v5547_v45 = vld [vmem:[%s10586_s0 + $0x12c] sm:$0x4]   ;;  %4120 = vrot.lane.b32.xlu1 %v4119_v41, %s5874_s4  ;;  %v4149_v29 = vsel %vm25_vm5, %v5542_v0, %v4145_v12 }
 0x176   :  { %v5549_v5 = vld [vmem:[%s10586_s0 + $0x22a] sm:$0x10]   ;;  %v4168_v8 = vsel %vm9_vm1, %v5547_v45, %v4164_v32  ;;  %v5554_v39 = vld [vmem:[%s10586_s0 + $0x3] sm:$0x1]   ;;  %v4153_v59 = vsel %vm29_vm6, %v5543_v30, %v4149_v29  ;;  %vm2250_vm8 = vcmask 564752   ;;  %vm2284_vm9 = vcmask 556552  }
 0x177   :  { %v5550_v35 = vld [vmem:[%s10586_s0 + $0x2a9] sm:$0x20]   ;;  %v4172_v56 = vsel %vm13_vm2, %v5548_v53, %v4168_v8  ;;  %v5555_v37 = vld [vmem:[%s10586_s0 + $0x82] sm:$0x2]   ;;  %4154 = vrot.lane.b32.xlu0 %v4153_v59, %s5875_s21  ;;  %v5562_v21 = vld [vmem:[%s10586_s0 + $0x58] sm:$0x1]  }
 0x178   :  { %v5551_v55 = vld [vmem:[%s10586_s0 + $0x328] sm:$0x40]   ;;  %v4176_v24 = vsel %vm17_vm3, %v5549_v5, %v4172_v56  ;;  %v4199_v6 = vsel %vm5_vm0, %v5555_v37, %v5554_v39  ;;  %v5556_v25 = vld [vmem:[%s10586_s0 + $0x101] sm:$0x4]   ;;  %v5563_v36 = vld [vmem:[%s10586_s0 + $0xd7] sm:$0x2]  }
 0x179   :  { %v5552_v61 = vld [vmem:[%s10586_s0 + $0x3a7] sm:$0x80]   ;;  %v5557_v44 = vld [vmem:[%s10586_s0 + $0x180] sm:$0x8]   ;;  %v4180_v22 = vsel %vm21_vm4, %v5550_v35, %v4176_v24  ;;  %v4203_v26 = vsel %vm9_vm1, %v5556_v25, %v4199_v6  ;;  %2251 = vst.msk [vmem:[%s10587_s1] ss:$3 sm:$0xff] %vm2250_vm8, %v9467_v2   ;;  %v4233_v2 = vsel %vm5_vm0, %v5563_v36, %v5562_v21 }
 0x17a   :  { %v5558_v48 = vld [vmem:[%s10586_s0 + $0x1ff] sm:$0x10]   ;;  %v4184_v33 = vsel %vm25_vm5, %v5551_v55, %v4180_v22  ;;  %v4207_v51 = vsel %vm13_vm2, %v5557_v44, %v4203_v26  ;;  %5076 = vst.msk [vmem:[%s10587_s1 + $0x2] ss:$3 sm:$0xff] %vm2284_vm9, %v9500_v19   ;;  %v5564_v19 = vld [vmem:[%s10586_s0 + $0x156] sm:$0x4]   ;;  %v10166_v55 = vpop.permute.xlu0 %2906  }
 0x17b   :  { %v5559_v28 = vld [vmem:[%s10586_s0 + $0x27e] sm:$0x20]   ;;  %v4188_v62 = vsel %vm29_vm6, %v5552_v61, %v4184_v33  ;;  %v4211_v16 = vsel %vm17_vm3, %v5558_v48, %v4207_v51  ;;  %v5565_v9 = vld [vmem:[%s10586_s0 + $0x1d5] sm:$0x8]   ;;  %s5876_s14 = smov 10   ;;  %v4237_v49 = vsel %vm9_vm1, %v5564_v19, %v4233_v2  ;;  %s5877_s27 = smov 9  }
 0x17c   :  { %v5560_v40 = vld [vmem:[%s10586_s0 + $0x2fd] sm:$0x40]   ;;  %v5566_v46 = vld [vmem:[%s10586_s0 + $0x254] sm:$0x10]   ;;  %4189 = vrot.lane.b32.xlu1 %v4188_v62, %s5876_s14  ;;  %v4215_v47 = vsel %vm21_vm4, %v5559_v28, %v4211_v16  ;;  %v4241_v30 = vsel %vm13_vm2, %v5565_v9, %v4237_v49  ;;  %v5571_v10 = vld [vmem:[%s10586_s0 + $0x2d] sm:$0x1]   ;;  %v10207_v28 = vpop.permute.xlu1 %2941  }
 0x17d   :  { %v5561_v4 = vld [vmem:[%s10586_s0 + $0x37c] sm:$0x80]   ;;  %v5567_v7 = vld [vmem:[%s10586_s0 + $0x2d3] sm:$0x20]   ;;  %v4219_v0 = vsel %vm25_vm5, %v5560_v40, %v4215_v47  ;;  %v5572_v11 = vld [vmem:[%s10586_s0 + $0xac] sm:$0x2]   ;;  %v4245_v63 = vsel %vm17_vm3, %v5566_v46, %v4241_v30 }
 0x17e   :  { %v5568_v43 = vld [vmem:[%s10586_s0 + $0x352] sm:$0x40]   ;;  %v4223_v3 = vsel %vm29_vm6, %v5561_v4, %v4219_v0  ;;  %v4268_v41 = vsel %vm5_vm0, %v5572_v11, %v5571_v10  ;;  %v5573_v1 = vld [vmem:[%s10586_s0 + $0x12b] sm:$0x4]   ;;  %v4249_v53 = vsel %vm21_vm4, %v5567_v7, %v4245_v63  ;;  %vm2319_vm10 = vcmask 548352   ;;  %s5878_s22 = smov 8  }
 0x17f   :  { %v5569_v20 = vld [vmem:[%s10586_s0 + $0x3d1] sm:$0x80]   ;;  %v5574_v32 = vld [vmem:[%s10586_s0 + $0x1aa] sm:$0x8]   ;;  %4224 = vrot.lane.b32.xlu0 %v4223_v3, %s5877_s27  ;;  %v4272_v5 = vsel %vm9_vm1, %v5573_v1, %v4268_v41  ;;  %v4253_v61 = vsel %vm25_vm5, %v5568_v43, %v4249_v53  ;;  %vm2354_vm11 = vcmask 540152   ;;  %s5879_s10 = smov 7   ;;  %v10240_v43 = vpop.permute.xlu0 %2976  }
 0x180   :  { %v5575_v45 = vld [vmem:[%s10586_s0 + $0x229] sm:$0x10]   ;;  %v4276_v29 = vsel %vm13_vm2, %v5574_v32, %v4272_v5  ;;  %v5580_v56 = vld [vmem:[%s10586_s0 + $0x2] sm:$0x1]   ;;  %v4257_v37 = vsel %vm29_vm6, %v5569_v20, %v4253_v61  ;;  %5085 = vst.msk [vmem:[%s10587_s1 + $0x1] ss:$3 sm:$0xff] %vm2319_vm10, %v9541_v31  }
 0x181   :  { %v5576_v12 = vld [vmem:[%s10586_s0 + $0x2a8] sm:$0x20]   ;;  %v5581_v39 = vld [vmem:[%s10586_s0 + $0x81] sm:$0x2]   ;;  %v4280_v59 = vsel %vm17_vm3, %v5575_v45, %v4276_v29  ;;  %2355 = vst.msk [vmem:[%s10587_s1] ss:$3 sm:$0xff] %vm2354_vm11, %v9574_v38   ;;  %4258 = vrot.lane.b32.xlu1 %v4257_v37, %s5878_s22 }
 0x182   :  { %v5577_v8 = vld [vmem:[%s10586_s0 + $0x327] sm:$0x40]   ;;  %v4303_v31 = vsel %vm5_vm0, %v5581_v39, %v5580_v56  ;;  %v5582_v38 = vld [vmem:[%s10586_s0 + $0x100] sm:$0x4]   ;;  %v4284_v25 = vsel %vm21_vm4, %v5576_v12, %v4280_v59  ;;  %v5588_v33 = vld [vmem:[%s10586_s0 + $0x57] sm:$0x1]   ;;  %v10281_v12 = vpop.permute.xlu1 %3010  }
 0x183   :  { %v5578_v35 = vld [vmem:[%s10586_s0 + $0x3a6] sm:$0x80]   ;;  %v5583_v24 = vld [vmem:[%s10586_s0 + $0x17f] sm:$0x8]   ;;  %v4307_v44 = vsel %vm9_vm1, %v5582_v38, %v4303_v31  ;;  %v4288_v40 = vsel %vm25_vm5, %v5577_v8, %v4284_v25  ;;  %v5589_v51 = vld [vmem:[%s10586_s0 + $0xd6] sm:$0x2]  }
 0x184   :  { %v5584_v6 = vld [vmem:[%s10586_s0 + $0x1fe] sm:$0x10]   ;;  %v4311_v4 = vsel %vm13_vm2, %v5583_v24, %v4307_v44  ;;  %v4292_v21 = vsel %vm29_vm6, %v5578_v35, %v4288_v40  ;;  %v4337_v62 = vsel %vm5_vm0, %v5589_v51, %v5588_v33  ;;  %v5590_v16 = vld [vmem:[%s10586_s0 + $0x155] sm:$0x4]   ;;  %vm2388_vm12 = vcmask 531952   ;;  %s5880_s2 = smov 6  }
 0x185   :  { %v5585_v48 = vld [vmem:[%s10586_s0 + $0x27d] sm:$0x20]   ;;  %v4315_v36 = vsel %vm17_vm3, %v5584_v6, %v4311_v4  ;;  %v5591_v2 = vld [vmem:[%s10586_s0 + $0x1d4] sm:$0x8]   ;;  %4293 = vrot.lane.b32.xlu0 %v4292_v21, %s5879_s10  ;;  %v4341_v46 = vsel %vm9_vm1, %v5590_v16, %v4337_v62  ;;  %vm2423_vm13 = vcmask 523752   ;;  %s5881_s19 = smov 5  }
 0x186   :  { %v5586_v22 = vld [vmem:[%s10586_s0 + $0x2fc] sm:$0x40]   ;;  %v5592_v19 = vld [vmem:[%s10586_s0 + $0x253] sm:$0x10]   ;;  %v4319_v9 = vsel %vm21_vm4, %v5585_v48, %v4315_v36  ;;  %v4345_v0 = vsel %vm13_vm2, %v5591_v2, %v4341_v46  ;;  %v5597_v30 = vld [vmem:[%s10586_s0 + $0x2c] sm:$0x1]   ;;  %v10352_v46 = vpop.permute.xlu1 %3080  }
 0x187   :  { %v5587_v26 = vld [vmem:[%s10586_s0 + $0x37b] sm:$0x80]   ;;  %v5593_v47 = vld [vmem:[%s10586_s0 + $0x2d2] sm:$0x20]   ;;  %v4323_v20 = vsel %vm25_vm5, %v5586_v22, %v4319_v9  ;;  %v5598_v10 = vld [vmem:[%s10586_s0 + $0xab] sm:$0x2]   ;;  %v4349_v3 = vsel %vm17_vm3, %v5592_v19, %v4345_v0  ;;  %v10314_v22 = vpop.permute.xlu0 %3045  }
 0x188   :  { %v5594_v49 = vld [vmem:[%s10586_s0 + $0x351] sm:$0x40]   ;;  %v4327_v11 = vsel %vm29_vm6, %v5587_v26, %v4323_v20  ;;  %5102 = vst.msk [vmem:[%s10587_s1 + $0x2] ss:$3 sm:$0xff] %vm2388_vm12, %v9615_v50   ;;  %v4372_v50 = vsel %vm5_vm0, %v5598_v10, %v5597_v30  ;;  %v5600_v63 = vld [vmem:[%s10586_s0 + $0x1a9] sm:$0x8]   ;;  %v4353_v1 = vsel %vm21_vm4, %v5593_v47, %v4349_v3 }
 0x189   :  { %v5595_v7 = vld [vmem:[%s10586_s0 + $0x3d0] sm:$0x80]   ;;  %5111 = vst.msk [vmem:[%s10587_s1 + $0x1] ss:$3 sm:$0xff] %vm2423_vm13, %v9648_v42   ;;  %v5599_v42 = vld [vmem:[%s10586_s0 + $0x12a] sm:$0x4]   ;;  %4328 = vrot.lane.b32.xlu1 %v4327_v11, %s5880_s2  ;;  %v4357_v8 = vsel %vm25_vm5, %v5594_v49, %v4353_v1 }
 0x18a   :  { %v5601_v41 = vld [vmem:[%s10586_s0 + $0x228] sm:$0x10]   ;;  %v4376_v32 = vsel %vm9_vm1, %v5599_v42, %v4372_v50  ;;  %v5606_v61 = vld [vmem:[%s10586_s0 + $0x1] sm:$0x1]   ;;  %v4361_v56 = vsel %vm29_vm6, %v5595_v7, %v4357_v8  ;;  %vm2458_vm14 = vcmask 515552   ;;  %vm2492_vm15 = vcmask 507352  }
 0x18b   :  { %v5602_v45 = vld [vmem:[%s10586_s0 + $0x2a7] sm:$0x20]   ;;  %v4380_v35 = vsel %vm13_vm2, %v5600_v63, %v4376_v32  ;;  %v5607_v29 = vld [vmem:[%s10586_s0 + $0x80] sm:$0x2]   ;;  %4362 = vrot.lane.b32.xlu0 %v4361_v56, %s5881_s19  ;;  %v5614_v4 = vld [vmem:[%s10586_s0 + $0x56] sm:$0x1]   ;;  %v3115_v32 = vpop.permute.xlu0 %3114  }
 0x18c   :  { %v5603_v53 = vld [vmem:[%s10586_s0 + $0x326] sm:$0x40]   ;;  %v4384_v39 = vsel %vm17_vm3, %v5601_v41, %v4380_v35  ;;  %v4407_v37 = vsel %vm5_vm0, %v5607_v29, %v5606_v61  ;;  %v5608_v59 = vld [vmem:[%s10586_s0 + $0xff] sm:$0x4]   ;;  %v5615_v33 = vld [vmem:[%s10586_s0 + $0xd5] sm:$0x2]  }
 0x18d   :  { %v5604_v5 = vld [vmem:[%s10586_s0 + $0x3a5] sm:$0x80]   ;;  %v5609_v31 = vld [vmem:[%s10586_s0 + $0x17e] sm:$0x8]   ;;  %v4388_v24 = vsel %vm21_vm4, %v5602_v45, %v4384_v39  ;;  %v4411_v6 = vsel %vm9_vm1, %v5608_v59, %v4407_v37  ;;  %2459 = vst.msk [vmem:[%s10587_s1] ss:$3 sm:$0xff] %vm2458_vm14, %v9689_v23   ;;  %v4441_v23 = vsel %vm5_vm0, %v5615_v33, %v5614_v4 }
 0x18e   :  { %v5610_v38 = vld [vmem:[%s10586_s0 + $0x1fd] sm:$0x10]   ;;  %v4392_v26 = vsel %vm25_vm5, %v5603_v53, %v4388_v24  ;;  %v4415_v40 = vsel %vm13_vm2, %v5609_v31, %v4411_v6  ;;  %5128 = vst.msk [vmem:[%s10587_s1 + $0x2] ss:$3 sm:$0xff] %vm2492_vm15, %v9722_v18   ;;  %v5616_v18 = vld [vmem:[%s10586_s0 + $0x154] sm:$0x4]  }
 0x18f   :  { %v5611_v25 = vld [vmem:[%s10586_s0 + $0x27c] sm:$0x20]   ;;  %v4396_v51 = vsel %vm29_vm6, %v5604_v5, %v4392_v26  ;;  %v4419_v21 = vsel %vm17_vm3, %v5610_v38, %v4415_v40  ;;  %v5617_v36 = vld [vmem:[%s10586_s0 + $0x1d3] sm:$0x8]   ;;  %s5882_s12 = smov 4   ;;  %v4445_v2 = vsel %vm9_vm1, %v5616_v18, %v4441_v23  ;;  %s5883_s29 = smov 3  }
 0x190   :  { %v5612_v44 = vld [vmem:[%s10586_s0 + $0x2fb] sm:$0x40]   ;;  %v5618_v62 = vld [vmem:[%s10586_s0 + $0x252] sm:$0x10]   ;;  %4397 = vrot.lane.b32.xlu1 %v4396_v51, %s5882_s12  ;;  %v4423_v16 = vsel %vm21_vm4, %v5611_v25, %v4419_v21  ;;  %v4449_v49 = vsel %vm13_vm2, %v5617_v36, %v4445_v2  ;;  %v5623_v20 = vld [vmem:[%s10586_s0 + $0x2b] sm:$0x1]  }
 0x191   :  { %v5613_v48 = vld [vmem:[%s10586_s0 + $0x37a] sm:$0x80]   ;;  %v5619_v19 = vld [vmem:[%s10586_s0 + $0x2d1] sm:$0x20]   ;;  %v4427_v47 = vsel %vm25_vm5, %v5612_v44, %v4423_v16  ;;  %v5624_v0 = vld [vmem:[%s10586_s0 + $0xaa] sm:$0x2]   ;;  %v4453_v10 = vsel %vm17_vm3, %v5618_v62, %v4449_v49 }
 0x192   :  { %v5620_v9 = vld [vmem:[%s10586_s0 + $0x350] sm:$0x40]   ;;  %v4431_v30 = vsel %vm29_vm6, %v5613_v48, %v4427_v47  ;;  %v4476_v11 = vsel %vm5_vm0, %v5624_v0, %v5623_v20  ;;  %v5625_v3 = vld [vmem:[%s10586_s0 + $0x129] sm:$0x4]   ;;  %v4457_v63 = vsel %vm21_vm4, %v5619_v19, %v4453_v10  ;;  %vm2527_vm0 = vcmask 499152   ;;  %s5884_s9 = smov 2  }
 0x193   :  { %v5621_v7 = vld [vmem:[%s10586_s0 + $0x3cf] sm:$0x80]   ;;  %v5626_v50 = vld [vmem:[%s10586_s0 + $0x1a8] sm:$0x8]   ;;  %4432 = vrot.lane.b32.xlu0 %v4431_v30, %s5883_s29  ;;  %v4480_v41 = vsel %vm9_vm1, %v5625_v3, %v4476_v11  ;;  %v4461_v45 = vsel %vm25_vm5, %v5620_v9, %v4457_v63  ;;  %vm2562_vm1 = vcmask 490952   ;;  %vm2700_vm7 = vcmask 458152  }
 0x194   :  { %v5627_v42 = vld [vmem:[%s10586_s0 + $0x227] sm:$0x10]   ;;  %v4484_v53 = vsel %vm13_vm2, %v5626_v50, %v4480_v41  ;;  %v4465_v8 = vsel %vm29_vm6, %v5621_v7, %v4461_v45  ;;  %5137 = vst.msk [vmem:[%s10587_s1 + $0x1] ss:$3 sm:$0xff] %vm2527_vm0, %v9763_v58   ;;  %vm2596_vm2 = vcmask 482752   ;;  %vm2735_vm8 = vcmask 449952  }
 0x195   :  { %v5628_v1 = vld [vmem:[%s10586_s0 + $0x2a6] sm:$0x20]   ;;  %v4488_v35 = vsel %vm17_vm3, %v5627_v42, %v4484_v53  ;;  %2563 = vst.msk [vmem:[%s10587_s1] ss:$3 sm:$0xff] %vm2562_vm1, %v9796_v60   ;;  %vm2631_vm3 = vcmask 474552   ;;  %4466 = vrot.lane.b32.xlu1 %v4465_v8, %s5884_s9  ;;  %v3150_v60 = vpop.permute.xlu1 %3149   ;;  %vm2804_vm9 = vcmask 433552  }
 0x196   :  { %v5629_v5 = vld [vmem:[%s10586_s0 + $0x325] sm:$0x40]   ;;  %v4492_v58 = vsel %vm21_vm4, %v5628_v1, %v4488_v35  ;;  %5154 = vst.msk [vmem:[%s10587_s1 + $0x2] ss:$3 sm:$0xff] %vm2596_vm2, %v9837_v15   ;;  %vm2666_vm4 = vcmask 466352   ;;  %vm2839_vm10 = vcmask 425352  }
 0x197   :  { %v5630_v61 = vld [vmem:[%s10586_s0 + $0x3a4] sm:$0x80]   ;;  %5163 = vst.msk [vmem:[%s10587_s1 + $0x1] ss:$3 sm:$0xff] %vm2631_vm3, %v9870_v27   ;;  %v4496_v15 = vsel %vm25_vm5, %v5629_v5, %v4492_v58  ;;  %vm2770_vm5 = vcmask 441752   ;;  %vm2908_vm11 = vcmask 408952  }
 0x198   :  { %2667 = vst.msk [vmem:[%s10587_s1] ss:$3 sm:$0xff] %vm2666_vm4, %v9911_v54   ;;  %v4500_v27 = vsel %vm29_vm6, %v5630_v61, %v4496_v15  ;;  %vm2874_vm6 = vcmask 417152   ;;  %vm2943_vm12 = vcmask 400752   ;;  %s5885_s26 = smov 1   ;;  %vm2978_vm13 = vcmask 392552   ;;  %v3185_v54 = vpop.permute.xlu0 %3184  }
 0x199   :  { %5180 = vst.msk [vmem:[%s10587_s1 + $0x2] ss:$3 sm:$0xff] %vm2700_vm7, %v9944_v13   ;;  %4501 = vrot.lane.b32.xlu0 %v4500_v27, %s5885_s26  ;;  %vm3012_vm14 = vcmask 384352   ;;  %vm3047_vm15 = vcmask 376152   ;;  %vm3082_vm0 = vcmask 367952   ;;  %vm3116_vm1 = vcmask 359752   ;;  %v3219_v13 = vpop.permute.xlu1 %3218  }
 0x19a   :  { %5189 = vst.msk [vmem:[%s10587_s1 + $0x1] ss:$3 sm:$0xff] %vm2735_vm8, %v9985_v34   ;;  %vm3151_vm2 = vcmask 351552   ;;  %vm3186_vm3 = vcmask 343352   ;;  %vm3220_vm4 = vcmask 335152   ;;  %vm3255_vm7 = vcmask 326952  }
 0x19b   :  { %2771 = vst.msk [vmem:[%s10587_s1] ss:$3 sm:$0xff] %vm2770_vm5, %v10018_v52   ;;  %vm3290_vm8 = vcmask 318752   ;;  %vm3324_vm5 = vcmask 310552  }
 0x19c   :  { %5206 = vst.msk [vmem:[%s10587_s1 + $0x2] ss:$3 sm:$0xff] %vm2804_vm9, %v10059_v17   ;;  %v3254_v34 = vpop.permute.xlu0 %3253   ;;  %vm3359_vm9 = vcmask 302352  }
 0x19d   :  { %5215 = vst.msk [vmem:[%s10587_s1 + $0x1] ss:$3 sm:$0xff] %vm2839_vm10, %v10092_v14   ;;  %v3289_v52 = vpop.permute.xlu1 %3288   ;;  %vm3394_vm10 = vcmask 294152  }
 0x19e   :  { %2875 = vst.msk [vmem:[%s10587_s1] ss:$3 sm:$0xff] %vm2874_vm6, %v10133_v57   ;;  %vm3428_vm6 = vcmask 285952  }
 0x19f   :  { %5232 = vst.msk [vmem:[%s10587_s1 + $0x2] ss:$3 sm:$0xff] %vm2908_vm11, %v10166_v55   ;;  %vm3463_vm11 = vcmask 277752  }
 0x1a0   :  { %5241 = vst.msk [vmem:[%s10587_s1 + $0x1] ss:$3 sm:$0xff] %vm2943_vm12, %v10207_v28   ;;  %v3323_v17 = vpop.permute.xlu0 %3322   ;;  %vm3498_vm12 = vcmask 269552  }
 0x1a1   :  { %2979 = vst.msk [vmem:[%s10587_s1] ss:$3 sm:$0xff] %vm2978_vm13, %v10240_v43   ;;  %v3358_v14 = vpop.permute.xlu1 %3357   ;;  %vm3532_vm13 = vcmask 261352  }
 0x1a2   :  { %5258 = vst.msk [vmem:[%s10587_s1 + $0x2] ss:$3 sm:$0xff] %vm3012_vm14, %v10281_v12   ;;  %vm3567_vm14 = vcmask 253152  }
 0x1a3   :  { %5267 = vst.msk [vmem:[%s10587_s1 + $0x1] ss:$3 sm:$0xff] %vm3047_vm15, %v10314_v22   ;;  %vm3602_vm15 = vcmask 244952  }
 0x1a4   :  { %3083 = vst.msk [vmem:[%s10587_s1] ss:$3 sm:$0xff] %vm3082_vm0, %v10352_v46   ;;  %v3393_v57 = vpop.permute.xlu0 %3392   ;;  %vm3636_vm0 = vcmask 236752  }
 0x1a5   :  { %5284 = vst.msk [vmem:[%s10587_s1 + $0x2] ss:$3 sm:$0xff] %vm3116_vm1, %v3115_v32   ;;  %v3427_v55 = vpop.permute.xlu1 %3426   ;;  %vm3671_vm1 = vcmask 228552  }
 0x1a6   :  { %5293 = vst.msk [vmem:[%s10587_s1 + $0x1] ss:$3 sm:$0xff] %vm3151_vm2, %v3150_v60   ;;  %vm3706_vm2 = vcmask 220352  }
 0x1a7   :  { %3187 = vst.msk [vmem:[%s10587_s1] ss:$3 sm:$0xff] %vm3186_vm3, %v3185_v54   ;;  %vm3740_vm3 = vcmask 212152  }
 0x1a8   :  { %5310 = vst.msk [vmem:[%s10587_s1 + $0x2] ss:$3 sm:$0xff] %vm3220_vm4, %v3219_v13   ;;  %v3462_v28 = vpop.permute.xlu0 %3461   ;;  %vm3775_vm4 = vcmask 203952  }
 0x1a9   :  { %5319 = vst.msk [vmem:[%s10587_s1 + $0x1] ss:$3 sm:$0xff] %vm3255_vm7, %v3254_v34   ;;  %vm3810_vm7 = vcmask 195752  }
 0x1aa   :  { %3291 = vst.msk [vmem:[%s10587_s1] ss:$3 sm:$0xff] %vm3290_vm8, %v3289_v52   ;;  %vm3844_vm8 = vcmask 187552  }
 0x1ab   :  { %5336 = vst.msk [vmem:[%s10587_s1 + $0x2] ss:$3 sm:$0xff] %vm3324_vm5, %v3323_v17   ;;  %v3497_v43 = vpop.permute.xlu1 %3496   ;;  %vm3879_vm5 = vcmask 179352  }
 0x1ac   :  { %5345 = vst.msk [vmem:[%s10587_s1 + $0x1] ss:$3 sm:$0xff] %vm3359_vm9, %v3358_v14   ;;  %vm3914_vm9 = vcmask 171152  }
 0x1ad   :  { %3395 = vst.msk [vmem:[%s10587_s1] ss:$3 sm:$0xff] %vm3394_vm10, %v3393_v57   ;;  %v3531_v12 = vpop.permute.xlu0 %3530   ;;  %vm3948_vm10 = vcmask 162952  }
 0x1ae   :  { %5362 = vst.msk [vmem:[%s10587_s1 + $0x2] ss:$3 sm:$0xff] %vm3428_vm6, %v3427_v55   ;;  %vm3983_vm6 = vcmask 154752  }
 0x1af   :  { %5371 = vst.msk [vmem:[%s10587_s1 + $0x1] ss:$3 sm:$0xff] %vm3463_vm11, %v3462_v28   ;;  %vm4018_vm11 = vcmask 146552  }
 0x1b0   :  { %3499 = vst.msk [vmem:[%s10587_s1] ss:$3 sm:$0xff] %vm3498_vm12, %v3497_v43   ;;  %vm4052_vm12 = vcmask 138352  }
 0x1b1   :  { %5388 = vst.msk [vmem:[%s10587_s1 + $0x2] ss:$3 sm:$0xff] %vm3532_vm13, %v3531_v12   ;;  %vm4087_vm13 = vcmask 130152  }
 0x1b2   :  { %v3566_v29 = vpop.permute.xlu1 %3565  }
 0x1b3   :  { %5397 = vst.msk [vmem:[%s10587_s1 + $0x1] ss:$3 sm:$0xff] %vm3567_vm14, %v3566_v29   ;;  %vm4122_vm14 = vcmask 121952  }
 0x1b5   :  { %v3601_v56 = vpop.permute.xlu0 %3600  }
 0x1b6   :  { %3603 = vst.msk [vmem:[%s10587_s1] ss:$3 sm:$0xff] %vm3602_vm15, %v3601_v56   ;;  %vm4156_vm15 = vcmask 113752  }
 0x1b7   :  { %v3635_v39 = vpop.permute.xlu1 %3634  }
 0x1b8   :  { %5414 = vst.msk [vmem:[%s10587_s1 + $0x2] ss:$3 sm:$0xff] %vm3636_vm0, %v3635_v39   ;;  %vm4191_vm0 = vcmask 105552  }
 0x1bb   :  { %v3670_v37 = vpop.permute.xlu0 %3669  }
 0x1bc   :  { %5423 = vst.msk [vmem:[%s10587_s1 + $0x1] ss:$3 sm:$0xff] %vm3671_vm1, %v3670_v37   ;;  %vm4226_vm1 = vcmask 97352  }
 0x1bf   :  { %v3705_v59 = vpop.permute.xlu1 %3704  }
 0x1c0   :  { %3707 = vst.msk [vmem:[%s10587_s1] ss:$3 sm:$0xff] %vm3706_vm2, %v3705_v59   ;;  %vm4260_vm2 = vcmask 89152  }
 0x1c1   :  { %v3739_v31 = vpop.permute.xlu0 %3738  }
 0x1c2   :  { %5440 = vst.msk [vmem:[%s10587_s1 + $0x2] ss:$3 sm:$0xff] %vm3740_vm3, %v3739_v31   ;;  %vm4295_vm3 = vcmask 80952  }
 0x1c6   :  { %v3774_v38 = vpop.permute.xlu1 %3773  }
 0x1c7   :  { %5449 = vst.msk [vmem:[%s10587_s1 + $0x1] ss:$3 sm:$0xff] %vm3775_vm4, %v3774_v38   ;;  %vm4330_vm4 = vcmask 72752  }
 0x1c9   :  { %v3809_v24 = vpop.permute.xlu0 %3808  }
 0x1ca   :  { %3811 = vst.msk [vmem:[%s10587_s1] ss:$3 sm:$0xff] %vm3810_vm7, %v3809_v24   ;;  %vm4364_vm7 = vcmask 64552  }
 0x1cb   :  { %v3843_v6 = vpop.permute.xlu1 %3842  }
 0x1cc   :  { %5466 = vst.msk [vmem:[%s10587_s1 + $0x2] ss:$3 sm:$0xff] %vm3844_vm8, %v3843_v6   ;;  %vm4399_vm8 = vcmask 56352  }
 0x1cf   :  { %v3878_v25 = vpop.permute.xlu0 %3877  }
 0x1d0   :  { %5475 = vst.msk [vmem:[%s10587_s1 + $0x1] ss:$3 sm:$0xff] %vm3879_vm5, %v3878_v25   ;;  %vm4434_vm5 = vcmask 48152  }
 0x1d3   :  { %v3913_v44 = vpop.permute.xlu1 %3912  }
 0x1d4   :  { %3915 = vst.msk [vmem:[%s10587_s1] ss:$3 sm:$0xff] %vm3914_vm9, %v3913_v44   ;;  %vm4468_vm9 = vcmask 39952  }
 0x1d5   :  { %v3947_v48 = vpop.permute.xlu0 %3946  }
 0x1d6   :  { %5492 = vst.msk [vmem:[%s10587_s1 + $0x2] ss:$3 sm:$0xff] %vm3948_vm10, %v3947_v48   ;;  %vm4503_vm10 = vcmask 31752  }
 0x1da   :  { %v3982_v22 = vpop.permute.xlu1 %3981  }
 0x1db   :  { %5501 = vst.msk [vmem:[%s10587_s1 + $0x1] ss:$3 sm:$0xff] %vm3983_vm6, %v3982_v22  }
 0x1dd   :  { %v4017_v26 = vpop.permute.xlu0 %4016  }
 0x1de   :  { %4019 = vst.msk [vmem:[%s10587_s1] ss:$3 sm:$0xff] %vm4018_vm11, %v4017_v26  }
 0x1df   :  { %v4051_v40 = vpop.permute.xlu1 %4050  }
 0x1e0   :  { %5518 = vst.msk [vmem:[%s10587_s1 + $0x2] ss:$3 sm:$0xff] %vm4052_vm12, %v4051_v40  }
 0x1e3   :  { %v4086_v4 = vpop.permute.xlu0 %4085  }
 0x1e4   :  { %5527 = vst.msk [vmem:[%s10587_s1 + $0x1] ss:$3 sm:$0xff] %vm4087_vm13, %v4086_v4  }
 0x1e7   :  { %v4121_v33 = vpop.permute.xlu1 %4120  }
 0x1e8   :  { %4123 = vst.msk [vmem:[%s10587_s1] ss:$3 sm:$0xff] %vm4122_vm14, %v4121_v33  }
 0x1e9   :  { %v4155_v51 = vpop.permute.xlu0 %4154  }
 0x1ea   :  { %5544 = vst.msk [vmem:[%s10587_s1 + $0x2] ss:$3 sm:$0xff] %vm4156_vm15, %v4155_v51  }
 0x1ee   :  { %v4190_v21 = vpop.permute.xlu1 %4189  }
 0x1ef   :  { %5553 = vst.msk [vmem:[%s10587_s1 + $0x1] ss:$3 sm:$0xff] %vm4191_vm0, %v4190_v21  }
 0x1f1   :  { %v4225_v23 = vpop.permute.xlu0 %4224  }
 0x1f2   :  { %4227 = vst.msk [vmem:[%s10587_s1] ss:$3 sm:$0xff] %vm4226_vm1, %v4225_v23  }
 0x1f3   :  { %v4259_v18 = vpop.permute.xlu1 %4258  }
 0x1f4   :  { %5570 = vst.msk [vmem:[%s10587_s1 + $0x2] ss:$3 sm:$0xff] %vm4260_vm2, %v4259_v18  }
 0x1f7   :  { %v4294_v36 = vpop.permute.xlu0 %4293  }
 0x1f8   :  { %5579 = vst.msk [vmem:[%s10587_s1 + $0x1] ss:$3 sm:$0xff] %vm4295_vm3, %v4294_v36  }
 0x1fb   :  { %v4329_v62 = vpop.permute.xlu1 %4328  }
 0x1fc   :  { %4331 = vst.msk [vmem:[%s10587_s1] ss:$3 sm:$0xff] %vm4330_vm4, %v4329_v62  }
 0x1fd   :  { %v4363_v16 = vpop.permute.xlu0 %4362  }
 0x1fe   :  { %5596 = vst.msk [vmem:[%s10587_s1 + $0x2] ss:$3 sm:$0xff] %vm4364_vm7, %v4363_v16  }
 0x202   :  { %v4398_v2 = vpop.permute.xlu1 %4397  }
 0x203   :  { %5605 = vst.msk [vmem:[%s10587_s1 + $0x1] ss:$3 sm:$0xff] %vm4399_vm8, %v4398_v2  }
 0x205   :  { %v4433_v19 = vpop.permute.xlu0 %4432  }
 0x206   :  { %4435 = vst.msk [vmem:[%s10587_s1] ss:$3 sm:$0xff] %vm4434_vm5, %v4433_v19  }
 0x207   :  { %v4467_v9 = vpop.permute.xlu1 %4466  }
 0x208   :  { %5622 = vst.msk [vmem:[%s10587_s1 + $0x2] ss:$3 sm:$0xff] %vm4468_vm9, %v4467_v9  }
 0x20b   :  { %v4502_v46 = vpop.permute.xlu0 %4501  }
 0x20c   :  { %5631 = vst.msk [vmem:[%s10587_s1 + $0x1] ss:$3 sm:$0xff] %vm4503_vm10, %v4502_v46  }

// kernel: _neus_loss_impl.1
= control target key start
LH: loop header
LB: loop body
LE: loop exit
PB: predicated region body
PF: predicated region fallthrough
CT: control target
= control target key end

     0   :  { %s622_s15 = smov 0   ;;  %s624_s16 = smov 0   ;;  %s683_s0 = inlined_call_operand.vmem [shape: f32[24,128], index: 0, kind: input, shape index: {}]   ;;  %s684_s1 = inlined_call_operand.vmem [shape: f32[24,128], index: 1, kind: input, shape index: {}]   ;;  %s685_s2 = inlined_call_operand.vmem [shape: f32[3,8,128], index: 2, kind: input, shape index: {}]   ;;  %s686_s3 = inlined_call_operand.vmem [shape: f32[2,8,128], index: 3, kind: output, shape index: {0}]   ;;  %s687_s4 = inlined_call_operand.vmem [shape: f32[2,8,128], index: 4, kind: output, shape index: {1}]  }
   0x1   :  { %s626_s17 = smov 0  }
   0x2 LB: > { %s27_s18 = sadd.s32 1, %s590_s16  ;;  %p529_p0 = scmp.ge.s32.totalorder %s594_s17, 1  ;;  %s594_s17 = sphi %s626_s17, %s15_s17   ;;  %s590_s16 = sphi %s624_s16, %s689_s16   ;;  %s586_s15 = sphi %s622_s15, %s688_s15  }
   0x3   : > { %p29_p1 = scmp.ge.s32.totalorder %s27_s18, 2  ;;  %p234_p2 = scmp.lt.s32.totalorder %s594_s17, 3 }
   0x5   : > { %s691_s18 = smov (%p29_p1, %s27_s18), 0  ;;  %p235_p3 = pnand %p529_p0, %p234_p2 }
   0x6   : > { %p282_p4 = scmp.lt.s32.totalorder (!%p235_p3), %s586_s15, 0  ;;  %p315_p5 = scmp.lt.s32.totalorder (!%p235_p3), %s586_s15, 1 }
   0x7   : > { %238 = sbr.rel (%p235_p3) target bundleno = 59 (0x3b), region = 32  ;;  %p538_p7 = scmp.ge.s32.totalorder (!%p235_p3), %s586_s15, 1 }
   0xc   : > { %s283_s19 = scalar_select %p282_p4, %s586_s15, 0  ;;  %v596_v0 = vmov 0.0  }
   0xd   : > { %s316_s20 = scalar_select %p315_p5, %s586_s15, 1 }
   0xe   : > { %s284_s21 = smul.u32 3, %s283_s19  ;;  %s693_s19 = smov (!%p282_p4, %s283_s19), 0 }
   0xf   : > { %s536_s22 = sshll.u32 %s316_s20, 3  ;;  %s535_s23 = sshll.u32 %s693_s19, 3 }
  0x10   : > { %p285_p6 = scmp.lt.s32.totalorder %s284_s21, 2  ;;  %s649_s26 = scalar_lea.vmem %s686_s3, %s536_s22 }
  0x11   : > { %328 = vst [vmem:[%s649_s26] sm:$0xff] %v596_v0  ;;  %s311_s29 = scalar_lea.vmem %s685_s2, %s535_s23  ;;  %s658_s6 = scalar_lea.vmem %s687_s4, %s536_s22 }
  0x12   : > { %s695_s21 = smov (!%p285_p6, %s284_s21), 2  ;;  %329 = vst [vmem:[%s658_s6] sm:$0xff] %v596_v0  ;;  %333 = sbr.rel (%p538_p7) target bundleno = 59 (0x3b), region = 40 }
  0x13   : > { %s530_s7 = sshll.u32 %s695_s21, 3  ;;  %s340_s14 = smul.u32 (!%p538_p7), 3072, %s586_s15 }
  0x14   : > { %s288_s10 = scalar_lea.vmem %s683_s0, %s530_s7  ;;  %s300_s13 = scalar_lea.vmem %s684_s1, %s530_s7 }
  0x15   : > { %s539_s19 = sshll.u32 (!%p538_p7), %s586_s15, 10 }
  0x17   : > { %v334_v1 = vlaneseq  ;;  %v351_v2 = vld [vmem:[%s300_s13] sm:$0xff]  ;;  %v352_v3 = vld [vmem:[%s300_s13 + $0x8] sm:$0xff]  ;;  %v353_v4 = vld [vmem:[%s300_s13 + $0x10] sm:$0xff]  ;;  %v344_v12 = vstv %s340_s14 }
  0x18   : > { %v354_v5 = vadd.f32 1.0, %v351_v2  ;;  %v355_v6 = vadd.f32 1.0, %v352_v3  ;;  %v356_v7 = vadd.f32 1.0, %v353_v4  ;;  %v360_v8 = vld [vmem:[%s288_s10] sm:$0xff]  ;;  %v361_v9 = vld [vmem:[%s288_s10 + $0x8] sm:$0xff]  ;;  %v362_v13 = vld [vmem:[%s288_s10 + $0x10] sm:$0xff]  ;;  %v381_v49 = vstv %s539_s19 }
  0x19   : > { %v335_v10 = vshrl.u32 %v334_v1, 7  ;;  %v339_v11 = vand.u32 127, %v334_v1  ;;  %v384_v14 = vld [vmem:[%s311_s29] sm:$0xff]  ;;  %v540_v15 = vld [vmem:[%s311_s29 + $0x8] sm:$0xff]  ;;  %v541_v19 = vld [vmem:[%s311_s29 + $0x10] sm:$0xff] }
  0x1a   : > { %v357_v16 = vmul.f32 0.5, %v354_v5  ;;  %v358_v17 = vmul.f32 0.5, %v355_v6  ;;  %v359_v18 = vmul.f32 0.5, %v356_v7  ;;  %v389_v20 = vmul.f32 %v384_v14, %v384_v14  ;;  %v377_v46 = vld [vmem:[%s649_s26] sm:$0xff] }
  0x1b   : > { %v336_v21 = vadd.s32 8, %v335_v10  ;;  %v337_v22 = vadd.s32 16, %v335_v10  ;;  %v341_v23 = vmul.u32 128, %v335_v10  ;;  %v390_v24 = vmul.f32 %v540_v15, %v540_v15  ;;  %v406_v59 = vld [vmem:[%s658_s6] sm:$0xff] }
  0x1c   : > { %v363_v25 = vsub.f32 %v360_v8, %v357_v16  ;;  %v364_v26 = vsub.f32 %v361_v9, %v358_v17  ;;  %v365_v27 = vsub.f32 %v362_v13, %v359_v18  ;;  %v392_v28 = vmul.f32 %v541_v19, %v541_v19 }
  0x1d   : > { %v342_v29 = vmul.u32 128, %v336_v21  ;;  %v343_v30 = vmul.u32 128, %v337_v22  ;;  %v345_v31 = vadd.s32 %v344_v12, %v341_v23  ;;  %v391_v33 = vadd.f32 %v390_v24, %v389_v20 }
  0x1e   : > { %v366_v32 = vand.u32 2147483647, %v363_v25  ;;  %v367_v37 = vand.u32 2147483647, %v364_v26  ;;  %v368_v38 = vand.u32 2147483647, %v365_v27  ;;  %v382_v50 = vadd.s32 %v381_v49, %v341_v23 }
  0x1f   : > { %v346_v34 = vadd.s32 %v344_v12, %v342_v29  ;;  %v347_v35 = vadd.s32 %v344_v12, %v343_v30  ;;  %v348_v36 = vadd.s32 %v345_v31, %v339_v11  ;;  %v393_v39 = vadd.f32 %v392_v28, %v391_v33 }
  0x20   : > { %v383_v54 = vadd.s32 %v382_v50, %v339_v11 }
  0x21   : > { %v349_v40 = vadd.s32 %v346_v34, %v339_v11  ;;  %v350_v41 = vadd.s32 %v347_v35, %v339_v11  ;;  %vm369_vm0 = vcmp.lt.s32.totalorder %v348_v36, 3072  ;;  %570 = vrsqrt.f32 %v393_v39 }
  0x22   : > { %v372_v42 = vsel %vm369_vm0, %v366_v32, 0.0  ;;  %vm396_vm3 = vcmp.eq.f32.partialorder %v393_v39, inf  ;;  %v399_v52 = vand.u32 2147483648, %v393_v39  ;;  %vm398_vm4 = vcmp.eq.f32.partialorder %v393_v39, 0.0 }
  0x23   : > { %vm370_vm1 = vcmp.lt.s32.totalorder %v349_v40, 3072  ;;  %vm371_vm2 = vcmp.lt.s32.totalorder %v350_v41, 3072  ;;  %vm402_vm5 = vcmp.lt.s32.totalorder %v383_v54, 768 }
  0x24   : > { %v373_v43 = vsel %vm370_vm1, %v367_v37, 0.0  ;;  %v374_v44 = vsel %vm371_vm2, %v368_v38, 0.0 }
  0x25   : > { %v375_v45 = vadd.f32 %v373_v43, %v372_v42 }
  0x27   : > { %v376_v47 = vadd.f32 %v375_v45, %v374_v44 }
  0x29   : > { %v378_v48 = vadd.f32 %v377_v46, %v376_v47 }
  0x2b   : > { %379 = vst [vmem:[%s649_s26] sm:$0xff] %v378_v48 }
  0x2e   : > { %v571_v51 = vpop.eup %570 }
  0x2f   : > { %v395_v53 = vmul.f32 %v571_v51, %v393_v39 }
  0x31   : > { %v397_v55 = vsel %vm396_vm3, %v393_v39, %v395_v53 }
  0x32   : > { %v400_v56 = vsel %vm398_vm4, %v399_v52, %v397_v55 }
  0x33   : > { %v542_v57 = vadd.f32 -1.0, %v400_v56 }
  0x35   : > { %v403_v58 = vmul.f32 %v542_v57, %v542_v57 }
  0x37   : > { %v404_v60 = vsel %vm402_vm5, %v403_v58, 0.0 }
  0x38   : > { %v407_v61 = vadd.f32 %v406_v59, %v404_v60 }
  0x3a   : > { %408 = vst [vmem:[%s658_s6] sm:$0xff] %v407_v61 }
  0x3b PF: > { %s15_s17 = sadd.s32 1, %s594_s17   ;;  %s688_s15 = smov %s590_s16 }
  0x3c   : > { %p12_p8 = scmp.ge.s32.totalorder %s15_s17, 4   ;;  %s689_s16 = smov %s691_s18 }
  0x3e   :  { %14 = sbr.rel (!%p12_p8) target bundleno = 2 (0x2), region = 90 }

</bundles_post_ra>
